<compile_context>
chip_gen: v6e
topology: v6e:2x2x1
jax: 0.10.0
libtpu: 0.0.40
codegen_flags: <defaults>
</compile_context>

<pallas_src>
import functools

import jax
import jax.numpy as jnp
from jax.experimental import pallas as pl
from jax.experimental.pallas import tpu as pltpu


def _round_up(n, m):
    return ((n + m - 1) // m) * m


def lstm_scan_kernel(ax_ref, whT_ref, h_out_ref, h_ref, c_ref, *, t_chunk):
    """One grid step = `t_chunk` recurrence steps for one batch shard.

    ax_ref:      (T, Bs, H) precomputed x @ Wx^T + bx + bh (f32), time-major
    whT_ref:     (H, H)     Wh^T (grid-invariant, resident in VMEM; bf16/f32)
    h_out_ref:   (T, Bs, H) per-step hidden states (lane-dense f32 slab)
    h_ref/c_ref: (Bs, H)    f32 carries, live across the sequential time axis
    """
    # Zero the carries at the first time-chunk of every batch shard.
    # NOTE: only correct because the time axis is the innermost grid axis.
    @pl.when(pl.program_id(1) == 0)
    def _():
        h_ref[...] = jnp.zeros_like(h_ref)
        c_ref[...] = jnp.zeros_like(c_ref)

    whT = whT_ref[...]
    h = h_ref[...]
    c = c_ref[...]
    # Statically unrolled inner loop: t is a Python int, so every slice/store
    # uses static offsets and the scheduler sees the whole chunk at once.
    # TODO(synk): for large t_chunk, bound code size / vreg live ranges with
    # lax.fori_loop(..., unroll=k); if the bundle dump shows a weight re-push
    # per step, keep Wh stationary via pltpu.matmul_push_rhs / matmul_acc_lhs.
    for t in range(t_chunk):
        # bf16 operands, f32 accumulation (MXU-native); carries stay f32.
        a = jnp.dot(h.astype(whT.dtype), whT,
                    preferred_element_type=jnp.float32) + ax_ref[t]
        s = jax.nn.sigmoid(a)               # i == f == o (quirk of the module)
        g = jnp.tanh(a)
        c = s * (c + g)                     # == f*c + i*g
        h = s * jnp.tanh(c)
        h_out_ref[t] = h
    h_ref[...] = h
    c_ref[...] = c


def rnn_module_forward(x, slen, params, *, t_chunk=16, batch_shards=1,
                       matmul_dtype=jnp.bfloat16, lane_pad=128):
    """x: (B, L, D) float32, slen: (B,) int. Returns (L*B, O) float32.

    lane_pad: pad H to a multiple of this.  128 fills a v5e MXU tile; use 256
    on v6e/v7x (2x256x256 MXUs) when the real H justifies it.
    """
    B, L, D = x.shape
    H = params["Wh"].shape[0]
    O = params["Wo"].shape[0]

    # --- Padding: lane-dense H, sublane-aligned batch. -----------------------
    H_pad = _round_up(max(H, lane_pad), lane_pad)
    B_pad = _round_up(B, 8)
    Wh = jnp.zeros((H_pad, H_pad), jnp.float32).at[:H, :H].set(params["Wh"])
    Wx = jnp.zeros((H_pad, D), jnp.float32).at[:H, :].set(params["Wx"])
    Wo = jnp.zeros((O, H_pad), jnp.float32).at[:, :H].set(params["Wo"])
    b_in = jnp.zeros((H_pad,), jnp.float32).at[:H].set(params["bx"] + params["bh"])

    # --- t_chunk / batch_shards legality. ------------------------------------
    t_chunk = max(1, min(int(t_chunk), L))
    while L % t_chunk != 0:          # largest divisor of L <= requested chunk
        t_chunk -= 1
    # Only split across TensorCores (v7x) when each shard stays sublane-aligned
    # (and ideally >= 128 rows so each core's matmul stays MXU-filled).
    if (batch_shards < 1 or B_pad % batch_shards != 0
            or (B_pad // batch_shards) % 8 != 0):
        batch_shards = 1
    b_shard = B_pad // batch_shards

    # --- Hoisted input projection (time-major): one big MXU matmul. ----------
    xT = jnp.transpose(x, (1, 0, 2)).astype(jnp.float32)          # (L, B, D)
    ax = jnp.dot(xT.reshape(L * B, D).astype(matmul_dtype),
                 Wx.T.astype(matmul_dtype),
                 preferred_element_type=jnp.float32)
    ax = (ax + b_in).reshape(L, B, H_pad)
    if B_pad != B:
        ax = jnp.pad(ax, ((0, 0), (0, B_pad - B), (0, 0)))        # (L, B_pad, H_pad)

    whT = Wh.T.astype(matmul_dtype)                               # (H_pad, H_pad)

    # --- Explicit VMEM budget (feedback: default scoped VMEM is far below
    # physical).  2x double-buffered ax + 2x h_out blocks + single Wh^T +
    # carries + 25% / 2 MiB headroom; cap at 64 MiB so the same plan fits a
    # v7x TensorCore.
    blk_bytes = t_chunk * b_shard * H_pad * 4
    wh_bytes = H_pad * H_pad * jnp.dtype(matmul_dtype).itemsize
    carry_bytes = 2 * b_shard * H_pad * 4
    est = 4 * blk_bytes + wh_bytes + carry_bytes
    vmem_limit = int(min(max(est * 5 // 4 + (2 << 20), 16 << 20), 64 << 20))

    # --- Sequential recurrence kernel. ----------------------------------------
    def build(single_buffer_wh):
        wh_kwargs = {"pipeline_mode": pl.Buffered(1)} if single_buffer_wh else {}
        return pl.pallas_call(
            functools.partial(lstm_scan_kernel, t_chunk=t_chunk),
            out_shape=jax.ShapeDtypeStruct((L, B_pad, H_pad), jnp.float32),
            grid_spec=pltpu.PrefetchScalarGridSpec(
                num_scalar_prefetch=0,
                grid=(batch_shards, L // t_chunk),   # time innermost (carries)
                in_specs=[
                    # Time-major A_x chunk: (T, Bs, H), time-blocked.
                    pl.BlockSpec((t_chunk, b_shard, H_pad),
                                 lambda s, i: (i, s, 0)),
                    # Grid-invariant Wh^T, single-buffered to halve its VMEM.
                    pl.BlockSpec((H_pad, H_pad), lambda s, i: (0, 0),
                                 **wh_kwargs),
                ],
                out_specs=pl.BlockSpec((t_chunk, b_shard, H_pad),
                                       lambda s, i: (i, s, 0)),
                scratch_shapes=[pltpu.VMEM((b_shard, H_pad), jnp.float32),  # h
                                pltpu.VMEM((b_shard, H_pad), jnp.float32)],  # c
            ),
            compiler_params=pltpu.CompilerParams(
                # batch shards independent -> "parallel" (v7x dual TC); the
                # time axis carries h/c -> "arbitrary" (sequential).
                dimension_semantics=("parallel", "arbitrary"),
                vmem_limit_bytes=vmem_limit),
        )

    try:
        h_all = build(True)(ax, whT)
    except Exception:
        # TODO(synk): pl.Buffered(1) not supported on this jax build; fall back
        # to the default double-buffered grid-invariant weight.
        h_all = build(False)(ax, whT)

    # --- Batched output head + slen masking, outside the serial loop. --------
    # TODO(synk): when H >> 128, fuse this head (Wo^T resident in VMEM) into the
    # kernel epilogue to avoid writing/re-reading the full (L, B, H) h slab.
    logits = jnp.dot(h_all.reshape(L * B_pad, H_pad), Wo.T,
                     preferred_element_type=jnp.float32) + params["bo"]
    logits = logits.reshape(L, B_pad, O)[:, :B, :]
    out = jnp.transpose(logits, (1, 0, 2))              # (B, L, O) tiny relayout
    tidx = jnp.arange(L, dtype=jnp.int32)
    mask = tidx[None, :, None] >= (slen.astype(jnp.int32)[:, None, None] + 1)
    fill = jax.nn.one_hot(1, O, dtype=jnp.float32)      # [0, 1]
    out = jnp.where(mask, fill[None, None, :], out)
    # (B, L, O) flattened contiguously -> row index b*L + l, identical to the
    # PyTorch .transpose(0, 1).contiguous().view(L*B, O).
    return out.reshape(L * B, O)


def reference_forward(x, slen, params):
    """Pure-JAX reference reproducing the PyTorch forward exactly."""
    B, L, _ = x.shape
    H = params["Wh"].shape[0]
    h = jnp.zeros((B, H), jnp.float32)
    c = jnp.zeros((B, H), jnp.float32)
    hs = []
    for l in range(L):
        xt = x[:, l, :]
        a = (h @ params["Wh"].T + params["bh"]
             + xt @ params["Wx"].T + params["bx"])
        s = jax.nn.sigmoid(a)
        g = jnp.tanh(a)
        c = s * c + s * g
        h = s * jnp.tanh(c)
        hs.append(h)
    hs = jnp.stack(hs)                                  # (L, B, H)
    out = hs @ params["Wo"].T + params["bo"]            # (L, B, O)
    out = jnp.transpose(out, (1, 0, 2))                 # (B, L, O)
    tidx = jnp.arange(L)[None, :, None]
    mask = tidx >= (slen[:, None, None] + 1)
    fill = jnp.array([0.0, 1.0], jnp.float32)[None, None, :]
    out = jnp.where(mask, fill, out)
    return out.reshape(L * B, out.shape[-1])


def init_params(key, input_dim, hidden_dim, output_dim):
    ks = jax.random.split(key, 6)

    def lin(kw, kb, out_d, in_d):
        bound = 1.0 / jnp.sqrt(in_d)
        w = jax.random.uniform(kw, (out_d, in_d), jnp.float32, -bound, bound)
        b = jax.random.uniform(kb, (out_d,), jnp.float32, -bound, bound)
        return w, b

    Wh, bh = lin(ks[0], ks[1], hidden_dim, hidden_dim)
    Wx, bx = lin(ks[2], ks[3], hidden_dim, input_dim)
    Wo, bo = lin(ks[4], ks[5], output_dim, hidden_dim)
    return {"Wh": Wh, "bh": bh, "Wx": Wx, "bx": bx, "Wo": Wo, "bo": bo}


if __name__ == "__main__":
    B, L, D, H, O = 2, 16, 16, 32, 2
    key = jax.random.PRNGKey(0)
    kx, kp = jax.random.split(key)
    x = jax.random.normal(kx, (B, L, D), jnp.float32)
    slen = jnp.array([5, 11], jnp.int32)          # per-example valid lengths
    params = init_params(kp, D, H, O)

    ref = jax.block_until_ready(reference_forward(x, slen, params))

    # Exact-semantics check: f32 MXU operands (matches the f32 PyTorch module).
    out_f32 = jax.block_until_ready(
        rnn_module_forward(x, slen, params, matmul_dtype=jnp.float32))
    assert out_f32.shape == (L * B, O), out_f32.shape
    err32 = float(jnp.max(jnp.abs(out_f32 - ref)))
    assert jnp.allclose(out_f32, ref, atol=1e-4, rtol=1e-4), \
        f"f32 path max abs err {err32}"

    # Recommended fast path: bf16 MXU operands with f32 accumulation/carries
    # (loosened tolerance per the numerics note in the review).
    out_bf16 = jax.block_until_ready(rnn_module_forward(x, slen, params))
    errbf = float(jnp.max(jnp.abs(out_bf16 - ref)))
    assert jnp.allclose(out_bf16, ref, atol=1e-1, rtol=1e-1), \
        f"bf16 path max abs err {errbf}"

    # batch_shards=2 request at this tiny B is gated back to 1 shard (B_pad/2
    # is not a multiple of 8); result must be unchanged.
    out_sh = jax.block_until_ready(
        rnn_module_forward(x, slen, params, batch_shards=2))
    assert jnp.allclose(out_sh, ref, atol=1e-1, rtol=1e-1), \
        f"sharded path max abs err {float(jnp.max(jnp.abs(out_sh - ref)))}"

    print("KERNEL_OK")
</pallas_src>

<mosaic_0001>
module attributes {stable_mosaic.version = 11 : i64} {
  func.func @lstm_scan_kernel(%arg0: i32, %arg1: i32, %arg2: memref<16x8x128xf32, #tpu.memory_space<vmem>>, %arg3: memref<128x128xf32, #tpu.memory_space<vmem>>, %arg4: memref<16x8x128xf32, #tpu.memory_space<vmem>>, %arg5: memref<8x128xf32, #tpu.memory_space<vmem>>, %arg6: memref<8x128xf32, #tpu.memory_space<vmem>>) attributes {dimension_semantics = [#tpu.dimension_semantics<parallel>, #tpu.dimension_semantics<arbitrary>], iteration_bounds = array<i64: 1, 1>, scalar_prefetch = 0 : i64, scratch_operands = 2 : i64, tpu.core_type = #tpu.core_type<tc>, window_params = [{transform_indices = @transform_0, window_bounds = array<i64: 16, 8, 128>}, {pipeline_mode = #tpu.pipeline_mode<synchronous>, transform_indices = @transform_1, window_bounds = array<i64: 128, 128>}, {transform_indices = @transform_2, window_bounds = array<i64: 16, 8, 128>}]} {
    %c0_i32 = arith.constant 0 : i32
    %0 = arith.cmpi eq, %arg1, %c0_i32 : i32
    %1 = arith.extui %0 : i1 to i32
    %c0_i32_0 = arith.constant 0 : i32
    %2 = arith.cmpi ne, %1, %c0_i32_0 : i32
    scf.if %2 {
      %cst_122 = arith.constant 0.000000e+00 : f32
      %280 = vector.broadcast %cst_122 : f32 to vector<8x128xf32>
      %c0_123 = arith.constant 0 : index
      %c0_124 = arith.constant 0 : index
      %281 = vector.load %arg5[%c0_123, %c0_124] : memref<8x128xf32, #tpu.memory_space<vmem>>, vector<8x128xf32>
      tpu.vector_store %arg5[%c0_123, %c0_124], %280 {strides = array<i32>} : memref<8x128xf32, #tpu.memory_space<vmem>>, vector<8x128xf32>,
      %cst_125 = arith.constant 0.000000e+00 : f32
      %282 = vector.broadcast %cst_125 : f32 to vector<8x128xf32>
      %c0_126 = arith.constant 0 : index
      %c0_127 = arith.constant 0 : index
      %283 = vector.load %arg6[%c0_126, %c0_127] : memref<8x128xf32, #tpu.memory_space<vmem>>, vector<8x128xf32>
      tpu.vector_store %arg6[%c0_126, %c0_127], %282 {strides = array<i32>} : memref<8x128xf32, #tpu.memory_space<vmem>>, vector<8x128xf32>,
    } else {
    }
    %c0 = arith.constant 0 : index
    %c0_1 = arith.constant 0 : index
    %3 = vector.load %arg3[%c0, %c0_1] : memref<128x128xf32, #tpu.memory_space<vmem>>, vector<128x128xf32>
    %c0_2 = arith.constant 0 : index
    %c0_3 = arith.constant 0 : index
    %4 = vector.load %arg5[%c0_2, %c0_3] : memref<8x128xf32, #tpu.memory_space<vmem>>, vector<8x128xf32>
    %c0_4 = arith.constant 0 : index
    %c0_5 = arith.constant 0 : index
    %5 = vector.load %arg6[%c0_4, %c0_5] : memref<8x128xf32, #tpu.memory_space<vmem>>, vector<8x128xf32>
    %cst = arith.constant dense<0.000000e+00> : vector<8x128xf32>
    %6 = tpu.matmul %4, %3, %cst {dimension_numbers = #tpu.dot_dimension_numbers<[1], [0], [0], [1], [0, 0, 1, 1], [], []>} : vector<8x128xf32>, vector<128x128xf32>, vector<8x128xf32> -> vector<8x128xf32>
    %c0_6 = arith.constant 0 : index
    %c0_7 = arith.constant 0 : index
    %c0_8 = arith.constant 0 : index
    %7 = vector.load %arg2[%c0_6, %c0_7, %c0_8] : memref<16x8x128xf32, #tpu.memory_space<vmem>>, vector<1x8x128xf32>
    %8 = vector.shape_cast %7 : vector<1x8x128xf32> to vector<8x128xf32>
    %9 = arith.addf %6, %8 : vector<8x128xf32>
    %10 = arith.negf %9 : vector<8x128xf32>
    %11 = math.exp %10 : vector<8x128xf32>
    %cst_9 = arith.constant 1.000000e+00 : f32
    %12 = vector.broadcast %cst_9 : f32 to vector<8x128xf32>
    %13 = arith.addf %12, %11 : vector<8x128xf32>
    %14 = arith.divf %12, %13 : vector<8x128xf32>
    %15 = math.tanh %9 : vector<8x128xf32>
    %16 = arith.addf %5, %15 : vector<8x128xf32>
    %17 = arith.mulf %14, %16 : vector<8x128xf32>
    %18 = math.tanh %17 : vector<8x128xf32>
    %19 = arith.mulf %14, %18 : vector<8x128xf32>
    %c0_10 = arith.constant 0 : index
    %c0_11 = arith.constant 0 : index
    %c0_12 = arith.constant 0 : index
    %20 = vector.load %arg4[%c0_10, %c0_11, %c0_12] : memref<16x8x128xf32, #tpu.memory_space<vmem>>, vector<1x8x128xf32>
    %21 = vector.shape_cast %20 : vector<1x8x128xf32> to vector<8x128xf32>
    %22 = vector.shape_cast %19 : vector<8x128xf32> to vector<1x8x128xf32>
    tpu.vector_store %arg4[%c0_10, %c0_11, %c0_12], %22 {strides = array<i32>} : memref<16x8x128xf32, #tpu.memory_space<vmem>>, vector<1x8x128xf32>,
    %cst_13 = arith.constant dense<0.000000e+00> : vector<8x128xf32>
    %23 = tpu.matmul %19, %3, %cst_13 {dimension_numbers = #tpu.dot_dimension_numbers<[1], [0], [0], [1], [0, 0, 1, 1], [], []>} : vector<8x128xf32>, vector<128x128xf32>, vector<8x128xf32> -> vector<8x128xf32>
    %c1 = arith.constant 1 : index
    %c0_14 = arith.constant 0 : index
    %c0_15 = arith.constant 0 : index
    %24 = vector.load %arg2[%c1, %c0_14, %c0_15] : memref<16x8x128xf32, #tpu.memory_space<vmem>>, vector<1x8x128xf32>
    %25 = vector.shape_cast %24 : vector<1x8x128xf32> to vector<8x128xf32>
    %26 = arith.addf %23, %25 : vector<8x128xf32>
    %27 = arith.negf %26 : vector<8x128xf32>
    %28 = math.exp %27 : vector<8x128xf32>
    %cst_16 = arith.constant 1.000000e+00 : f32
    %29 = vector.broadcast %cst_16 : f32 to vector<8x128xf32>
    %30 = arith.addf %29, %28 : vector<8x128xf32>
    %31 = arith.divf %29, %30 : vector<8x128xf32>
    %32 = math.tanh %26 : vector<8x128xf32>
    %33 = arith.addf %17, %32 : vector<8x128xf32>
    %34 = arith.mulf %31, %33 : vector<8x128xf32>
    %35 = math.tanh %34 : vector<8x128xf32>
    %36 = arith.mulf %31, %35 : vector<8x128xf32>
    %c1_17 = arith.constant 1 : index
    %c0_18 = arith.constant 0 : index
    %c0_19 = arith.constant 0 : index
    %37 = vector.load %arg4[%c1_17, %c0_18, %c0_19] : memref<16x8x128xf32, #tpu.memory_space<vmem>>, vector<1x8x128xf32>
    %38 = vector.shape_cast %37 : vector<1x8x128xf32> to vector<8x128xf32>
    %39 = vector.shape_cast %36 : vector<8x128xf32> to vector<1x8x128xf32>
    tpu.vector_store %arg4[%c1_17, %c0_18, %c0_19], %39 {strides = array<i32>} : memref<16x8x128xf32, #tpu.memory_space<vmem>>, vector<1x8x128xf32>,
    %cst_20 = arith.constant dense<0.000000e+00> : vector<8x128xf32>
    %40 = tpu.matmul %36, %3, %cst_20 {dimension_numbers = #tpu.dot_dimension_numbers<[1], [0], [0], [1], [0, 0, 1, 1], [], []>} : vector<8x128xf32>, vector<128x128xf32>, vector<8x128xf32> -> vector<8x128xf32>
    %c2 = arith.constant 2 : index
    %c0_21 = arith.constant 0 : index
    %c0_22 = arith.constant 0 : index
    %41 = vector.load %arg2[%c2, %c0_21, %c0_22] : memref<16x8x128xf32, #tpu.memory_space<vmem>>, vector<1x8x128xf32>
    %42 = vector.shape_cast %41 : vector<1x8x128xf32> to vector<8x128xf32>
    %43 = arith.addf %40, %42 : vector<8x128xf32>
    %44 = arith.negf %43 : vector<8x128xf32>
    %45 = math.exp %44 : vector<8x128xf32>
    %cst_23 = arith.constant 1.000000e+00 : f32
    %46 = vector.broadcast %cst_23 : f32 to vector<8x128xf32>
    %47 = arith.addf %46, %45 : vector<8x128xf32>
    %48 = arith.divf %46, %47 : vector<8x128xf32>
    %49 = math.tanh %43 : vector<8x128xf32>
    %50 = arith.addf %34, %49 : vector<8x128xf32>
    %51 = arith.mulf %48, %50 : vector<8x128xf32>
    %52 = math.tanh %51 : vector<8x128xf32>
    %53 = arith.mulf %48, %52 : vector<8x128xf32>
    %c2_24 = arith.constant 2 : index
    %c0_25 = arith.constant 0 : index
    %c0_26 = arith.constant 0 : index
    %54 = vector.load %arg4[%c2_24, %c0_25, %c0_26] : memref<16x8x128xf32, #tpu.memory_space<vmem>>, vector<1x8x128xf32>
    %55 = vector.shape_cast %54 : vector<1x8x128xf32> to vector<8x128xf32>
    %56 = vector.shape_cast %53 : vector<8x128xf32> to vector<1x8x128xf32>
    tpu.vector_store %arg4[%c2_24, %c0_25, %c0_26], %56 {strides = array<i32>} : memref<16x8x128xf32, #tpu.memory_space<vmem>>, vector<1x8x128xf32>,
    %cst_27 = arith.constant dense<0.000000e+00> : vector<8x128xf32>
    %57 = tpu.matmul %53, %3, %cst_27 {dimension_numbers = #tpu.dot_dimension_numbers<[1], [0], [0], [1], [0, 0, 1, 1], [], []>} : vector<8x128xf32>, vector<128x128xf32>, vector<8x128xf32> -> vector<8x128xf32>
    %c3 = arith.constant 3 : index
    %c0_28 = arith.constant 0 : index
    %c0_29 = arith.constant 0 : index
    %58 = vector.load %arg2[%c3, %c0_28, %c0_29] : memref<16x8x128xf32, #tpu.memory_space<vmem>>, vector<1x8x128xf32>
    %59 = vector.shape_cast %58 : vector<1x8x128xf32> to vector<8x128xf32>
    %60 = arith.addf %57, %59 : vector<8x128xf32>
    %61 = arith.negf %60 : vector<8x128xf32>
    %62 = math.exp %61 : vector<8x128xf32>
    %cst_30 = arith.constant 1.000000e+00 : f32
    %63 = vector.broadcast %cst_30 : f32 to vector<8x128xf32>
    %64 = arith.addf %63, %62 : vector<8x128xf32>
    %65 = arith.divf %63, %64 : vector<8x128xf32>
    %66 = math.tanh %60 : vector<8x128xf32>
    %67 = arith.addf %51, %66 : vector<8x128xf32>
    %68 = arith.mulf %65, %67 : vector<8x128xf32>
    %69 = math.tanh %68 : vector<8x128xf32>
    %70 = arith.mulf %65, %69 : vector<8x128xf32>
    %c3_31 = arith.constant 3 : index
    %c0_32 = arith.constant 0 : index
    %c0_33 = arith.constant 0 : index
    %71 = vector.load %arg4[%c3_31, %c0_32, %c0_33] : memref<16x8x128xf32, #tpu.memory_space<vmem>>, vector<1x8x128xf32>
    %72 = vector.shape_cast %71 : vector<1x8x128xf32> to vector<8x128xf32>
    %73 = vector.shape_cast %70 : vector<8x128xf32> to vector<1x8x128xf32>
    tpu.vector_store %arg4[%c3_31, %c0_32, %c0_33], %73 {strides = array<i32>} : memref<16x8x128xf32, #tpu.memory_space<vmem>>, vector<1x8x128xf32>,
    %cst_34 = arith.constant dense<0.000000e+00> : vector<8x128xf32>
    %74 = tpu.matmul %70, %3, %cst_34 {dimension_numbers = #tpu.dot_dimension_numbers<[1], [0], [0], [1], [0, 0, 1, 1], [], []>} : vector<8x128xf32>, vector<128x128xf32>, vector<8x128xf32> -> vector<8x128xf32>
    %c4 = arith.constant 4 : index
    %c0_35 = arith.constant 0 : index
    %c0_36 = arith.constant 0 : index
    %75 = vector.load %arg2[%c4, %c0_35, %c0_36] : memref<16x8x128xf32, #tpu.memory_space<vmem>>, vector<1x8x128xf32>
    %76 = vector.shape_cast %75 : vector<1x8x128xf32> to vector<8x128xf32>
    %77 = arith.addf %74, %76 : vector<8x128xf32>
    %78 = arith.negf %77 : vector<8x128xf32>
    %79 = math.exp %78 : vector<8x128xf32>
    %cst_37 = arith.constant 1.000000e+00 : f32
    %80 = vector.broadcast %cst_37 : f32 to vector<8x128xf32>
    %81 = arith.addf %80, %79 : vector<8x128xf32>
    %82 = arith.divf %80, %81 : vector<8x128xf32>
    %83 = math.tanh %77 : vector<8x128xf32>
    %84 = arith.addf %68, %83 : vector<8x128xf32>
    %85 = arith.mulf %82, %84 : vector<8x128xf32>
    %86 = math.tanh %85 : vector<8x128xf32>
    %87 = arith.mulf %82, %86 : vector<8x128xf32>
    %c4_38 = arith.constant 4 : index
    %c0_39 = arith.constant 0 : index
    %c0_40 = arith.constant 0 : index
    %88 = vector.load %arg4[%c4_38, %c0_39, %c0_40] : memref<16x8x128xf32, #tpu.memory_space<vmem>>, vector<1x8x128xf32>
    %89 = vector.shape_cast %88 : vector<1x8x128xf32> to vector<8x128xf32>
    %90 = vector.shape_cast %87 : vector<8x128xf32> to vector<1x8x128xf32>
    tpu.vector_store %arg4[%c4_38, %c0_39, %c0_40], %90 {strides = array<i32>} : memref<16x8x128xf32, #tpu.memory_space<vmem>>, vector<1x8x128xf32>,
    %cst_41 = arith.constant dense<0.000000e+00> : vector<8x128xf32>
    %91 = tpu.matmul %87, %3, %cst_41 {dimension_numbers = #tpu.dot_dimension_numbers<[1], [0], [0], [1], [0, 0, 1, 1], [], []>} : vector<8x128xf32>, vector<128x128xf32>, vector<8x128xf32> -> vector<8x128xf32>
    %c5 = arith.constant 5 : index
    %c0_42 = arith.constant 0 : index
    %c0_43 = arith.constant 0 : index
    %92 = vector.load %arg2[%c5, %c0_42, %c0_43] : memref<16x8x128xf32, #tpu.memory_space<vmem>>, vector<1x8x128xf32>
    %93 = vector.shape_cast %92 : vector<1x8x128xf32> to vector<8x128xf32>
    %94 = arith.addf %91, %93 : vector<8x128xf32>
    %95 = arith.negf %94 : vector<8x128xf32>
    %96 = math.exp %95 : vector<8x128xf32>
    %cst_44 = arith.constant 1.000000e+00 : f32
    %97 = vector.broadcast %cst_44 : f32 to vector<8x128xf32>
    %98 = arith.addf %97, %96 : vector<8x128xf32>
    %99 = arith.divf %97, %98 : vector<8x128xf32>
    %100 = math.tanh %94 : vector<8x128xf32>
    %101 = arith.addf %85, %100 : vector<8x128xf32>
    %102 = arith.mulf %99, %101 : vector<8x128xf32>
    %103 = math.tanh %102 : vector<8x128xf32>
    %104 = arith.mulf %99, %103 : vector<8x128xf32>
    %c5_45 = arith.constant 5 : index
    %c0_46 = arith.constant 0 : index
    %c0_47 = arith.constant 0 : index
    %105 = vector.load %arg4[%c5_45, %c0_46, %c0_47] : memref<16x8x128xf32, #tpu.memory_space<vmem>>, vector<1x8x128xf32>
    %106 = vector.shape_cast %105 : vector<1x8x128xf32> to vector<8x128xf32>
    %107 = vector.shape_cast %104 : vector<8x128xf32> to vector<1x8x128xf32>
    tpu.vector_store %arg4[%c5_45, %c0_46, %c0_47], %107 {strides = array<i32>} : memref<16x8x128xf32, #tpu.memory_space<vmem>>, vector<1x8x128xf32>,
    %cst_48 = arith.constant dense<0.000000e+00> : vector<8x128xf32>
    %108 = tpu.matmul %104, %3, %cst_48 {dimension_numbers = #tpu.dot_dimension_numbers<[1], [0], [0], [1], [0, 0, 1, 1], [], []>} : vector<8x128xf32>, vector<128x128xf32>, vector<8x128xf32> -> vector<8x128xf32>
    %c6 = arith.constant 6 : index
    %c0_49 = arith.constant 0 : index
    %c0_50 = arith.constant 0 : index
    %109 = vector.load %arg2[%c6, %c0_49, %c0_50] : memref<16x8x128xf32, #tpu.memory_space<vmem>>, vector<1x8x128xf32>
    %110 = vector.shape_cast %109 : vector<1x8x128xf32> to vector<8x128xf32>
    %111 = arith.addf %108, %110 : vector<8x128xf32>
    %112 = arith.negf %111 : vector<8x128xf32>
    %113 = math.exp %112 : vector<8x128xf32>
    %cst_51 = arith.constant 1.000000e+00 : f32
    %114 = vector.broadcast %cst_51 : f32 to vector<8x128xf32>
    %115 = arith.addf %114, %113 : vector<8x128xf32>
    %116 = arith.divf %114, %115 : vector<8x128xf32>
    %117 = math.tanh %111 : vector<8x128xf32>
    %118 = arith.addf %102, %117 : vector<8x128xf32>
    %119 = arith.mulf %116, %118 : vector<8x128xf32>
    %120 = math.tanh %119 : vector<8x128xf32>
    %121 = arith.mulf %116, %120 : vector<8x128xf32>
    %c6_52 = arith.constant 6 : index
    %c0_53 = arith.constant 0 : index
    %c0_54 = arith.constant 0 : index
    %122 = vector.load %arg4[%c6_52, %c0_53, %c0_54] : memref<16x8x128xf32, #tpu.memory_space<vmem>>, vector<1x8x128xf32>
    %123 = vector.shape_cast %122 : vector<1x8x128xf32> to vector<8x128xf32>
    %124 = vector.shape_cast %121 : vector<8x128xf32> to vector<1x8x128xf32>
    tpu.vector_store %arg4[%c6_52, %c0_53, %c0_54], %124 {strides = array<i32>} : memref<16x8x128xf32, #tpu.memory_space<vmem>>, vector<1x8x128xf32>,
    %cst_55 = arith.constant dense<0.000000e+00> : vector<8x128xf32>
    %125 = tpu.matmul %121, %3, %cst_55 {dimension_numbers = #tpu.dot_dimension_numbers<[1], [0], [0], [1], [0, 0, 1, 1], [], []>} : vector<8x128xf32>, vector<128x128xf32>, vector<8x128xf32> -> vector<8x128xf32>
    %c7 = arith.constant 7 : index
    %c0_56 = arith.constant 0 : index
    %c0_57 = arith.constant 0 : index
    %126 = vector.load %arg2[%c7, %c0_56, %c0_57] : memref<16x8x128xf32, #tpu.memory_space<vmem>>, vector<1x8x128xf32>
    %127 = vector.shape_cast %126 : vector<1x8x128xf32> to vector<8x128xf32>
    %128 = arith.addf %125, %127 : vector<8x128xf32>
    %129 = arith.negf %128 : vector<8x128xf32>
    %130 = math.exp %129 : vector<8x128xf32>
    %cst_58 = arith.constant 1.000000e+00 : f32
    %131 = vector.broadcast %cst_58 : f32 to vector<8x128xf32>
    %132 = arith.addf %131, %130 : vector<8x128xf32>
    %133 = arith.divf %131, %132 : vector<8x128xf32>
    %134 = math.tanh %128 : vector<8x128xf32>
    %135 = arith.addf %119, %134 : vector<8x128xf32>
    %136 = arith.mulf %133, %135 : vector<8x128xf32>
    %137 = math.tanh %136 : vector<8x128xf32>
    %138 = arith.mulf %133, %137 : vector<8x128xf32>
    %c7_59 = arith.constant 7 : index
    %c0_60 = arith.constant 0 : index
    %c0_61 = arith.constant 0 : index
    %139 = vector.load %arg4[%c7_59, %c0_60, %c0_61] : memref<16x8x128xf32, #tpu.memory_space<vmem>>, vector<1x8x128xf32>
    %140 = vector.shape_cast %139 : vector<1x8x128xf32> to vector<8x128xf32>
    %141 = vector.shape_cast %138 : vector<8x128xf32> to vector<1x8x128xf32>
    tpu.vector_store %arg4[%c7_59, %c0_60, %c0_61], %141 {strides = array<i32>} : memref<16x8x128xf32, #tpu.memory_space<vmem>>, vector<1x8x128xf32>,
    %cst_62 = arith.constant dense<0.000000e+00> : vector<8x128xf32>
    %142 = tpu.matmul %138, %3, %cst_62 {dimension_numbers = #tpu.dot_dimension_numbers<[1], [0], [0], [1], [0, 0, 1, 1], [], []>} : vector<8x128xf32>, vector<128x128xf32>, vector<8x128xf32> -> vector<8x128xf32>
    %c8 = arith.constant 8 : index
    %c0_63 = arith.constant 0 : index
    %c0_64 = arith.constant 0 : index
    %143 = vector.load %arg2[%c8, %c0_63, %c0_64] : memref<16x8x128xf32, #tpu.memory_space<vmem>>, vector<1x8x128xf32>
    %144 = vector.shape_cast %143 : vector<1x8x128xf32> to vector<8x128xf32>
    %145 = arith.addf %142, %144 : vector<8x128xf32>
    %146 = arith.negf %145 : vector<8x128xf32>
    %147 = math.exp %146 : vector<8x128xf32>
    %cst_65 = arith.constant 1.000000e+00 : f32
    %148 = vector.broadcast %cst_65 : f32 to vector<8x128xf32>
    %149 = arith.addf %148, %147 : vector<8x128xf32>
    %150 = arith.divf %148, %149 : vector<8x128xf32>
    %151 = math.tanh %145 : vector<8x128xf32>
    %152 = arith.addf %136, %151 : vector<8x128xf32>
    %153 = arith.mulf %150, %152 : vector<8x128xf32>
    %154 = math.tanh %153 : vector<8x128xf32>
    %155 = arith.mulf %150, %154 : vector<8x128xf32>
    %c8_66 = arith.constant 8 : index
    %c0_67 = arith.constant 0 : index
    %c0_68 = arith.constant 0 : index
    %156 = vector.load %arg4[%c8_66, %c0_67, %c0_68] : memref<16x8x128xf32, #tpu.memory_space<vmem>>, vector<1x8x128xf32>
    %157 = vector.shape_cast %156 : vector<1x8x128xf32> to vector<8x128xf32>
    %158 = vector.shape_cast %155 : vector<8x128xf32> to vector<1x8x128xf32>
    tpu.vector_store %arg4[%c8_66, %c0_67, %c0_68], %158 {strides = array<i32>} : memref<16x8x128xf32, #tpu.memory_space<vmem>>, vector<1x8x128xf32>,
    %cst_69 = arith.constant dense<0.000000e+00> : vector<8x128xf32>
    %159 = tpu.matmul %155, %3, %cst_69 {dimension_numbers = #tpu.dot_dimension_numbers<[1], [0], [0], [1], [0, 0, 1, 1], [], []>} : vector<8x128xf32>, vector<128x128xf32>, vector<8x128xf32> -> vector<8x128xf32>
    %c9 = arith.constant 9 : index
    %c0_70 = arith.constant 0 : index
    %c0_71 = arith.constant 0 : index
    %160 = vector.load %arg2[%c9, %c0_70, %c0_71] : memref<16x8x128xf32, #tpu.memory_space<vmem>>, vector<1x8x128xf32>
    %161 = vector.shape_cast %160 : vector<1x8x128xf32> to vector<8x128xf32>
    %162 = arith.addf %159, %161 : vector<8x128xf32>
    %163 = arith.negf %162 : vector<8x128xf32>
    %164 = math.exp %163 : vector<8x128xf32>
    %cst_72 = arith.constant 1.000000e+00 : f32
    %165 = vector.broadcast %cst_72 : f32 to vector<8x128xf32>
    %166 = arith.addf %165, %164 : vector<8x128xf32>
    %167 = arith.divf %165, %166 : vector<8x128xf32>
    %168 = math.tanh %162 : vector<8x128xf32>
    %169 = arith.addf %153, %168 : vector<8x128xf32>
    %170 = arith.mulf %167, %169 : vector<8x128xf32>
    %171 = math.tanh %170 : vector<8x128xf32>
    %172 = arith.mulf %167, %171 : vector<8x128xf32>
    %c9_73 = arith.constant 9 : index
    %c0_74 = arith.constant 0 : index
    %c0_75 = arith.constant 0 : index
    %173 = vector.load %arg4[%c9_73, %c0_74, %c0_75] : memref<16x8x128xf32, #tpu.memory_space<vmem>>, vector<1x8x128xf32>
    %174 = vector.shape_cast %173 : vector<1x8x128xf32> to vector<8x128xf32>
    %175 = vector.shape_cast %172 : vector<8x128xf32> to vector<1x8x128xf32>
    tpu.vector_store %arg4[%c9_73, %c0_74, %c0_75], %175 {strides = array<i32>} : memref<16x8x128xf32, #tpu.memory_space<vmem>>, vector<1x8x128xf32>,
    %cst_76 = arith.constant dense<0.000000e+00> : vector<8x128xf32>
    %176 = tpu.matmul %172, %3, %cst_76 {dimension_numbers = #tpu.dot_dimension_numbers<[1], [0], [0], [1], [0, 0, 1, 1], [], []>} : vector<8x128xf32>, vector<128x128xf32>, vector<8x128xf32> -> vector<8x128xf32>
    %c10 = arith.constant 10 : index
    %c0_77 = arith.constant 0 : index
    %c0_78 = arith.constant 0 : index
    %177 = vector.load %arg2[%c10, %c0_77, %c0_78] : memref<16x8x128xf32, #tpu.memory_space<vmem>>, vector<1x8x128xf32>
    %178 = vector.shape_cast %177 : vector<1x8x128xf32> to vector<8x128xf32>
    %179 = arith.addf %176, %178 : vector<8x128xf32>
    %180 = arith.negf %179 : vector<8x128xf32>
    %181 = math.exp %180 : vector<8x128xf32>
    %cst_79 = arith.constant 1.000000e+00 : f32
    %182 = vector.broadcast %cst_79 : f32 to vector<8x128xf32>
    %183 = arith.addf %182, %181 : vector<8x128xf32>
    %184 = arith.divf %182, %183 : vector<8x128xf32>
    %185 = math.tanh %179 : vector<8x128xf32>
    %186 = arith.addf %170, %185 : vector<8x128xf32>
    %187 = arith.mulf %184, %186 : vector<8x128xf32>
    %188 = math.tanh %187 : vector<8x128xf32>
    %189 = arith.mulf %184, %188 : vector<8x128xf32>
    %c10_80 = arith.constant 10 : index
    %c0_81 = arith.constant 0 : index
    %c0_82 = arith.constant 0 : index
    %190 = vector.load %arg4[%c10_80, %c0_81, %c0_82] : memref<16x8x128xf32, #tpu.memory_space<vmem>>, vector<1x8x128xf32>
    %191 = vector.shape_cast %190 : vector<1x8x128xf32> to vector<8x128xf32>
    %192 = vector.shape_cast %189 : vector<8x128xf32> to vector<1x8x128xf32>
    tpu.vector_store %arg4[%c10_80, %c0_81, %c0_82], %192 {strides = array<i32>} : memref<16x8x128xf32, #tpu.memory_space<vmem>>, vector<1x8x128xf32>,
    %cst_83 = arith.constant dense<0.000000e+00> : vector<8x128xf32>
    %193 = tpu.matmul %189, %3, %cst_83 {dimension_numbers = #tpu.dot_dimension_numbers<[1], [0], [0], [1], [0, 0, 1, 1], [], []>} : vector<8x128xf32>, vector<128x128xf32>, vector<8x128xf32> -> vector<8x128xf32>
    %c11 = arith.constant 11 : index
    %c0_84 = arith.constant 0 : index
    %c0_85 = arith.constant 0 : index
    %194 = vector.load %arg2[%c11, %c0_84, %c0_85] : memref<16x8x128xf32, #tpu.memory_space<vmem>>, vector<1x8x128xf32>
    %195 = vector.shape_cast %194 : vector<1x8x128xf32> to vector<8x128xf32>
    %196 = arith.addf %193, %195 : vector<8x128xf32>
    %197 = arith.negf %196 : vector<8x128xf32>
    %198 = math.exp %197 : vector<8x128xf32>
    %cst_86 = arith.constant 1.000000e+00 : f32
    %199 = vector.broadcast %cst_86 : f32 to vector<8x128xf32>
    %200 = arith.addf %199, %198 : vector<8x128xf32>
    %201 = arith.divf %199, %200 : vector<8x128xf32>
    %202 = math.tanh %196 : vector<8x128xf32>
    %203 = arith.addf %187, %202 : vector<8x128xf32>
    %204 = arith.mulf %201, %203 : vector<8x128xf32>
    %205 = math.tanh %204 : vector<8x128xf32>
    %206 = arith.mulf %201, %205 : vector<8x128xf32>
    %c11_87 = arith.constant 11 : index
    %c0_88 = arith.constant 0 : index
    %c0_89 = arith.constant 0 : index
    %207 = vector.load %arg4[%c11_87, %c0_88, %c0_89] : memref<16x8x128xf32, #tpu.memory_space<vmem>>, vector<1x8x128xf32>
    %208 = vector.shape_cast %207 : vector<1x8x128xf32> to vector<8x128xf32>
    %209 = vector.shape_cast %206 : vector<8x128xf32> to vector<1x8x128xf32>
    tpu.vector_store %arg4[%c11_87, %c0_88, %c0_89], %209 {strides = array<i32>} : memref<16x8x128xf32, #tpu.memory_space<vmem>>, vector<1x8x128xf32>,
    %cst_90 = arith.constant dense<0.000000e+00> : vector<8x128xf32>
    %210 = tpu.matmul %206, %3, %cst_90 {dimension_numbers = #tpu.dot_dimension_numbers<[1], [0], [0], [1], [0, 0, 1, 1], [], []>} : vector<8x128xf32>, vector<128x128xf32>, vector<8x128xf32> -> vector<8x128xf32>
    %c12 = arith.constant 12 : index
    %c0_91 = arith.constant 0 : index
    %c0_92 = arith.constant 0 : index
    %211 = vector.load %arg2[%c12, %c0_91, %c0_92] : memref<16x8x128xf32, #tpu.memory_space<vmem>>, vector<1x8x128xf32>
    %212 = vector.shape_cast %211 : vector<1x8x128xf32> to vector<8x128xf32>
    %213 = arith.addf %210, %212 : vector<8x128xf32>
    %214 = arith.negf %213 : vector<8x128xf32>
    %215 = math.exp %214 : vector<8x128xf32>
    %cst_93 = arith.constant 1.000000e+00 : f32
    %216 = vector.broadcast %cst_93 : f32 to vector<8x128xf32>
    %217 = arith.addf %216, %215 : vector<8x128xf32>
    %218 = arith.divf %216, %217 : vector<8x128xf32>
    %219 = math.tanh %213 : vector<8x128xf32>
    %220 = arith.addf %204, %219 : vector<8x128xf32>
    %221 = arith.mulf %218, %220 : vector<8x128xf32>
    %222 = math.tanh %221 : vector<8x128xf32>
    %223 = arith.mulf %218, %222 : vector<8x128xf32>
    %c12_94 = arith.constant 12 : index
    %c0_95 = arith.constant 0 : index
    %c0_96 = arith.constant 0 : index
    %224 = vector.load %arg4[%c12_94, %c0_95, %c0_96] : memref<16x8x128xf32, #tpu.memory_space<vmem>>, vector<1x8x128xf32>
    %225 = vector.shape_cast %224 : vector<1x8x128xf32> to vector<8x128xf32>
    %226 = vector.shape_cast %223 : vector<8x128xf32> to vector<1x8x128xf32>
    tpu.vector_store %arg4[%c12_94, %c0_95, %c0_96], %226 {strides = array<i32>} : memref<16x8x128xf32, #tpu.memory_space<vmem>>, vector<1x8x128xf32>,
    %cst_97 = arith.constant dense<0.000000e+00> : vector<8x128xf32>
    %227 = tpu.matmul %223, %3, %cst_97 {dimension_numbers = #tpu.dot_dimension_numbers<[1], [0], [0], [1], [0, 0, 1, 1], [], []>} : vector<8x128xf32>, vector<128x128xf32>, vector<8x128xf32> -> vector<8x128xf32>
    %c13 = arith.constant 13 : index
    %c0_98 = arith.constant 0 : index
    %c0_99 = arith.constant 0 : index
    %228 = vector.load %arg2[%c13, %c0_98, %c0_99] : memref<16x8x128xf32, #tpu.memory_space<vmem>>, vector<1x8x128xf32>
    %229 = vector.shape_cast %228 : vector<1x8x128xf32> to vector<8x128xf32>
    %230 = arith.addf %227, %229 : vector<8x128xf32>
    %231 = arith.negf %230 : vector<8x128xf32>
    %232 = math.exp %231 : vector<8x128xf32>
    %cst_100 = arith.constant 1.000000e+00 : f32
    %233 = vector.broadcast %cst_100 : f32 to vector<8x128xf32>
    %234 = arith.addf %233, %232 : vector<8x128xf32>
    %235 = arith.divf %233, %234 : vector<8x128xf32>
    %236 = math.tanh %230 : vector<8x128xf32>
    %237 = arith.addf %221, %236 : vector<8x128xf32>
    %238 = arith.mulf %235, %237 : vector<8x128xf32>
    %239 = math.tanh %238 : vector<8x128xf32>
    %240 = arith.mulf %235, %239 : vector<8x128xf32>
    %c13_101 = arith.constant 13 : index
    %c0_102 = arith.constant 0 : index
    %c0_103 = arith.constant 0 : index
    %241 = vector.load %arg4[%c13_101, %c0_102, %c0_103] : memref<16x8x128xf32, #tpu.memory_space<vmem>>, vector<1x8x128xf32>
    %242 = vector.shape_cast %241 : vector<1x8x128xf32> to vector<8x128xf32>
    %243 = vector.shape_cast %240 : vector<8x128xf32> to vector<1x8x128xf32>
    tpu.vector_store %arg4[%c13_101, %c0_102, %c0_103], %243 {strides = array<i32>} : memref<16x8x128xf32, #tpu.memory_space<vmem>>, vector<1x8x128xf32>,
    %cst_104 = arith.constant dense<0.000000e+00> : vector<8x128xf32>
    %244 = tpu.matmul %240, %3, %cst_104 {dimension_numbers = #tpu.dot_dimension_numbers<[1], [0], [0], [1], [0, 0, 1, 1], [], []>} : vector<8x128xf32>, vector<128x128xf32>, vector<8x128xf32> -> vector<8x128xf32>
    %c14 = arith.constant 14 : index
    %c0_105 = arith.constant 0 : index
    %c0_106 = arith.constant 0 : index
    %245 = vector.load %arg2[%c14, %c0_105, %c0_106] : memref<16x8x128xf32, #tpu.memory_space<vmem>>, vector<1x8x128xf32>
    %246 = vector.shape_cast %245 : vector<1x8x128xf32> to vector<8x128xf32>
    %247 = arith.addf %244, %246 : vector<8x128xf32>
    %248 = arith.negf %247 : vector<8x128xf32>
    %249 = math.exp %248 : vector<8x128xf32>
    %cst_107 = arith.constant 1.000000e+00 : f32
    %250 = vector.broadcast %cst_107 : f32 to vector<8x128xf32>
    %251 = arith.addf %250, %249 : vector<8x128xf32>
    %252 = arith.divf %250, %251 : vector<8x128xf32>
    %253 = math.tanh %247 : vector<8x128xf32>
    %254 = arith.addf %238, %253 : vector<8x128xf32>
    %255 = arith.mulf %252, %254 : vector<8x128xf32>
    %256 = math.tanh %255 : vector<8x128xf32>
    %257 = arith.mulf %252, %256 : vector<8x128xf32>
    %c14_108 = arith.constant 14 : index
    %c0_109 = arith.constant 0 : index
    %c0_110 = arith.constant 0 : index
    %258 = vector.load %arg4[%c14_108, %c0_109, %c0_110] : memref<16x8x128xf32, #tpu.memory_space<vmem>>, vector<1x8x128xf32>
    %259 = vector.shape_cast %258 : vector<1x8x128xf32> to vector<8x128xf32>
    %260 = vector.shape_cast %257 : vector<8x128xf32> to vector<1x8x128xf32>
    tpu.vector_store %arg4[%c14_108, %c0_109, %c0_110], %260 {strides = array<i32>} : memref<16x8x128xf32, #tpu.memory_space<vmem>>, vector<1x8x128xf32>,
    %cst_111 = arith.constant dense<0.000000e+00> : vector<8x128xf32>
    %261 = tpu.matmul %257, %3, %cst_111 {dimension_numbers = #tpu.dot_dimension_numbers<[1], [0], [0], [1], [0, 0, 1, 1], [], []>} : vector<8x128xf32>, vector<128x128xf32>, vector<8x128xf32> -> vector<8x128xf32>
    %c15 = arith.constant 15 : index
    %c0_112 = arith.constant 0 : index
    %c0_113 = arith.constant 0 : index
    %262 = vector.load %arg2[%c15, %c0_112, %c0_113] : memref<16x8x128xf32, #tpu.memory_space<vmem>>, vector<1x8x128xf32>
    %263 = vector.shape_cast %262 : vector<1x8x128xf32> to vector<8x128xf32>
    %264 = arith.addf %261, %263 : vector<8x128xf32>
    %265 = arith.negf %264 : vector<8x128xf32>
    %266 = math.exp %265 : vector<8x128xf32>
    %cst_114 = arith.constant 1.000000e+00 : f32
    %267 = vector.broadcast %cst_114 : f32 to vector<8x128xf32>
    %268 = arith.addf %267, %266 : vector<8x128xf32>
    %269 = arith.divf %267, %268 : vector<8x128xf32>
    %270 = math.tanh %264 : vector<8x128xf32>
    %271 = arith.addf %255, %270 : vector<8x128xf32>
    %272 = arith.mulf %269, %271 : vector<8x128xf32>
    %273 = math.tanh %272 : vector<8x128xf32>
    %274 = arith.mulf %269, %273 : vector<8x128xf32>
    %c15_115 = arith.constant 15 : index
    %c0_116 = arith.constant 0 : index
    %c0_117 = arith.constant 0 : index
    %275 = vector.load %arg4[%c15_115, %c0_116, %c0_117] : memref<16x8x128xf32, #tpu.memory_space<vmem>>, vector<1x8x128xf32>
    %276 = vector.shape_cast %275 : vector<1x8x128xf32> to vector<8x128xf32>
    %277 = vector.shape_cast %274 : vector<8x128xf32> to vector<1x8x128xf32>
    tpu.vector_store %arg4[%c15_115, %c0_116, %c0_117], %277 {strides = array<i32>} : memref<16x8x128xf32, #tpu.memory_space<vmem>>, vector<1x8x128xf32>,
    %c0_118 = arith.constant 0 : index
    %c0_119 = arith.constant 0 : index
    %278 = vector.load %arg5[%c0_118, %c0_119] : memref<8x128xf32, #tpu.memory_space<vmem>>, vector<8x128xf32>
    tpu.vector_store %arg5[%c0_118, %c0_119], %274 {strides = array<i32>} : memref<8x128xf32, #tpu.memory_space<vmem>>, vector<8x128xf32>,
    %c0_120 = arith.constant 0 : index
    %c0_121 = arith.constant 0 : index
    %279 = vector.load %arg6[%c0_120, %c0_121] : memref<8x128xf32, #tpu.memory_space<vmem>>, vector<8x128xf32>
    tpu.vector_store %arg6[%c0_120, %c0_121], %272 {strides = array<i32>} : memref<8x128xf32, #tpu.memory_space<vmem>>, vector<8x128xf32>,
    return
  }
  func.func @transform_0(%arg0: i32, %arg1: i32) -> (i32, i32, i32) {
    %c0_i32 = arith.constant 0 : i32
    %c0_i32_0 = arith.constant 0 : i32
    return %arg1, %arg0, %c0_i32 : i32, i32, i32
  }
  func.func @transform_1(%arg0: i32, %arg1: i32) -> (i32, i32) {
    %c0_i32 = arith.constant 0 : i32
    %c0_i32_0 = arith.constant 0 : i32
    %c0_i32_1 = arith.constant 0 : i32
    return %c0_i32, %c0_i32_0 : i32, i32
  }
  func.func @transform_2(%arg0: i32, %arg1: i32) -> (i32, i32, i32) {
    %c0_i32 = arith.constant 0 : i32
    %c0_i32_0 = arith.constant 0 : i32
    return %arg1, %arg0, %c0_i32 : i32, i32, i32
  }
}

module attributes {stable_mosaic.version = 11 : i64} {
  func.func @lstm_scan_kernel(%arg0: i32, %arg1: i32, %arg2: memref<16x8x128xf32, #tpu.memory_space<vmem>>, %arg3: memref<128x128xf32, #tpu.memory_space<vmem>>, %arg4: memref<16x8x128xf32, #tpu.memory_space<vmem>>, %arg5: memref<8x128xf32, #tpu.memory_space<vmem>>, %arg6: memref<8x128xf32, #tpu.memory_space<vmem>>) attributes {dimension_semantics = [#tpu.dimension_semantics<parallel>, #tpu.dimension_semantics<arbitrary>], iteration_bounds = array<i64: 1, 1>, scalar_prefetch = 0 : i64, scratch_operands = 2 : i64, tpu.core_type = #tpu.core_type<tc>, window_params = [{transform_indices = @transform_0, window_bounds = array<i64: 16, 8, 128>}, {pipeline_mode = #tpu.pipeline_mode<synchronous>, transform_indices = @transform_1, window_bounds = array<i64: 128, 128>}, {transform_indices = @transform_2, window_bounds = array<i64: 16, 8, 128>}]} {
    %c0_i32 = arith.constant 0 : i32
    %0 = arith.cmpi eq, %arg1, %c0_i32 : i32
    %1 = arith.extui %0 : i1 to i32
    %c0_i32_0 = arith.constant 0 : i32
    %2 = arith.cmpi ne, %1, %c0_i32_0 : i32
    scf.if %2 {
      %cst_122 = arith.constant 0.000000e+00 : f32
      %280 = vector.broadcast %cst_122 : f32 to vector<8x128xf32>
      %c0_123 = arith.constant 0 : index
      %c0_124 = arith.constant 0 : index
      %281 = vector.load %arg5[%c0_123, %c0_124] : memref<8x128xf32, #tpu.memory_space<vmem>>, vector<8x128xf32>
      tpu.vector_store %arg5[%c0_123, %c0_124], %280 {strides = array<i32>} : memref<8x128xf32, #tpu.memory_space<vmem>>, vector<8x128xf32>,
      %cst_125 = arith.constant 0.000000e+00 : f32
      %282 = vector.broadcast %cst_125 : f32 to vector<8x128xf32>
      %c0_126 = arith.constant 0 : index
      %c0_127 = arith.constant 0 : index
      %283 = vector.load %arg6[%c0_126, %c0_127] : memref<8x128xf32, #tpu.memory_space<vmem>>, vector<8x128xf32>
      tpu.vector_store %arg6[%c0_126, %c0_127], %282 {strides = array<i32>} : memref<8x128xf32, #tpu.memory_space<vmem>>, vector<8x128xf32>,
    } else {
    }
    %c0 = arith.constant 0 : index
    %c0_1 = arith.constant 0 : index
    %3 = vector.load %arg3[%c0, %c0_1] : memref<128x128xf32, #tpu.memory_space<vmem>>, vector<128x128xf32>
    %c0_2 = arith.constant 0 : index
    %c0_3 = arith.constant 0 : index
    %4 = vector.load %arg5[%c0_2, %c0_3] : memref<8x128xf32, #tpu.memory_space<vmem>>, vector<8x128xf32>
    %c0_4 = arith.constant 0 : index
    %c0_5 = arith.constant 0 : index
    %5 = vector.load %arg6[%c0_4, %c0_5] : memref<8x128xf32, #tpu.memory_space<vmem>>, vector<8x128xf32>
    %cst = arith.constant dense<0.000000e+00> : vector<8x128xf32>
    %6 = tpu.matmul %4, %3, %cst {dimension_numbers = #tpu.dot_dimension_numbers<[1], [0], [0], [1], [0, 0, 1, 1], [], []>} : vector<8x128xf32>, vector<128x128xf32>, vector<8x128xf32> -> vector<8x128xf32>
    %c0_6 = arith.constant 0 : index
    %c0_7 = arith.constant 0 : index
    %c0_8 = arith.constant 0 : index
    %7 = vector.load %arg2[%c0_6, %c0_7, %c0_8] : memref<16x8x128xf32, #tpu.memory_space<vmem>>, vector<1x8x128xf32>
    %8 = vector.shape_cast %7 : vector<1x8x128xf32> to vector<8x128xf32>
    %9 = arith.addf %6, %8 : vector<8x128xf32>
    %10 = arith.negf %9 : vector<8x128xf32>
    %11 = math.exp %10 : vector<8x128xf32>
    %cst_9 = arith.constant 1.000000e+00 : f32
    %12 = vector.broadcast %cst_9 : f32 to vector<8x128xf32>
    %13 = arith.addf %12, %11 : vector<8x128xf32>
    %14 = arith.divf %12, %13 : vector<8x128xf32>
    %15 = math.tanh %9 : vector<8x128xf32>
    %16 = arith.addf %5, %15 : vector<8x128xf32>
    %17 = arith.mulf %14, %16 : vector<8x128xf32>
    %18 = math.tanh %17 : vector<8x128xf32>
    %19 = arith.mulf %14, %18 : vector<8x128xf32>
    %c0_10 = arith.constant 0 : index
    %c0_11 = arith.constant 0 : index
    %c0_12 = arith.constant 0 : index
    %20 = vector.load %arg4[%c0_10, %c0_11, %c0_12] : memref<16x8x128xf32, #tpu.memory_space<vmem>>, vector<1x8x128xf32>
    %21 = vector.shape_cast %20 : vector<1x8x128xf32> to vector<8x128xf32>
    %22 = vector.shape_cast %19 : vector<8x128xf32> to vector<1x8x128xf32>
    tpu.vector_store %arg4[%c0_10, %c0_11, %c0_12], %22 {strides = array<i32>} : memref<16x8x128xf32, #tpu.memory_space<vmem>>, vector<1x8x128xf32>,
    %cst_13 = arith.constant dense<0.000000e+00> : vector<8x128xf32>
    %23 = tpu.matmul %19, %3, %cst_13 {dimension_numbers = #tpu.dot_dimension_numbers<[1], [0], [0], [1], [0, 0, 1, 1], [], []>} : vector<8x128xf32>, vector<128x128xf32>, vector<8x128xf32> -> vector<8x128xf32>
    %c1 = arith.constant 1 : index
    %c0_14 = arith.constant 0 : index
    %c0_15 = arith.constant 0 : index
    %24 = vector.load %arg2[%c1, %c0_14, %c0_15] : memref<16x8x128xf32, #tpu.memory_space<vmem>>, vector<1x8x128xf32>
    %25 = vector.shape_cast %24 : vector<1x8x128xf32> to vector<8x128xf32>
    %26 = arith.addf %23, %25 : vector<8x128xf32>
    %27 = arith.negf %26 : vector<8x128xf32>
    %28 = math.exp %27 : vector<8x128xf32>
    %cst_16 = arith.constant 1.000000e+00 : f32
    %29 = vector.broadcast %cst_16 : f32 to vector<8x128xf32>
    %30 = arith.addf %29, %28 : vector<8x128xf32>
    %31 = arith.divf %29, %30 : vector<8x128xf32>
    %32 = math.tanh %26 : vector<8x128xf32>
    %33 = arith.addf %17, %32 : vector<8x128xf32>
    %34 = arith.mulf %31, %33 : vector<8x128xf32>
    %35 = math.tanh %34 : vector<8x128xf32>
    %36 = arith.mulf %31, %35 : vector<8x128xf32>
    %c1_17 = arith.constant 1 : index
    %c0_18 = arith.constant 0 : index
    %c0_19 = arith.constant 0 : index
    %37 = vector.load %arg4[%c1_17, %c0_18, %c0_19] : memref<16x8x128xf32, #tpu.memory_space<vmem>>, vector<1x8x128xf32>
    %38 = vector.shape_cast %37 : vector<1x8x128xf32> to vector<8x128xf32>
    %39 = vector.shape_cast %36 : vector<8x128xf32> to vector<1x8x128xf32>
    tpu.vector_store %arg4[%c1_17, %c0_18, %c0_19], %39 {strides = array<i32>} : memref<16x8x128xf32, #tpu.memory_space<vmem>>, vector<1x8x128xf32>,
    %cst_20 = arith.constant dense<0.000000e+00> : vector<8x128xf32>
    %40 = tpu.matmul %36, %3, %cst_20 {dimension_numbers = #tpu.dot_dimension_numbers<[1], [0], [0], [1], [0, 0, 1, 1], [], []>} : vector<8x128xf32>, vector<128x128xf32>, vector<8x128xf32> -> vector<8x128xf32>
    %c2 = arith.constant 2 : index
    %c0_21 = arith.constant 0 : index
    %c0_22 = arith.constant 0 : index
    %41 = vector.load %arg2[%c2, %c0_21, %c0_22] : memref<16x8x128xf32, #tpu.memory_space<vmem>>, vector<1x8x128xf32>
    %42 = vector.shape_cast %41 : vector<1x8x128xf32> to vector<8x128xf32>
    %43 = arith.addf %40, %42 : vector<8x128xf32>
    %44 = arith.negf %43 : vector<8x128xf32>
    %45 = math.exp %44 : vector<8x128xf32>
    %cst_23 = arith.constant 1.000000e+00 : f32
    %46 = vector.broadcast %cst_23 : f32 to vector<8x128xf32>
    %47 = arith.addf %46, %45 : vector<8x128xf32>
    %48 = arith.divf %46, %47 : vector<8x128xf32>
    %49 = math.tanh %43 : vector<8x128xf32>
    %50 = arith.addf %34, %49 : vector<8x128xf32>
    %51 = arith.mulf %48, %50 : vector<8x128xf32>
    %52 = math.tanh %51 : vector<8x128xf32>
    %53 = arith.mulf %48, %52 : vector<8x128xf32>
    %c2_24 = arith.constant 2 : index
    %c0_25 = arith.constant 0 : index
    %c0_26 = arith.constant 0 : index
    %54 = vector.load %arg4[%c2_24, %c0_25, %c0_26] : memref<16x8x128xf32, #tpu.memory_space<vmem>>, vector<1x8x128xf32>
    %55 = vector.shape_cast %54 : vector<1x8x128xf32> to vector<8x128xf32>
    %56 = vector.shape_cast %53 : vector<8x128xf32> to vector<1x8x128xf32>
    tpu.vector_store %arg4[%c2_24, %c0_25, %c0_26], %56 {strides = array<i32>} : memref<16x8x128xf32, #tpu.memory_space<vmem>>, vector<1x8x128xf32>,
    %cst_27 = arith.constant dense<0.000000e+00> : vector<8x128xf32>
    %57 = tpu.matmul %53, %3, %cst_27 {dimension_numbers = #tpu.dot_dimension_numbers<[1], [0], [0], [1], [0, 0, 1, 1], [], []>} : vector<8x128xf32>, vector<128x128xf32>, vector<8x128xf32> -> vector<8x128xf32>
    %c3 = arith.constant 3 : index
    %c0_28 = arith.constant 0 : index
    %c0_29 = arith.constant 0 : index
    %58 = vector.load %arg2[%c3, %c0_28, %c0_29] : memref<16x8x128xf32, #tpu.memory_space<vmem>>, vector<1x8x128xf32>
    %59 = vector.shape_cast %58 : vector<1x8x128xf32> to vector<8x128xf32>
    %60 = arith.addf %57, %59 : vector<8x128xf32>
    %61 = arith.negf %60 : vector<8x128xf32>
    %62 = math.exp %61 : vector<8x128xf32>
    %cst_30 = arith.constant 1.000000e+00 : f32
    %63 = vector.broadcast %cst_30 : f32 to vector<8x128xf32>
    %64 = arith.addf %63, %62 : vector<8x128xf32>
    %65 = arith.divf %63, %64 : vector<8x128xf32>
    %66 = math.tanh %60 : vector<8x128xf32>
    %67 = arith.addf %51, %66 : vector<8x128xf32>
    %68 = arith.mulf %65, %67 : vector<8x128xf32>
    %69 = math.tanh %68 : vector<8x128xf32>
    %70 = arith.mulf %65, %69 : vector<8x128xf32>
    %c3_31 = arith.constant 3 : index
    %c0_32 = arith.constant 0 : index
    %c0_33 = arith.constant 0 : index
    %71 = vector.load %arg4[%c3_31, %c0_32, %c0_33] : memref<16x8x128xf32, #tpu.memory_space<vmem>>, vector<1x8x128xf32>
    %72 = vector.shape_cast %71 : vector<1x8x128xf32> to vector<8x128xf32>
    %73 = vector.shape_cast %70 : vector<8x128xf32> to vector<1x8x128xf32>
    tpu.vector_store %arg4[%c3_31, %c0_32, %c0_33], %73 {strides = array<i32>} : memref<16x8x128xf32, #tpu.memory_space<vmem>>, vector<1x8x128xf32>,
    %cst_34 = arith.constant dense<0.000000e+00> : vector<8x128xf32>
    %74 = tpu.matmul %70, %3, %cst_34 {dimension_numbers = #tpu.dot_dimension_numbers<[1], [0], [0], [1], [0, 0, 1, 1], [], []>} : vector<8x128xf32>, vector<128x128xf32>, vector<8x128xf32> -> vector<8x128xf32>
    %c4 = arith.constant 4 : index
    %c0_35 = arith.constant 0 : index
    %c0_36 = arith.constant 0 : index
    %75 = vector.load %arg2[%c4, %c0_35, %c0_36] : memref<16x8x128xf32, #tpu.memory_space<vmem>>, vector<1x8x128xf32>
    %76 = vector.shape_cast %75 : vector<1x8x128xf32> to vector<8x128xf32>
    %77 = arith.addf %74, %76 : vector<8x128xf32>
    %78 = arith.negf %77 : vector<8x128xf32>
    %79 = math.exp %78 : vector<8x128xf32>
    %cst_37 = arith.constant 1.000000e+00 : f32
    %80 = vector.broadcast %cst_37 : f32 to vector<8x128xf32>
    %81 = arith.addf %80, %79 : vector<8x128xf32>
    %82 = arith.divf %80, %81 : vector<8x128xf32>
    %83 = math.tanh %77 : vector<8x128xf32>
    %84 = arith.addf %68, %83 : vector<8x128xf32>
    %85 = arith.mulf %82, %84 : vector<8x128xf32>
    %86 = math.tanh %85 : vector<8x128xf32>
    %87 = arith.mulf %82, %86 : vector<8x128xf32>
    %c4_38 = arith.constant 4 : index
    %c0_39 = arith.constant 0 : index
    %c0_40 = arith.constant 0 : index
    %88 = vector.load %arg4[%c4_38, %c0_39, %c0_40] : memref<16x8x128xf32, #tpu.memory_space<vmem>>, vector<1x8x128xf32>
    %89 = vector.shape_cast %88 : vector<1x8x128xf32> to vector<8x128xf32>
    %90 = vector.shape_cast %87 : vector<8x128xf32> to vector<1x8x128xf32>
    tpu.vector_store %arg4[%c4_38, %c0_39, %c0_40], %90 {strides = array<i32>} : memref<16x8x128xf32, #tpu.memory_space<vmem>>, vector<1x8x128xf32>,
    %cst_41 = arith.constant dense<0.000000e+00> : vector<8x128xf32>
    %91 = tpu.matmul %87, %3, %cst_41 {dimension_numbers = #tpu.dot_dimension_numbers<[1], [0], [0], [1], [0, 0, 1, 1], [], []>} : vector<8x128xf32>, vector<128x128xf32>, vector<8x128xf32> -> vector<8x128xf32>
    %c5 = arith.constant 5 : index
    %c0_42 = arith.constant 0 : index
    %c0_43 = arith.constant 0 : index
    %92 = vector.load %arg2[%c5, %c0_42, %c0_43] : memref<16x8x128xf32, #tpu.memory_space<vmem>>, vector<1x8x128xf32>
    %93 = vector.shape_cast %92 : vector<1x8x128xf32> to vector<8x128xf32>
    %94 = arith.addf %91, %93 : vector<8x128xf32>
    %95 = arith.negf %94 : vector<8x128xf32>
    %96 = math.exp %95 : vector<8x128xf32>
    %cst_44 = arith.constant 1.000000e+00 : f32
    %97 = vector.broadcast %cst_44 : f32 to vector<8x128xf32>
    %98 = arith.addf %97, %96 : vector<8x128xf32>
    %99 = arith.divf %97, %98 : vector<8x128xf32>
    %100 = math.tanh %94 : vector<8x128xf32>
    %101 = arith.addf %85, %100 : vector<8x128xf32>
    %102 = arith.mulf %99, %101 : vector<8x128xf32>
    %103 = math.tanh %102 : vector<8x128xf32>
    %104 = arith.mulf %99, %103 : vector<8x128xf32>
    %c5_45 = arith.constant 5 : index
    %c0_46 = arith.constant 0 : index
    %c0_47 = arith.constant 0 : index
    %105 = vector.load %arg4[%c5_45, %c0_46, %c0_47] : memref<16x8x128xf32, #tpu.memory_space<vmem>>, vector<1x8x128xf32>
    %106 = vector.shape_cast %105 : vector<1x8x128xf32> to vector<8x128xf32>
    %107 = vector.shape_cast %104 : vector<8x128xf32> to vector<1x8x128xf32>
    tpu.vector_store %arg4[%c5_45, %c0_46, %c0_47], %107 {strides = array<i32>} : memref<16x8x128xf32, #tpu.memory_space<vmem>>, vector<1x8x128xf32>,
    %cst_48 = arith.constant dense<0.000000e+00> : vector<8x128xf32>
    %108 = tpu.matmul %104, %3, %cst_48 {dimension_numbers = #tpu.dot_dimension_numbers<[1], [0], [0], [1], [0, 0, 1, 1], [], []>} : vector<8x128xf32>, vector<128x128xf32>, vector<8x128xf32> -> vector<8x128xf32>
    %c6 = arith.constant 6 : index
    %c0_49 = arith.constant 0 : index
    %c0_50 = arith.constant 0 : index
    %109 = vector.load %arg2[%c6, %c0_49, %c0_50] : memref<16x8x128xf32, #tpu.memory_space<vmem>>, vector<1x8x128xf32>
    %110 = vector.shape_cast %109 : vector<1x8x128xf32> to vector<8x128xf32>
    %111 = arith.addf %108, %110 : vector<8x128xf32>
    %112 = arith.negf %111 : vector<8x128xf32>
    %113 = math.exp %112 : vector<8x128xf32>
    %cst_51 = arith.constant 1.000000e+00 : f32
    %114 = vector.broadcast %cst_51 : f32 to vector<8x128xf32>
    %115 = arith.addf %114, %113 : vector<8x128xf32>
    %116 = arith.divf %114, %115 : vector<8x128xf32>
    %117 = math.tanh %111 : vector<8x128xf32>
    %118 = arith.addf %102, %117 : vector<8x128xf32>
    %119 = arith.mulf %116, %118 : vector<8x128xf32>
    %120 = math.tanh %119 : vector<8x128xf32>
    %121 = arith.mulf %116, %120 : vector<8x128xf32>
    %c6_52 = arith.constant 6 : index
    %c0_53 = arith.constant 0 : index
    %c0_54 = arith.constant 0 : index
    %122 = vector.load %arg4[%c6_52, %c0_53, %c0_54] : memref<16x8x128xf32, #tpu.memory_space<vmem>>, vector<1x8x128xf32>
    %123 = vector.shape_cast %122 : vector<1x8x128xf32> to vector<8x128xf32>
    %124 = vector.shape_cast %121 : vector<8x128xf32> to vector<1x8x128xf32>
    tpu.vector_store %arg4[%c6_52, %c0_53, %c0_54], %124 {strides = array<i32>} : memref<16x8x128xf32, #tpu.memory_space<vmem>>, vector<1x8x128xf32>,
    %cst_55 = arith.constant dense<0.000000e+00> : vector<8x128xf32>
    %125 = tpu.matmul %121, %3, %cst_55 {dimension_numbers = #tpu.dot_dimension_numbers<[1], [0], [0], [1], [0, 0, 1, 1], [], []>} : vector<8x128xf32>, vector<128x128xf32>, vector<8x128xf32> -> vector<8x128xf32>
    %c7 = arith.constant 7 : index
    %c0_56 = arith.constant 0 : index
    %c0_57 = arith.constant 0 : index
    %126 = vector.load %arg2[%c7, %c0_56, %c0_57] : memref<16x8x128xf32, #tpu.memory_space<vmem>>, vector<1x8x128xf32>
    %127 = vector.shape_cast %126 : vector<1x8x128xf32> to vector<8x128xf32>
    %128 = arith.addf %125, %127 : vector<8x128xf32>
    %129 = arith.negf %128 : vector<8x128xf32>
    %130 = math.exp %129 : vector<8x128xf32>
    %cst_58 = arith.constant 1.000000e+00 : f32
    %131 = vector.broadcast %cst_58 : f32 to vector<8x128xf32>
    %132 = arith.addf %131, %130 : vector<8x128xf32>
    %133 = arith.divf %131, %132 : vector<8x128xf32>
    %134 = math.tanh %128 : vector<8x128xf32>
    %135 = arith.addf %119, %134 : vector<8x128xf32>
    %136 = arith.mulf %133, %135 : vector<8x128xf32>
    %137 = math.tanh %136 : vector<8x128xf32>
    %138 = arith.mulf %133, %137 : vector<8x128xf32>
    %c7_59 = arith.constant 7 : index
    %c0_60 = arith.constant 0 : index
    %c0_61 = arith.constant 0 : index
    %139 = vector.load %arg4[%c7_59, %c0_60, %c0_61] : memref<16x8x128xf32, #tpu.memory_space<vmem>>, vector<1x8x128xf32>
    %140 = vector.shape_cast %139 : vector<1x8x128xf32> to vector<8x128xf32>
    %141 = vector.shape_cast %138 : vector<8x128xf32> to vector<1x8x128xf32>
    tpu.vector_store %arg4[%c7_59, %c0_60, %c0_61], %141 {strides = array<i32>} : memref<16x8x128xf32, #tpu.memory_space<vmem>>, vector<1x8x128xf32>,
    %cst_62 = arith.constant dense<0.000000e+00> : vector<8x128xf32>
    %142 = tpu.matmul %138, %3, %cst_62 {dimension_numbers = #tpu.dot_dimension_numbers<[1], [0], [0], [1], [0, 0, 1, 1], [], []>} : vector<8x128xf32>, vector<128x128xf32>, vector<8x128xf32> -> vector<8x128xf32>
    %c8 = arith.constant 8 : index
    %c0_63 = arith.constant 0 : index
    %c0_64 = arith.constant 0 : index
    %143 = vector.load %arg2[%c8, %c0_63, %c0_64] : memref<16x8x128xf32, #tpu.memory_space<vmem>>, vector<1x8x128xf32>
    %144 = vector.shape_cast %143 : vector<1x8x128xf32> to vector<8x128xf32>
    %145 = arith.addf %142, %144 : vector<8x128xf32>
    %146 = arith.negf %145 : vector<8x128xf32>
    %147 = math.exp %146 : vector<8x128xf32>
    %cst_65 = arith.constant 1.000000e+00 : f32
    %148 = vector.broadcast %cst_65 : f32 to vector<8x128xf32>
    %149 = arith.addf %148, %147 : vector<8x128xf32>
    %150 = arith.divf %148, %149 : vector<8x128xf32>
    %151 = math.tanh %145 : vector<8x128xf32>
    %152 = arith.addf %136, %151 : vector<8x128xf32>
    %153 = arith.mulf %150, %152 : vector<8x128xf32>
    %154 = math.tanh %153 : vector<8x128xf32>
    %155 = arith.mulf %150, %154 : vector<8x128xf32>
    %c8_66 = arith.constant 8 : index
    %c0_67 = arith.constant 0 : index
    %c0_68 = arith.constant 0 : index
    %156 = vector.load %arg4[%c8_66, %c0_67, %c0_68] : memref<16x8x128xf32, #tpu.memory_space<vmem>>, vector<1x8x128xf32>
    %157 = vector.shape_cast %156 : vector<1x8x128xf32> to vector<8x128xf32>
    %158 = vector.shape_cast %155 : vector<8x128xf32> to vector<1x8x128xf32>
    tpu.vector_store %arg4[%c8_66, %c0_67, %c0_68], %158 {strides = array<i32>} : memref<16x8x128xf32, #tpu.memory_space<vmem>>, vector<1x8x128xf32>,
    %cst_69 = arith.constant dense<0.000000e+00> : vector<8x128xf32>
    %159 = tpu.matmul %155, %3, %cst_69 {dimension_numbers = #tpu.dot_dimension_numbers<[1], [0], [0], [1], [0, 0, 1, 1], [], []>} : vector<8x128xf32>, vector<128x128xf32>, vector<8x128xf32> -> vector<8x128xf32>
    %c9 = arith.constant 9 : index
    %c0_70 = arith.constant 0 : index
    %c0_71 = arith.constant 0 : index
    %160 = vector.load %arg2[%c9, %c0_70, %c0_71] : memref<16x8x128xf32, #tpu.memory_space<vmem>>, vector<1x8x128xf32>
    %161 = vector.shape_cast %160 : vector<1x8x128xf32> to vector<8x128xf32>
    %162 = arith.addf %159, %161 : vector<8x128xf32>
    %163 = arith.negf %162 : vector<8x128xf32>
    %164 = math.exp %163 : vector<8x128xf32>
    %cst_72 = arith.constant 1.000000e+00 : f32
    %165 = vector.broadcast %cst_72 : f32 to vector<8x128xf32>
    %166 = arith.addf %165, %164 : vector<8x128xf32>
    %167 = arith.divf %165, %166 : vector<8x128xf32>
    %168 = math.tanh %162 : vector<8x128xf32>
    %169 = arith.addf %153, %168 : vector<8x128xf32>
    %170 = arith.mulf %167, %169 : vector<8x128xf32>
    %171 = math.tanh %170 : vector<8x128xf32>
    %172 = arith.mulf %167, %171 : vector<8x128xf32>
    %c9_73 = arith.constant 9 : index
    %c0_74 = arith.constant 0 : index
    %c0_75 = arith.constant 0 : index
    %173 = vector.load %arg4[%c9_73, %c0_74, %c0_75] : memref<16x8x128xf32, #tpu.memory_space<vmem>>, vector<1x8x128xf32>
    %174 = vector.shape_cast %173 : vector<1x8x128xf32> to vector<8x128xf32>
    %175 = vector.shape_cast %172 : vector<8x128xf32> to vector<1x8x128xf32>
    tpu.vector_store %arg4[%c9_73, %c0_74, %c0_75], %175 {strides = array<i32>} : memref<16x8x128xf32, #tpu.memory_space<vmem>>, vector<1x8x128xf32>,
    %cst_76 = arith.constant dense<0.000000e+00> : vector<8x128xf32>
    %176 = tpu.matmul %172, %3, %cst_76 {dimension_numbers = #tpu.dot_dimension_numbers<[1], [0], [0], [1], [0, 0, 1, 1], [], []>} : vector<8x128xf32>, vector<128x128xf32>, vector<8x128xf32> -> vector<8x128xf32>
    %c10 = arith.constant 10 : index
    %c0_77 = arith.constant 0 : index
    %c0_78 = arith.constant 0 : index
    %177 = vector.load %arg2[%c10, %c0_77, %c0_78] : memref<16x8x128xf32, #tpu.memory_space<vmem>>, vector<1x8x128xf32>
    %178 = vector.shape_cast %177 : vector<1x8x128xf32> to vector<8x128xf32>
    %179 = arith.addf %176, %178 : vector<8x128xf32>
    %180 = arith.negf %179 : vector<8x128xf32>
    %181 = math.exp %180 : vector<8x128xf32>
    %cst_79 = arith.constant 1.000000e+00 : f32
    %182 = vector.broadcast %cst_79 : f32 to vector<8x128xf32>
    %183 = arith.addf %182, %181 : vector<8x128xf32>
    %184 = arith.divf %182, %183 : vector<8x128xf32>
    %185 = math.tanh %179 : vector<8x128xf32>
    %186 = arith.addf %170, %185 : vector<8x128xf32>
    %187 = arith.mulf %184, %186 : vector<8x128xf32>
    %188 = math.tanh %187 : vector<8x128xf32>
    %189 = arith.mulf %184, %188 : vector<8x128xf32>
    %c10_80 = arith.constant 10 : index
    %c0_81 = arith.constant 0 : index
    %c0_82 = arith.constant 0 : index
    %190 = vector.load %arg4[%c10_80, %c0_81, %c0_82] : memref<16x8x128xf32, #tpu.memory_space<vmem>>, vector<1x8x128xf32>
    %191 = vector.shape_cast %190 : vector<1x8x128xf32> to vector<8x128xf32>
    %192 = vector.shape_cast %189 : vector<8x128xf32> to vector<1x8x128xf32>
    tpu.vector_store %arg4[%c10_80, %c0_81, %c0_82], %192 {strides = array<i32>} : memref<16x8x128xf32, #tpu.memory_space<vmem>>, vector<1x8x128xf32>,
    %cst_83 = arith.constant dense<0.000000e+00> : vector<8x128xf32>
    %193 = tpu.matmul %189, %3, %cst_83 {dimension_numbers = #tpu.dot_dimension_numbers<[1], [0], [0], [1], [0, 0, 1, 1], [], []>} : vector<8x128xf32>, vector<128x128xf32>, vector<8x128xf32> -> vector<8x128xf32>
    %c11 = arith.constant 11 : index
    %c0_84 = arith.constant 0 : index
    %c0_85 = arith.constant 0 : index
    %194 = vector.load %arg2[%c11, %c0_84, %c0_85] : memref<16x8x128xf32, #tpu.memory_space<vmem>>, vector<1x8x128xf32>
    %195 = vector.shape_cast %194 : vector<1x8x128xf32> to vector<8x128xf32>
    %196 = arith.addf %193, %195 : vector<8x128xf32>
    %197 = arith.negf %196 : vector<8x128xf32>
    %198 = math.exp %197 : vector<8x128xf32>
    %cst_86 = arith.constant 1.000000e+00 : f32
    %199 = vector.broadcast %cst_86 : f32 to vector<8x128xf32>
    %200 = arith.addf %199, %198 : vector<8x128xf32>
    %201 = arith.divf %199, %200 : vector<8x128xf32>
    %202 = math.tanh %196 : vector<8x128xf32>
    %203 = arith.addf %187, %202 : vector<8x128xf32>
    %204 = arith.mulf %201, %203 : vector<8x128xf32>
    %205 = math.tanh %204 : vector<8x128xf32>
    %206 = arith.mulf %201, %205 : vector<8x128xf32>
    %c11_87 = arith.constant 11 : index
    %c0_88 = arith.constant 0 : index
    %c0_89 = arith.constant 0 : index
    %207 = vector.load %arg4[%c11_87, %c0_88, %c0_89] : memref<16x8x128xf32, #tpu.memory_space<vmem>>, vector<1x8x128xf32>
    %208 = vector.shape_cast %207 : vector<1x8x128xf32> to vector<8x128xf32>
    %209 = vector.shape_cast %206 : vector<8x128xf32> to vector<1x8x128xf32>
    tpu.vector_store %arg4[%c11_87, %c0_88, %c0_89], %209 {strides = array<i32>} : memref<16x8x128xf32, #tpu.memory_space<vmem>>, vector<1x8x128xf32>,
    %cst_90 = arith.constant dense<0.000000e+00> : vector<8x128xf32>
    %210 = tpu.matmul %206, %3, %cst_90 {dimension_numbers = #tpu.dot_dimension_numbers<[1], [0], [0], [1], [0, 0, 1, 1], [], []>} : vector<8x128xf32>, vector<128x128xf32>, vector<8x128xf32> -> vector<8x128xf32>
    %c12 = arith.constant 12 : index
    %c0_91 = arith.constant 0 : index
    %c0_92 = arith.constant 0 : index
    %211 = vector.load %arg2[%c12, %c0_91, %c0_92] : memref<16x8x128xf32, #tpu.memory_space<vmem>>, vector<1x8x128xf32>
    %212 = vector.shape_cast %211 : vector<1x8x128xf32> to vector<8x128xf32>
    %213 = arith.addf %210, %212 : vector<8x128xf32>
    %214 = arith.negf %213 : vector<8x128xf32>
    %215 = math.exp %214 : vector<8x128xf32>
    %cst_93 = arith.constant 1.000000e+00 : f32
    %216 = vector.broadcast %cst_93 : f32 to vector<8x128xf32>
    %217 = arith.addf %216, %215 : vector<8x128xf32>
    %218 = arith.divf %216, %217 : vector<8x128xf32>
    %219 = math.tanh %213 : vector<8x128xf32>
    %220 = arith.addf %204, %219 : vector<8x128xf32>
    %221 = arith.mulf %218, %220 : vector<8x128xf32>
    %222 = math.tanh %221 : vector<8x128xf32>
    %223 = arith.mulf %218, %222 : vector<8x128xf32>
    %c12_94 = arith.constant 12 : index
    %c0_95 = arith.constant 0 : index
    %c0_96 = arith.constant 0 : index
    %224 = vector.load %arg4[%c12_94, %c0_95, %c0_96] : memref<16x8x128xf32, #tpu.memory_space<vmem>>, vector<1x8x128xf32>
    %225 = vector.shape_cast %224 : vector<1x8x128xf32> to vector<8x128xf32>
    %226 = vector.shape_cast %223 : vector<8x128xf32> to vector<1x8x128xf32>
    tpu.vector_store %arg4[%c12_94, %c0_95, %c0_96], %226 {strides = array<i32>} : memref<16x8x128xf32, #tpu.memory_space<vmem>>, vector<1x8x128xf32>,
    %cst_97 = arith.constant dense<0.000000e+00> : vector<8x128xf32>
    %227 = tpu.matmul %223, %3, %cst_97 {dimension_numbers = #tpu.dot_dimension_numbers<[1], [0], [0], [1], [0, 0, 1, 1], [], []>} : vector<8x128xf32>, vector<128x128xf32>, vector<8x128xf32> -> vector<8x128xf32>
    %c13 = arith.constant 13 : index
    %c0_98 = arith.constant 0 : index
    %c0_99 = arith.constant 0 : index
    %228 = vector.load %arg2[%c13, %c0_98, %c0_99] : memref<16x8x128xf32, #tpu.memory_space<vmem>>, vector<1x8x128xf32>
    %229 = vector.shape_cast %228 : vector<1x8x128xf32> to vector<8x128xf32>
    %230 = arith.addf %227, %229 : vector<8x128xf32>
    %231 = arith.negf %230 : vector<8x128xf32>
    %232 = math.exp %231 : vector<8x128xf32>
    %cst_100 = arith.constant 1.000000e+00 : f32
    %233 = vector.broadcast %cst_100 : f32 to vector<8x128xf32>
    %234 = arith.addf %233, %232 : vector<8x128xf32>
    %235 = arith.divf %233, %234 : vector<8x128xf32>
    %236 = math.tanh %230 : vector<8x128xf32>
    %237 = arith.addf %221, %236 : vector<8x128xf32>
    %238 = arith.mulf %235, %237 : vector<8x128xf32>
    %239 = math.tanh %238 : vector<8x128xf32>
    %240 = arith.mulf %235, %239 : vector<8x128xf32>
    %c13_101 = arith.constant 13 : index
    %c0_102 = arith.constant 0 : index
    %c0_103 = arith.constant 0 : index
    %241 = vector.load %arg4[%c13_101, %c0_102, %c0_103] : memref<16x8x128xf32, #tpu.memory_space<vmem>>, vector<1x8x128xf32>
    %242 = vector.shape_cast %241 : vector<1x8x128xf32> to vector<8x128xf32>
    %243 = vector.shape_cast %240 : vector<8x128xf32> to vector<1x8x128xf32>
    tpu.vector_store %arg4[%c13_101, %c0_102, %c0_103], %243 {strides = array<i32>} : memref<16x8x128xf32, #tpu.memory_space<vmem>>, vector<1x8x128xf32>,
    %cst_104 = arith.constant dense<0.000000e+00> : vector<8x128xf32>
    %244 = tpu.matmul %240, %3, %cst_104 {dimension_numbers = #tpu.dot_dimension_numbers<[1], [0], [0], [1], [0, 0, 1, 1], [], []>} : vector<8x128xf32>, vector<128x128xf32>, vector<8x128xf32> -> vector<8x128xf32>
    %c14 = arith.constant 14 : index
    %c0_105 = arith.constant 0 : index
    %c0_106 = arith.constant 0 : index
    %245 = vector.load %arg2[%c14, %c0_105, %c0_106] : memref<16x8x128xf32, #tpu.memory_space<vmem>>, vector<1x8x128xf32>
    %246 = vector.shape_cast %245 : vector<1x8x128xf32> to vector<8x128xf32>
    %247 = arith.addf %244, %246 : vector<8x128xf32>
    %248 = arith.negf %247 : vector<8x128xf32>
    %249 = math.exp %248 : vector<8x128xf32>
    %cst_107 = arith.constant 1.000000e+00 : f32
    %250 = vector.broadcast %cst_107 : f32 to vector<8x128xf32>
    %251 = arith.addf %250, %249 : vector<8x128xf32>
    %252 = arith.divf %250, %251 : vector<8x128xf32>
    %253 = math.tanh %247 : vector<8x128xf32>
    %254 = arith.addf %238, %253 : vector<8x128xf32>
    %255 = arith.mulf %252, %254 : vector<8x128xf32>
    %256 = math.tanh %255 : vector<8x128xf32>
    %257 = arith.mulf %252, %256 : vector<8x128xf32>
    %c14_108 = arith.constant 14 : index
    %c0_109 = arith.constant 0 : index
    %c0_110 = arith.constant 0 : index
    %258 = vector.load %arg4[%c14_108, %c0_109, %c0_110] : memref<16x8x128xf32, #tpu.memory_space<vmem>>, vector<1x8x128xf32>
    %259 = vector.shape_cast %258 : vector<1x8x128xf32> to vector<8x128xf32>
    %260 = vector.shape_cast %257 : vector<8x128xf32> to vector<1x8x128xf32>
    tpu.vector_store %arg4[%c14_108, %c0_109, %c0_110], %260 {strides = array<i32>} : memref<16x8x128xf32, #tpu.memory_space<vmem>>, vector<1x8x128xf32>,
    %cst_111 = arith.constant dense<0.000000e+00> : vector<8x128xf32>
    %261 = tpu.matmul %257, %3, %cst_111 {dimension_numbers = #tpu.dot_dimension_numbers<[1], [0], [0], [1], [0, 0, 1, 1], [], []>} : vector<8x128xf32>, vector<128x128xf32>, vector<8x128xf32> -> vector<8x128xf32>
    %c15 = arith.constant 15 : index
    %c0_112 = arith.constant 0 : index
    %c0_113 = arith.constant 0 : index
    %262 = vector.load %arg2[%c15, %c0_112, %c0_113] : memref<16x8x128xf32, #tpu.memory_space<vmem>>, vector<1x8x128xf32>
    %263 = vector.shape_cast %262 : vector<1x8x128xf32> to vector<8x128xf32>
    %264 = arith.addf %261, %263 : vector<8x128xf32>
    %265 = arith.negf %264 : vector<8x128xf32>
    %266 = math.exp %265 : vector<8x128xf32>
    %cst_114 = arith.constant 1.000000e+00 : f32
    %267 = vector.broadcast %cst_114 : f32 to vector<8x128xf32>
    %268 = arith.addf %267, %266 : vector<8x128xf32>
    %269 = arith.divf %267, %268 : vector<8x128xf32>
    %270 = math.tanh %264 : vector<8x128xf32>
    %271 = arith.addf %255, %270 : vector<8x128xf32>
    %272 = arith.mulf %269, %271 : vector<8x128xf32>
    %273 = math.tanh %272 : vector<8x128xf32>
    %274 = arith.mulf %269, %273 : vector<8x128xf32>
    %c15_115 = arith.constant 15 : index
    %c0_116 = arith.constant 0 : index
    %c0_117 = arith.constant 0 : index
    %275 = vector.load %arg4[%c15_115, %c0_116, %c0_117] : memref<16x8x128xf32, #tpu.memory_space<vmem>>, vector<1x8x128xf32>
    %276 = vector.shape_cast %275 : vector<1x8x128xf32> to vector<8x128xf32>
    %277 = vector.shape_cast %274 : vector<8x128xf32> to vector<1x8x128xf32>
    tpu.vector_store %arg4[%c15_115, %c0_116, %c0_117], %277 {strides = array<i32>} : memref<16x8x128xf32, #tpu.memory_space<vmem>>, vector<1x8x128xf32>,
    %c0_118 = arith.constant 0 : index
    %c0_119 = arith.constant 0 : index
    %278 = vector.load %arg5[%c0_118, %c0_119] : memref<8x128xf32, #tpu.memory_space<vmem>>, vector<8x128xf32>
    tpu.vector_store %arg5[%c0_118, %c0_119], %274 {strides = array<i32>} : memref<8x128xf32, #tpu.memory_space<vmem>>, vector<8x128xf32>,
    %c0_120 = arith.constant 0 : index
    %c0_121 = arith.constant 0 : index
    %279 = vector.load %arg6[%c0_120, %c0_121] : memref<8x128xf32, #tpu.memory_space<vmem>>, vector<8x128xf32>
    tpu.vector_store %arg6[%c0_120, %c0_121], %272 {strides = array<i32>} : memref<8x128xf32, #tpu.memory_space<vmem>>, vector<8x128xf32>,
    return
  }
  func.func @transform_0(%arg0: i32, %arg1: i32) -> (i32, i32, i32) {
    %c0_i32 = arith.constant 0 : i32
    %c0_i32_0 = arith.constant 0 : i32
    return %arg1, %arg0, %c0_i32 : i32, i32, i32
  }
  func.func @transform_1(%arg0: i32, %arg1: i32) -> (i32, i32) {
    %c0_i32 = arith.constant 0 : i32
    %c0_i32_0 = arith.constant 0 : i32
    %c0_i32_1 = arith.constant 0 : i32
    return %c0_i32, %c0_i32_0 : i32, i32
  }
  func.func @transform_2(%arg0: i32, %arg1: i32) -> (i32, i32, i32) {
    %c0_i32 = arith.constant 0 : i32
    %c0_i32_0 = arith.constant 0 : i32
    return %arg1, %arg0, %c0_i32 : i32, i32, i32
  }
}

</mosaic_0001>

<bundles_post_ra>
// kernel: tpu_custom_call.1
= control target key start
LH: loop header
LB: loop body
LE: loop exit
PB: predicated region body
PF: predicated region fallthrough
CT: control target
= control target key end

     0   :  { %7 = vsyncpa [#allocation5], 0  ;;  %s3160_s0 = inlined_call_operand.hbm [shape: f32[16,8,128], index: 0, kind: input, shape index: {}]   ;;  %s3161_s1 = inlined_call_operand.hbm [shape: f32[128,128], index: 1, kind: input, shape index: {}]   ;;  %s3162_s2 = inlined_call_operand.hbm [shape: f32[16,8,128], index: 2, kind: output, shape index: {}]  }
   0x1   :  { %8 = vsyncpa [#allocation8], 0 }
   0x2   :  { %9 = vsyncpa [#allocation6], 0  ;;  %s2507_s9 = smov [#allocation4]  }
   0x3   :  { %s15_s10 = sshll.u32 %s2507_s9, 4  ;;  %s16_s10 = int_to_ptr.vmem [resolvable:$true] %s15_s10 }
   0x4   :  { %s2449_s11 = scalar_lea.vmem %s16_s10, 2048  ;;  %p2454_p1 = scmp.lt.s32.totalorder %s16_s10, %s16_s10 }
   0x5   :  { %p2450_p0 = scmp.ne.s32.totalorder %s16_s10, %s2449_s11  ;;  %p2455_p2 = scmp.lt.s32.totalorder %s2449_s11, %s2449_s11 }
   0x7   :  { %p2456_p3 = por %p2455_p2, %p2454_p1 }
   0x9   :  { %p2457_p4 = pnand %p2456_p3, %p2450_p0 }
   0xb   :  { %2460 = shalt.err (!%p2457_p4)
}
   0xc   :  { %s2508_s12 = smov 128   ;;  %s2509_s13 = smov 8  }
   0xd   :  { %21 = dma.hbm_to_vmem [thread:$0]  %s3160_s0, 2048, %s16_s10, [#allocation5], %s2508_s12, %s2508_s12, %s2509_s13  }
   0xe   :  { %s2510_s16 = smov [#allocation7]  }
   0xf   :  { %s27_s17 = sshll.u32 %s2510_s16, 4  ;;  %s28_s17 = int_to_ptr.vmem [resolvable:$true] %s27_s17 }
  0x10   :  { %s2469_s18 = scalar_lea.vmem %s28_s17, 2048  ;;  %p2474_p6 = scmp.lt.s32.totalorder %s28_s17, %s28_s17 }
  0x11   :  { %p2470_p5 = scmp.ne.s32.totalorder %s28_s17, %s2469_s18  ;;  %p2475_p7 = scmp.lt.s32.totalorder %s2469_s18, %s2469_s18 }
  0x13   :  { %p2476_p8 = por %p2475_p7, %p2474_p6 }
  0x15   :  { %p2477_p9 = pnand %p2476_p8, %p2470_p5 }
  0x17   :  { %2480 = shalt.err (!%p2477_p9)
}
  0x18   :  { %33 = dma.hbm_to_vmem [thread:$0]  %s3161_s1, 2048, %s28_s17, [#allocation8], %s2508_s12, %s2508_s12, %s2509_s13  }
  0x19   :  { %2501 = dma.done.wait [#allocation5], 2048  }
  0x1a   :  { %2502 = vsyncadd [#allocation5], 4294965248 }
  0x1b   :  { %2503 = dma.done.wait [#allocation8], 2048  }
  0x1c   :  { %2504 = vsyncadd [#allocation8], 4294965248  ;;  %v2511_v0 = vmov 0.0   ;;  %vm2512_vm0 = vmmov 0   ;;  %v2547_v1 = vld [vmem:[#allocation7 + $0x78] sm:$0xff]  ;;  %v2549_v2 = vld [vmem:[#allocation7 + $0x70] sm:$0xff] }
  0x1d   :  { %1730 = vmatprep.subr.mxu0 %v2511_v0  ;;  %1762 = vmatprep.mubr.msk.f32.mxu0 %vm2512_vm0, %v2511_v0  ;;  %v2554_v3 = vld [vmem:[#allocation7 + $0x68] sm:$0xff]  ;;  %v2560_v4 = vld [vmem:[#allocation7 + $0x60] sm:$0xff]  ;;  %v2566_v5 = vld [vmem:[#allocation7 + $0x58] sm:$0xff]  ;;  %s2513_s0 = smov [#allocation9]  }
  0x1e   :  { %1765 = vmatprep.subr.mxu1 %v2511_v0  ;;  %1797 = vmatprep.mubr.msk.f32.mxu1 %vm2512_vm0, %v2511_v0  ;;  %v2572_v6 = vld [vmem:[#allocation7 + $0x50] sm:$0xff]  ;;  %v2578_v7 = vld [vmem:[#allocation7 + $0x48] sm:$0xff]  ;;  %v2584_v8 = vld [vmem:[#allocation7 + $0x40] sm:$0xff]  ;;  %s1429_s1 = sshll.u32 %s2513_s0, 4  ;;  %s1430_s1 = int_to_ptr.vmem [resolvable:$true] %s1429_s1 }
  0x1f   :  { %1731 = vmatpush3.msra.mxu0 %v2547_v1  ;;  %1766 = vmatpush3.msra.mxu1 %v2547_v1  ;;  %v2590_v9 = vld [vmem:[#allocation7 + $0x38] sm:$0xff]  ;;  %v2596_v10 = vld [vmem:[#allocation7 + $0x30] sm:$0xff]  ;;  %v2602_v11 = vld [vmem:[#allocation7 + $0x28] sm:$0xff]  ;;  %s2481_s21 = scalar_lea.vmem %s1430_s1, 2048  ;;  %p2486_p11 = scmp.lt.s32.totalorder %s1430_s1, %s1430_s1 }
  0x20   :  { %1732 = vmatprep.subr.mxu0 %v2511_v0  ;;  %1767 = vmatprep.subr.mxu1 %v2511_v0  ;;  %v2608_v12 = vld [vmem:[#allocation7 + $0x20] sm:$0xff]  ;;  %v2614_v13 = vld [vmem:[#allocation7 + $0x18] sm:$0xff]  ;;  %v2620_v14 = vld [vmem:[#allocation7 + $0x10] sm:$0xff]  ;;  %p2482_p10 = scmp.ne.s32.totalorder %s1430_s1, %s2481_s21  ;;  %p2487_p12 = scmp.lt.s32.totalorder %s2481_s21, %s2481_s21 }
  0x21   :  { %1733 = vmatpush3.msra.mxu0 %v2549_v2  ;;  %1768 = vmatpush3.msra.mxu1 %v2549_v2  ;;  %v2626_v15 = vld [vmem:[#allocation7 + $0x8] sm:$0xff]  ;;  %v2632_v16 = vld [vmem:[#allocation7] sm:$0xff]  ;;  %v233_v42 = vld [vmem:[#allocation4 + $0x10] sm:$0xff] }
  0x22   :  { %1734 = vmatprep.subr.mxu0 %v2511_v0  ;;  %1769 = vmatprep.subr.mxu1 %v2511_v0  ;;  %v64_v17 = vld [vmem:[#allocation4] sm:$0xff]  ;;  %v148_v29 = vld [vmem:[#allocation4 + $0x8] sm:$0xff]  ;;  %v318_v55 = vld [vmem:[#allocation4 + $0x18] sm:$0xff]  ;;  %p2488_p13 = por %p2487_p12, %p2486_p11 }
  0x23   :  { %1735 = vmatpush3.msra.mxu0 %v2554_v3  ;;  %1770 = vmatpush3.msra.mxu1 %v2554_v3 }
  0x24   :  { %1736 = vmatprep.subr.mxu0 %v2511_v0  ;;  %1771 = vmatprep.subr.mxu1 %v2511_v0  ;;  %p2489_p0 = pnand %p2488_p13, %p2482_p10 }
  0x25   :  { %1737 = vmatpush3.msra.mxu0 %v2560_v4  ;;  %1772 = vmatpush3.msra.mxu1 %v2560_v4 }
  0x26   :  { %1738 = vmatprep.subr.mxu0 %v2511_v0  ;;  %1773 = vmatprep.subr.mxu1 %v2511_v0 }
  0x27   :  { %1739 = vmatpush3.msra.mxu0 %v2566_v5  ;;  %1774 = vmatpush3.msra.mxu1 %v2566_v5 }
  0x28   :  { %1740 = vmatprep.subr.mxu0 %v2511_v0  ;;  %1775 = vmatprep.subr.mxu1 %v2511_v0 }
  0x29   :  { %1741 = vmatpush3.msra.mxu0 %v2572_v6  ;;  %1776 = vmatpush3.msra.mxu1 %v2572_v6 }
  0x2a   :  { %1742 = vmatprep.subr.mxu0 %v2511_v0  ;;  %1777 = vmatprep.subr.mxu1 %v2511_v0 }
  0x2b   :  { %1743 = vmatpush3.msra.mxu0 %v2578_v7  ;;  %1778 = vmatpush3.msra.mxu1 %v2578_v7 }
  0x2c   :  { %1744 = vmatprep.subr.mxu0 %v2511_v0  ;;  %1779 = vmatprep.subr.mxu1 %v2511_v0 }
  0x2d   :  { %1745 = vmatpush3.msra.mxu0 %v2584_v8  ;;  %1780 = vmatpush3.msra.mxu1 %v2584_v8 }
  0x2e   :  { %1746 = vmatprep.subr.mxu0 %v2511_v0  ;;  %1781 = vmatprep.subr.mxu1 %v2511_v0 }
  0x2f   :  { %1747 = vmatpush3.msra.mxu0 %v2590_v9  ;;  %1782 = vmatpush3.msra.mxu1 %v2590_v9 }
  0x30   :  { %1748 = vmatprep.subr.mxu0 %v2511_v0  ;;  %1783 = vmatprep.subr.mxu1 %v2511_v0 }
  0x31   :  { %1749 = vmatpush3.msra.mxu0 %v2596_v10  ;;  %1784 = vmatpush3.msra.mxu1 %v2596_v10 }
  0x32   :  { %1750 = vmatprep.subr.mxu0 %v2511_v0  ;;  %1785 = vmatprep.subr.mxu1 %v2511_v0 }
  0x33   :  { %1751 = vmatpush3.msra.mxu0 %v2602_v11  ;;  %1786 = vmatpush3.msra.mxu1 %v2602_v11 }
  0x34   :  { %1752 = vmatprep.subr.mxu0 %v2511_v0  ;;  %1787 = vmatprep.subr.mxu1 %v2511_v0 }
  0x35   :  { %1753 = vmatpush3.msra.mxu0 %v2608_v12  ;;  %1788 = vmatpush3.msra.mxu1 %v2608_v12 }
  0x36   :  { %1754 = vmatprep.subr.mxu0 %v2511_v0  ;;  %1789 = vmatprep.subr.mxu1 %v2511_v0 }
  0x37   :  { %1755 = vmatpush3.msra.mxu0 %v2614_v13  ;;  %1790 = vmatpush3.msra.mxu1 %v2614_v13 }
  0x38   :  { %1756 = vmatprep.subr.mxu0 %v2511_v0  ;;  %1791 = vmatprep.subr.mxu1 %v2511_v0 }
  0x39   :  { %1757 = vmatpush3.msra.mxu0 %v2620_v14  ;;  %1792 = vmatpush3.msra.mxu1 %v2620_v14 }
  0x3a   :  { %1758 = vmatprep.subr.mxu0 %v2511_v0  ;;  %1793 = vmatprep.subr.mxu1 %v2511_v0 }
  0x3b   :  { %1759 = vmatpush3.msra.mxu0 %v2626_v15  ;;  %1794 = vmatpush3.msra.mxu1 %v2626_v15 }
  0x3c   :  { %1760 = vmatprep.subr.mxu0 %v2511_v0  ;;  %1795 = vmatprep.subr.mxu1 %v2511_v0 }
  0x3d   :  { %1761 = vmatpush3.msra.mxu0 %v2632_v16  ;;  %1796 = vmatpush3.msra.mxu1 %v2632_v16 }
  0x3e   :  { %1763 = vmatmul.mubr.f32.vlgmr.msra.gmra.mxu0 %v2511_v0  ;;  %1800 = vmatprep.subr.mxu0 %v2511_v0 }
  0x3f   :  { %1801 = vmatpush3.msra.mxu0 %v2547_v1  ;;  %1832 = vmatprep.mubr.msk.f32.mxu0 %vm2512_vm0, %v2511_v0 }
  0x40   :  { %1802 = vmatprep.subr.mxu0 %v2511_v0  ;;  %1835 = vmatprep.subr.mxu1 %v2511_v0 }
  0x41   :  { %1803 = vmatpush3.msra.mxu0 %v2549_v2 }
  0x42   :  { %1804 = vmatprep.subr.mxu0 %v2511_v0 }
  0x43   :  { %1805 = vmatpush3.msra.mxu0 %v2554_v3 }
  0x44   :  { %1806 = vmatprep.subr.mxu0 %v2511_v0 }
  0x45   :  { %1807 = vmatpush3.msra.mxu0 %v2560_v4 }
  0x46   :  { %1808 = vmatprep.subr.mxu0 %v2511_v0 }
  0x47   :  { %1809 = vmatpush3.msra.mxu0 %v2566_v5 }
  0x48   :  { %1810 = vmatprep.subr.mxu0 %v2511_v0 }
  0x49   :  { %1811 = vmatpush3.msra.mxu0 %v2572_v6 }
  0x4a   :  { %1812 = vmatprep.subr.mxu0 %v2511_v0 }
  0x4b   :  { %1813 = vmatpush3.msra.mxu0 %v2578_v7 }
  0x4c   :  { %1814 = vmatprep.subr.mxu0 %v2511_v0 }
  0x4d   :  { %1815 = vmatpush3.msra.mxu0 %v2584_v8 }
  0x4e   :  { %1816 = vmatprep.subr.mxu0 %v2511_v0 }
  0x4f   :  { %1817 = vmatpush3.msra.mxu0 %v2590_v9 }
  0x50   :  { %1818 = vmatprep.subr.mxu0 %v2511_v0 }
  0x51   :  { %1819 = vmatpush3.msra.mxu0 %v2596_v10 }
  0x52   :  { %1820 = vmatprep.subr.mxu0 %v2511_v0 }
  0x53   :  { %1821 = vmatpush3.msra.mxu0 %v2602_v11 }
  0x54   :  { %1822 = vmatprep.subr.mxu0 %v2511_v0 }
  0x55   :  { %1823 = vmatpush3.msra.mxu0 %v2608_v12 }
  0x56   :  { %1824 = vmatprep.subr.mxu0 %v2511_v0 }
  0x57   :  { %1825 = vmatpush3.msra.mxu0 %v2614_v13 }
  0x58   :  { %1826 = vmatprep.subr.mxu0 %v2511_v0 }
  0x59   :  { %1827 = vmatpush3.msra.mxu0 %v2620_v14 }
  0x5a   :  { %1828 = vmatprep.subr.mxu0 %v2511_v0 }
  0x5b   :  { %1829 = vmatpush3.msra.mxu0 %v2626_v15 }
  0x5c   :  { %1830 = vmatprep.subr.mxu0 %v2511_v0 }
  0x5d   :  { %1831 = vmatpush3.msra.mxu0 %v2632_v16 }
  0x5e   :  { %1870 = vmatprep.subr.mxu0 %v2511_v0 }
  0xfe   :  { %v131_v18 = vpop.f32.mrf.mxu0 }
  0xff   :  { %v132_v19 = vadd.f32 %v131_v18, %v64_v17 }
 0x100   :  { %v1764_v20 = vpop.f32.mrf.mxu0 }
 0x101   :  { %v1442_v21 = vmul.f32 -1.442695, %v132_v19 }
 0x103   :  { %2297 = vpow2.f32 %v1442_v21  ;;  %v403_v21 = vld [vmem:[#allocation4 + $0x20] sm:$0xff] }
 0x104   :  { %2299 = vtanh.f32 %v132_v19 }
 0x110   :  { %v2298_v22 = vpop.eup %2297 }
 0x111   :  { %v138_v23 = vadd.f32 1.0, %v2298_v22  ;;  %v2300_v24 = vpop.eup %2299 }
 0x113   :  { %2301 = vrcp.f32 %v138_v23 }
 0x120   :  { %v2302_v25 = vpop.eup %2301 }
 0x121   :  { %v143_v26 = vmul.f32 %v2302_v25, %v2300_v24 }
 0x123   :  { %2303 = vtanh.f32 %v143_v26 }
 0x130   :  { %v2304_v27 = vpop.eup %2303 }
 0x131   :  { %v145_v28 = vmul.f32 %v2304_v27, %v2302_v25 }
 0x133   :  { %146 = vst [vmem:[#allocation9] sm:$0xff] %v145_v28  ;;  %1798 = vmatmul.mubr.f32.vlgmr.msra.gmra.mxu1 %v145_v28 }
 0x134   :  { %1836 = vmatpush3.msra.mxu1 %v2547_v1  ;;  %1867 = vmatprep.mubr.msk.f32.mxu1 %vm2512_vm0, %v2511_v0 }
 0x135   :  { %1837 = vmatprep.subr.mxu1 %v2511_v0 }
 0x136   :  { %1838 = vmatpush3.msra.mxu1 %v2549_v2 }
 0x137   :  { %1839 = vmatprep.subr.mxu1 %v2511_v0 }
 0x138   :  { %1840 = vmatpush3.msra.mxu1 %v2554_v3 }
 0x139   :  { %1841 = vmatprep.subr.mxu1 %v2511_v0 }
 0x13a   :  { %1842 = vmatpush3.msra.mxu1 %v2560_v4 }
 0x13b   :  { %1843 = vmatprep.subr.mxu1 %v2511_v0 }
 0x13c   :  { %1844 = vmatpush3.msra.mxu1 %v2566_v5 }
 0x13d   :  { %1845 = vmatprep.subr.mxu1 %v2511_v0 }
 0x13e   :  { %1846 = vmatpush3.msra.mxu1 %v2572_v6 }
 0x13f   :  { %1847 = vmatprep.subr.mxu1 %v2511_v0 }
 0x140   :  { %1848 = vmatpush3.msra.mxu1 %v2578_v7 }
 0x141   :  { %1849 = vmatprep.subr.mxu1 %v2511_v0 }
 0x142   :  { %1850 = vmatpush3.msra.mxu1 %v2584_v8 }
 0x143   :  { %1851 = vmatprep.subr.mxu1 %v2511_v0 }
 0x144   :  { %1852 = vmatpush3.msra.mxu1 %v2590_v9 }
 0x145   :  { %1853 = vmatprep.subr.mxu1 %v2511_v0 }
 0x146   :  { %1854 = vmatpush3.msra.mxu1 %v2596_v10 }
 0x147   :  { %1855 = vmatprep.subr.mxu1 %v2511_v0 }
 0x148   :  { %1856 = vmatpush3.msra.mxu1 %v2602_v11 }
 0x149   :  { %1857 = vmatprep.subr.mxu1 %v2511_v0 }
 0x14a   :  { %1858 = vmatpush3.msra.mxu1 %v2608_v12 }
 0x14b   :  { %1859 = vmatprep.subr.mxu1 %v2511_v0 }
 0x14c   :  { %1860 = vmatpush3.msra.mxu1 %v2614_v13 }
 0x14d   :  { %1861 = vmatprep.subr.mxu1 %v2511_v0 }
 0x14e   :  { %1862 = vmatpush3.msra.mxu1 %v2620_v14 }
 0x14f   :  { %1863 = vmatprep.subr.mxu1 %v2511_v0 }
 0x150   :  { %1864 = vmatpush3.msra.mxu1 %v2626_v15 }
 0x151   :  { %1865 = vmatprep.subr.mxu1 %v2511_v0 }
 0x152   :  { %1866 = vmatpush3.msra.mxu1 %v2632_v16 }
 0x153   :  { %1905 = vmatprep.subr.mxu1 %v2511_v0 }
 0x1f3   :  { %v215_v30 = vpop.f32.mrf.mxu1 }
 0x1f4   :  { %v216_v31 = vadd.f32 %v215_v30, %v148_v29 }
 0x1f5   :  { %v1799_v32 = vpop.f32.mrf.mxu1 }
 0x1f6   :  { %v1443_v33 = vmul.f32 -1.442695, %v216_v31 }
 0x1f8   :  { %2305 = vpow2.f32 %v1443_v33 }
 0x1f9   :  { %2307 = vtanh.f32 %v216_v31 }
 0x205   :  { %v2306_v34 = vpop.eup %2305 }
 0x206   :  { %v222_v35 = vadd.f32 1.0, %v2306_v34  ;;  %v2308_v36 = vpop.eup %2307  ;;  %v488_v34 = vld [vmem:[#allocation4 + $0x28] sm:$0xff] }
 0x207   :  { %v226_v37 = vadd.f32 %v2308_v36, %v143_v26 }
 0x208   :  { %2309 = vrcp.f32 %v222_v35 }
 0x215   :  { %v2310_v38 = vpop.eup %2309 }
 0x216   :  { %v227_v39 = vmul.f32 %v2310_v38, %v226_v37 }
 0x218   :  { %2311 = vtanh.f32 %v227_v39 }
 0x225   :  { %v2312_v40 = vpop.eup %2311 }
 0x226   :  { %v229_v41 = vmul.f32 %v2312_v40, %v2310_v38 }
 0x228   :  { %231 = vst [vmem:[#allocation9 + $0x8] sm:$0xff] %v229_v41  ;;  %1833 = vmatmul.mubr.f32.vlgmr.msra.gmra.mxu0 %v229_v41 }
 0x229   :  { %1871 = vmatpush3.msra.mxu0 %v2547_v1  ;;  %1902 = vmatprep.mubr.msk.f32.mxu0 %vm2512_vm0, %v2511_v0 }
 0x22a   :  { %1872 = vmatprep.subr.mxu0 %v2511_v0 }
 0x22b   :  { %1873 = vmatpush3.msra.mxu0 %v2549_v2 }
 0x22c   :  { %1874 = vmatprep.subr.mxu0 %v2511_v0 }
 0x22d   :  { %1875 = vmatpush3.msra.mxu0 %v2554_v3 }
 0x22e   :  { %1876 = vmatprep.subr.mxu0 %v2511_v0 }
 0x22f   :  { %1877 = vmatpush3.msra.mxu0 %v2560_v4 }
 0x230   :  { %1878 = vmatprep.subr.mxu0 %v2511_v0 }
 0x231   :  { %1879 = vmatpush3.msra.mxu0 %v2566_v5 }
 0x232   :  { %1880 = vmatprep.subr.mxu0 %v2511_v0 }
 0x233   :  { %1881 = vmatpush3.msra.mxu0 %v2572_v6 }
 0x234   :  { %1882 = vmatprep.subr.mxu0 %v2511_v0 }
 0x235   :  { %1883 = vmatpush3.msra.mxu0 %v2578_v7 }
 0x236   :  { %1884 = vmatprep.subr.mxu0 %v2511_v0 }
 0x237   :  { %1885 = vmatpush3.msra.mxu0 %v2584_v8 }
 0x238   :  { %1886 = vmatprep.subr.mxu0 %v2511_v0 }
 0x239   :  { %1887 = vmatpush3.msra.mxu0 %v2590_v9 }
 0x23a   :  { %1888 = vmatprep.subr.mxu0 %v2511_v0 }
 0x23b   :  { %1889 = vmatpush3.msra.mxu0 %v2596_v10 }
 0x23c   :  { %1890 = vmatprep.subr.mxu0 %v2511_v0 }
 0x23d   :  { %1891 = vmatpush3.msra.mxu0 %v2602_v11 }
 0x23e   :  { %1892 = vmatprep.subr.mxu0 %v2511_v0 }
 0x23f   :  { %1893 = vmatpush3.msra.mxu0 %v2608_v12 }
 0x240   :  { %1894 = vmatprep.subr.mxu0 %v2511_v0 }
 0x241   :  { %1895 = vmatpush3.msra.mxu0 %v2614_v13 }
 0x242   :  { %1896 = vmatprep.subr.mxu0 %v2511_v0 }
 0x243   :  { %1897 = vmatpush3.msra.mxu0 %v2620_v14 }
 0x244   :  { %1898 = vmatprep.subr.mxu0 %v2511_v0 }
 0x245   :  { %1899 = vmatpush3.msra.mxu0 %v2626_v15 }
 0x246   :  { %1900 = vmatprep.subr.mxu0 %v2511_v0 }
 0x247   :  { %1901 = vmatpush3.msra.mxu0 %v2632_v16 }
 0x248   :  { %1940 = vmatprep.subr.mxu0 %v2511_v0 }
 0x2e8   :  { %v300_v43 = vpop.f32.mrf.mxu0 }
 0x2e9   :  { %v301_v44 = vadd.f32 %v300_v43, %v233_v42 }
 0x2ea   :  { %v1834_v45 = vpop.f32.mrf.mxu0 }
 0x2eb   :  { %v1444_v46 = vmul.f32 -1.442695, %v301_v44 }
 0x2ed   :  { %2313 = vpow2.f32 %v1444_v46 }
 0x2ee   :  { %2315 = vtanh.f32 %v301_v44 }
 0x2fa   :  { %v2314_v47 = vpop.eup %2313 }
 0x2fb   :  { %v307_v48 = vadd.f32 1.0, %v2314_v47  ;;  %v2316_v49 = vpop.eup %2315  ;;  %v573_v47 = vld [vmem:[#allocation4 + $0x30] sm:$0xff] }
 0x2fc   :  { %v311_v50 = vadd.f32 %v2316_v49, %v227_v39 }
 0x2fd   :  { %2317 = vrcp.f32 %v307_v48 }
 0x30a   :  { %v2318_v51 = vpop.eup %2317 }
 0x30b   :  { %v312_v52 = vmul.f32 %v2318_v51, %v311_v50 }
 0x30d   :  { %2319 = vtanh.f32 %v312_v52 }
 0x31a   :  { %v2320_v53 = vpop.eup %2319 }
 0x31b   :  { %v314_v54 = vmul.f32 %v2320_v53, %v2318_v51 }
 0x31d   :  { %316 = vst [vmem:[#allocation9 + $0x10] sm:$0xff] %v314_v54  ;;  %1868 = vmatmul.mubr.f32.vlgmr.msra.gmra.mxu1 %v314_v54 }
 0x31e   :  { %1906 = vmatpush3.msra.mxu1 %v2547_v1  ;;  %1937 = vmatprep.mubr.msk.f32.mxu1 %vm2512_vm0, %v2511_v0 }
 0x31f   :  { %1907 = vmatprep.subr.mxu1 %v2511_v0 }
 0x320   :  { %1908 = vmatpush3.msra.mxu1 %v2549_v2 }
 0x321   :  { %1909 = vmatprep.subr.mxu1 %v2511_v0 }
 0x322   :  { %1910 = vmatpush3.msra.mxu1 %v2554_v3 }
 0x323   :  { %1911 = vmatprep.subr.mxu1 %v2511_v0 }
 0x324   :  { %1912 = vmatpush3.msra.mxu1 %v2560_v4 }
 0x325   :  { %1913 = vmatprep.subr.mxu1 %v2511_v0 }
 0x326   :  { %1914 = vmatpush3.msra.mxu1 %v2566_v5 }
 0x327   :  { %1915 = vmatprep.subr.mxu1 %v2511_v0 }
 0x328   :  { %1916 = vmatpush3.msra.mxu1 %v2572_v6 }
 0x329   :  { %1917 = vmatprep.subr.mxu1 %v2511_v0 }
 0x32a   :  { %1918 = vmatpush3.msra.mxu1 %v2578_v7 }
 0x32b   :  { %1919 = vmatprep.subr.mxu1 %v2511_v0 }
 0x32c   :  { %1920 = vmatpush3.msra.mxu1 %v2584_v8 }
 0x32d   :  { %1921 = vmatprep.subr.mxu1 %v2511_v0 }
 0x32e   :  { %1922 = vmatpush3.msra.mxu1 %v2590_v9 }
 0x32f   :  { %1923 = vmatprep.subr.mxu1 %v2511_v0 }
 0x330   :  { %1924 = vmatpush3.msra.mxu1 %v2596_v10 }
 0x331   :  { %1925 = vmatprep.subr.mxu1 %v2511_v0 }
 0x332   :  { %1926 = vmatpush3.msra.mxu1 %v2602_v11 }
 0x333   :  { %1927 = vmatprep.subr.mxu1 %v2511_v0 }
 0x334   :  { %1928 = vmatpush3.msra.mxu1 %v2608_v12 }
 0x335   :  { %1929 = vmatprep.subr.mxu1 %v2511_v0 }
 0x336   :  { %1930 = vmatpush3.msra.mxu1 %v2614_v13 }
 0x337   :  { %1931 = vmatprep.subr.mxu1 %v2511_v0 }
 0x338   :  { %1932 = vmatpush3.msra.mxu1 %v2620_v14 }
 0x339   :  { %1933 = vmatprep.subr.mxu1 %v2511_v0 }
 0x33a   :  { %1934 = vmatpush3.msra.mxu1 %v2626_v15 }
 0x33b   :  { %1935 = vmatprep.subr.mxu1 %v2511_v0 }
 0x33c   :  { %1936 = vmatpush3.msra.mxu1 %v2632_v16 }
 0x33d   :  { %1975 = vmatprep.subr.mxu1 %v2511_v0 }
 0x3dd   :  { %v385_v56 = vpop.f32.mrf.mxu1 }
 0x3de   :  { %v386_v57 = vadd.f32 %v385_v56, %v318_v55 }
 0x3df   :  { %v1869_v58 = vpop.f32.mrf.mxu1 }
 0x3e0   :  { %v1445_v59 = vmul.f32 -1.442695, %v386_v57 }
 0x3e2   :  { %2321 = vpow2.f32 %v1445_v59 }
 0x3e3   :  { %2323 = vtanh.f32 %v386_v57 }
 0x3ef   :  { %v2322_v60 = vpop.eup %2321 }
 0x3f0   :  { %v392_v61 = vadd.f32 1.0, %v2322_v60  ;;  %v2324_v62 = vpop.eup %2323  ;;  %v658_v60 = vld [vmem:[#allocation4 + $0x38] sm:$0xff] }
 0x3f1   :  { %v396_v63 = vadd.f32 %v2324_v62, %v312_v52 }
 0x3f2   :  { %2325 = vrcp.f32 %v392_v61 }
 0x3ff   :  { %v2326_v17 = vpop.eup %2325 }
 0x400   :  { %v397_v18 = vmul.f32 %v2326_v17, %v396_v63 }
 0x402   :  { %2327 = vtanh.f32 %v397_v18 }
 0x40f   :  { %v2328_v19 = vpop.eup %2327 }
 0x410   :  { %v399_v20 = vmul.f32 %v2328_v19, %v2326_v17 }
 0x412   :  { %401 = vst [vmem:[#allocation9 + $0x18] sm:$0xff] %v399_v20  ;;  %1903 = vmatmul.mubr.f32.vlgmr.msra.gmra.mxu0 %v399_v20 }
 0x413   :  { %1941 = vmatpush3.msra.mxu0 %v2547_v1  ;;  %1972 = vmatprep.mubr.msk.f32.mxu0 %vm2512_vm0, %v2511_v0 }
 0x414   :  { %1942 = vmatprep.subr.mxu0 %v2511_v0 }
 0x415   :  { %1943 = vmatpush3.msra.mxu0 %v2549_v2 }
 0x416   :  { %1944 = vmatprep.subr.mxu0 %v2511_v0 }
 0x417   :  { %1945 = vmatpush3.msra.mxu0 %v2554_v3 }
 0x418   :  { %1946 = vmatprep.subr.mxu0 %v2511_v0 }
 0x419   :  { %1947 = vmatpush3.msra.mxu0 %v2560_v4 }
 0x41a   :  { %1948 = vmatprep.subr.mxu0 %v2511_v0 }
 0x41b   :  { %1949 = vmatpush3.msra.mxu0 %v2566_v5 }
 0x41c   :  { %1950 = vmatprep.subr.mxu0 %v2511_v0 }
 0x41d   :  { %1951 = vmatpush3.msra.mxu0 %v2572_v6 }
 0x41e   :  { %1952 = vmatprep.subr.mxu0 %v2511_v0 }
 0x41f   :  { %1953 = vmatpush3.msra.mxu0 %v2578_v7 }
 0x420   :  { %1954 = vmatprep.subr.mxu0 %v2511_v0 }
 0x421   :  { %1955 = vmatpush3.msra.mxu0 %v2584_v8 }
 0x422   :  { %1956 = vmatprep.subr.mxu0 %v2511_v0 }
 0x423   :  { %1957 = vmatpush3.msra.mxu0 %v2590_v9 }
 0x424   :  { %1958 = vmatprep.subr.mxu0 %v2511_v0 }
 0x425   :  { %1959 = vmatpush3.msra.mxu0 %v2596_v10 }
 0x426   :  { %1960 = vmatprep.subr.mxu0 %v2511_v0 }
 0x427   :  { %1961 = vmatpush3.msra.mxu0 %v2602_v11 }
 0x428   :  { %1962 = vmatprep.subr.mxu0 %v2511_v0 }
 0x429   :  { %1963 = vmatpush3.msra.mxu0 %v2608_v12 }
 0x42a   :  { %1964 = vmatprep.subr.mxu0 %v2511_v0 }
 0x42b   :  { %1965 = vmatpush3.msra.mxu0 %v2614_v13 }
 0x42c   :  { %1966 = vmatprep.subr.mxu0 %v2511_v0 }
 0x42d   :  { %1967 = vmatpush3.msra.mxu0 %v2620_v14 }
 0x42e   :  { %1968 = vmatprep.subr.mxu0 %v2511_v0 }
 0x42f   :  { %1969 = vmatpush3.msra.mxu0 %v2626_v15 }
 0x430   :  { %1970 = vmatprep.subr.mxu0 %v2511_v0 }
 0x431   :  { %1971 = vmatpush3.msra.mxu0 %v2632_v16 }
 0x432   :  { %2010 = vmatprep.subr.mxu0 %v2511_v0 }
 0x4d2   :  { %v470_v22 = vpop.f32.mrf.mxu0 }
 0x4d3   :  { %v471_v23 = vadd.f32 %v470_v22, %v403_v21 }
 0x4d4   :  { %v1904_v24 = vpop.f32.mrf.mxu0 }
 0x4d5   :  { %v1446_v25 = vmul.f32 -1.442695, %v471_v23 }
 0x4d7   :  { %2329 = vpow2.f32 %v1446_v25 }
 0x4d8   :  { %2331 = vtanh.f32 %v471_v23 }
 0x4e4   :  { %v2330_v26 = vpop.eup %2329 }
 0x4e5   :  { %v477_v27 = vadd.f32 1.0, %v2330_v26  ;;  %v2332_v28 = vpop.eup %2331  ;;  %v2963_v26 = vld [vmem:[#allocation7 + $0x68] sm:$0xff] }
 0x4e6   :  { %v481_v29 = vadd.f32 %v2332_v28, %v397_v18  ;;  %v2971_v28 = vld [vmem:[#allocation7 + $0x58] sm:$0xff] }
 0x4e7   :  { %2333 = vrcp.f32 %v477_v27  ;;  %v2967_v27 = vld [vmem:[#allocation7 + $0x60] sm:$0xff] }
 0x4f4   :  { %v2334_v30 = vpop.eup %2333 }
 0x4f5   :  { %v482_v31 = vmul.f32 %v2334_v30, %v481_v29  ;;  %v2975_v29 = vld [vmem:[#allocation7 + $0x50] sm:$0xff] }
 0x4f7   :  { %2335 = vtanh.f32 %v482_v31 }
 0x504   :  { %v2336_v32 = vpop.eup %2335 }
 0x505   :  { %v484_v33 = vmul.f32 %v2336_v32, %v2334_v30  ;;  %v2979_v30 = vld [vmem:[#allocation7 + $0x48] sm:$0xff]  ;;  %v2987_v32 = vld [vmem:[#allocation7 + $0x38] sm:$0xff] }
 0x507   :  { %486 = vst [vmem:[#allocation9 + $0x20] sm:$0xff] %v484_v33  ;;  %1938 = vmatmul.mubr.f32.vlgmr.msra.gmra.mxu1 %v484_v33  ;;  %v2991_v33 = vld [vmem:[#allocation7 + $0x30] sm:$0xff] }
 0x508   :  { %1976 = vmatpush3.msra.mxu1 %v2547_v1  ;;  %2007 = vmatprep.mubr.msk.f32.mxu1 %vm2512_vm0, %v2511_v0 }
 0x509   :  { %1977 = vmatprep.subr.mxu1 %v2511_v0 }
 0x50a   :  { %1978 = vmatpush3.msra.mxu1 %v2549_v2 }
 0x50b   :  { %1979 = vmatprep.subr.mxu1 %v2511_v0 }
 0x50c   :  { %1980 = vmatpush3.msra.mxu1 %v2554_v3 }
 0x50d   :  { %1981 = vmatprep.subr.mxu1 %v2511_v0 }
 0x50e   :  { %1982 = vmatpush3.msra.mxu1 %v2560_v4 }
 0x50f   :  { %1983 = vmatprep.subr.mxu1 %v2511_v0 }
 0x510   :  { %1984 = vmatpush3.msra.mxu1 %v2566_v5 }
 0x511   :  { %1985 = vmatprep.subr.mxu1 %v2511_v0 }
 0x512   :  { %1986 = vmatpush3.msra.mxu1 %v2572_v6 }
 0x513   :  { %1987 = vmatprep.subr.mxu1 %v2511_v0 }
 0x514   :  { %1988 = vmatpush3.msra.mxu1 %v2578_v7 }
 0x515   :  { %1989 = vmatprep.subr.mxu1 %v2511_v0 }
 0x516   :  { %1990 = vmatpush3.msra.mxu1 %v2584_v8 }
 0x517   :  { %1991 = vmatprep.subr.mxu1 %v2511_v0 }
 0x518   :  { %1992 = vmatpush3.msra.mxu1 %v2590_v9 }
 0x519   :  { %1993 = vmatprep.subr.mxu1 %v2511_v0 }
 0x51a   :  { %1994 = vmatpush3.msra.mxu1 %v2596_v10 }
 0x51b   :  { %1995 = vmatprep.subr.mxu1 %v2511_v0 }
 0x51c   :  { %1996 = vmatpush3.msra.mxu1 %v2602_v11 }
 0x51d   :  { %1997 = vmatprep.subr.mxu1 %v2511_v0 }
 0x51e   :  { %1998 = vmatpush3.msra.mxu1 %v2608_v12 }
 0x51f   :  { %1999 = vmatprep.subr.mxu1 %v2511_v0 }
 0x520   :  { %2000 = vmatpush3.msra.mxu1 %v2614_v13 }
 0x521   :  { %2001 = vmatprep.subr.mxu1 %v2511_v0 }
 0x522   :  { %2002 = vmatpush3.msra.mxu1 %v2620_v14 }
 0x523   :  { %2003 = vmatprep.subr.mxu1 %v2511_v0 }
 0x524   :  { %2004 = vmatpush3.msra.mxu1 %v2626_v15 }
 0x525   :  { %2005 = vmatprep.subr.mxu1 %v2511_v0 }
 0x526   :  { %2006 = vmatpush3.msra.mxu1 %v2632_v16 }
 0x527   :  { %2045 = vmatprep.subr.mxu1 %v2511_v0 }
 0x5c7   :  { %v555_v35 = vpop.f32.mrf.mxu1 }
 0x5c8   :  { %v556_v36 = vadd.f32 %v555_v35, %v488_v34  ;;  %v2995_v34 = vld [vmem:[#allocation7 + $0x28] sm:$0xff]  ;;  %v2999_v35 = vld [vmem:[#allocation7 + $0x20] sm:$0xff] }
 0x5c9   :  { %v1939_v37 = vpop.f32.mrf.mxu1 }
 0x5ca   :  { %v1447_v38 = vmul.f32 -1.442695, %v556_v36  ;;  %v3007_v37 = vld [vmem:[#allocation7 + $0x10] sm:$0xff] }
 0x5cc   :  { %2337 = vpow2.f32 %v1447_v38  ;;  %v3011_v38 = vld [vmem:[#allocation7 + $0x8] sm:$0xff] }
 0x5cd   :  { %2339 = vtanh.f32 %v556_v36  ;;  %v3003_v36 = vld [vmem:[#allocation7 + $0x18] sm:$0xff] }
 0x5d9   :  { %v2338_v39 = vpop.eup %2337 }
 0x5da   :  { %v562_v40 = vadd.f32 1.0, %v2338_v39  ;;  %v2340_v41 = vpop.eup %2339  ;;  %v828_v39 = vld [vmem:[#allocation4 + $0x48] sm:$0xff] }
 0x5db   :  { %v566_v42 = vadd.f32 %v2340_v41, %v482_v31  ;;  %v2983_v31 = vld [vmem:[#allocation7 + $0x40] sm:$0xff] }
 0x5dc   :  { %2341 = vrcp.f32 %v562_v40 }
 0x5e9   :  { %v2342_v43 = vpop.eup %2341 }
 0x5ea   :  { %v567_v44 = vmul.f32 %v2342_v43, %v566_v42 }
 0x5ec   :  { %2343 = vtanh.f32 %v567_v44 }
 0x5f9   :  { %v2344_v45 = vpop.eup %2343 }
 0x5fa   :  { %v569_v46 = vmul.f32 %v2344_v45, %v2342_v43 }
 0x5fc   :  { %571 = vst [vmem:[#allocation9 + $0x28] sm:$0xff] %v569_v46  ;;  %1973 = vmatmul.mubr.f32.vlgmr.msra.gmra.mxu0 %v569_v46 }
 0x5fd   :  { %2011 = vmatpush3.msra.mxu0 %v2547_v1  ;;  %2042 = vmatprep.mubr.msk.f32.mxu0 %vm2512_vm0, %v2511_v0 }
 0x5fe   :  { %2012 = vmatprep.subr.mxu0 %v2511_v0 }
 0x5ff   :  { %2013 = vmatpush3.msra.mxu0 %v2549_v2 }
 0x600   :  { %2014 = vmatprep.subr.mxu0 %v2511_v0 }
 0x601   :  { %2015 = vmatpush3.msra.mxu0 %v2554_v3 }
 0x602   :  { %2016 = vmatprep.subr.mxu0 %v2511_v0 }
 0x603   :  { %2017 = vmatpush3.msra.mxu0 %v2560_v4 }
 0x604   :  { %2018 = vmatprep.subr.mxu0 %v2511_v0 }
 0x605   :  { %2019 = vmatpush3.msra.mxu0 %v2566_v5 }
 0x606   :  { %2020 = vmatprep.subr.mxu0 %v2511_v0 }
 0x607   :  { %2021 = vmatpush3.msra.mxu0 %v2572_v6 }
 0x608   :  { %2022 = vmatprep.subr.mxu0 %v2511_v0 }
 0x609   :  { %2023 = vmatpush3.msra.mxu0 %v2578_v7 }
 0x60a   :  { %2024 = vmatprep.subr.mxu0 %v2511_v0 }
 0x60b   :  { %2025 = vmatpush3.msra.mxu0 %v2584_v8 }
 0x60c   :  { %2026 = vmatprep.subr.mxu0 %v2511_v0 }
 0x60d   :  { %2027 = vmatpush3.msra.mxu0 %v2590_v9 }
 0x60e   :  { %2028 = vmatprep.subr.mxu0 %v2511_v0 }
 0x60f   :  { %2029 = vmatpush3.msra.mxu0 %v2596_v10 }
 0x610   :  { %2030 = vmatprep.subr.mxu0 %v2511_v0 }
 0x611   :  { %2031 = vmatpush3.msra.mxu0 %v2602_v11 }
 0x612   :  { %2032 = vmatprep.subr.mxu0 %v2511_v0 }
 0x613   :  { %2033 = vmatpush3.msra.mxu0 %v2608_v12 }
 0x614   :  { %2034 = vmatprep.subr.mxu0 %v2511_v0 }
 0x615   :  { %2035 = vmatpush3.msra.mxu0 %v2614_v13 }
 0x616   :  { %2036 = vmatprep.subr.mxu0 %v2511_v0 }
 0x617   :  { %2037 = vmatpush3.msra.mxu0 %v2620_v14 }
 0x618   :  { %2038 = vmatprep.subr.mxu0 %v2511_v0 }
 0x619   :  { %2039 = vmatpush3.msra.mxu0 %v2626_v15 }
 0x61a   :  { %2040 = vmatprep.subr.mxu0 %v2511_v0 }
 0x61b   :  { %2041 = vmatpush3.msra.mxu0 %v2632_v16 }
 0x61c   :  { %2080 = vmatprep.subr.mxu0 %v2511_v0 }
 0x6bc   :  { %v640_v48 = vpop.f32.mrf.mxu0 }
 0x6bd   :  { %v641_v49 = vadd.f32 %v640_v48, %v573_v47 }
 0x6be   :  { %v1974_v50 = vpop.f32.mrf.mxu0 }
 0x6bf   :  { %v1448_v51 = vmul.f32 -1.442695, %v641_v49 }
 0x6c1   :  { %2345 = vpow2.f32 %v1448_v51  ;;  %v3050_v51 = vld [vmem:[#allocation7] sm:$0xff] }
 0x6c2   :  { %2347 = vtanh.f32 %v641_v49 }
 0x6ce   :  { %v2346_v52 = vpop.eup %2345 }
 0x6cf   :  { %v647_v53 = vadd.f32 1.0, %v2346_v52  ;;  %v2348_v54 = vpop.eup %2347  ;;  %v913_v52 = vld [vmem:[#allocation4 + $0x50] sm:$0xff] }
 0x6d0   :  { %v651_v55 = vadd.f32 %v2348_v54, %v567_v44 }
 0x6d1   :  { %2349 = vrcp.f32 %v647_v53 }
 0x6de   :  { %v2350_v56 = vpop.eup %2349 }
 0x6df   :  { %v652_v57 = vmul.f32 %v2350_v56, %v651_v55 }
 0x6e1   :  { %2351 = vtanh.f32 %v652_v57 }
 0x6ee   :  { %v2352_v58 = vpop.eup %2351 }
 0x6ef   :  { %v654_v59 = vmul.f32 %v2352_v58, %v2350_v56 }
 0x6f1   :  { %656 = vst [vmem:[#allocation9 + $0x30] sm:$0xff] %v654_v59  ;;  %2008 = vmatmul.mubr.f32.vlgmr.msra.gmra.mxu1 %v654_v59 }
 0x6f2   :  { %2046 = vmatpush3.msra.mxu1 %v2547_v1  ;;  %2077 = vmatprep.mubr.msk.f32.mxu1 %vm2512_vm0, %v2511_v0 }
 0x6f3   :  { %2047 = vmatprep.subr.mxu1 %v2511_v0 }
 0x6f4   :  { %2048 = vmatpush3.msra.mxu1 %v2549_v2 }
 0x6f5   :  { %2049 = vmatprep.subr.mxu1 %v2511_v0 }
 0x6f6   :  { %2050 = vmatpush3.msra.mxu1 %v2554_v3 }
 0x6f7   :  { %2051 = vmatprep.subr.mxu1 %v2511_v0 }
 0x6f8   :  { %2052 = vmatpush3.msra.mxu1 %v2560_v4 }
 0x6f9   :  { %2053 = vmatprep.subr.mxu1 %v2511_v0 }
 0x6fa   :  { %2054 = vmatpush3.msra.mxu1 %v2566_v5 }
 0x6fb   :  { %2055 = vmatprep.subr.mxu1 %v2511_v0 }
 0x6fc   :  { %2056 = vmatpush3.msra.mxu1 %v2572_v6 }
 0x6fd   :  { %2057 = vmatprep.subr.mxu1 %v2511_v0 }
 0x6fe   :  { %2058 = vmatpush3.msra.mxu1 %v2578_v7 }
 0x6ff   :  { %2059 = vmatprep.subr.mxu1 %v2511_v0 }
 0x700   :  { %2060 = vmatpush3.msra.mxu1 %v2584_v8 }
 0x701   :  { %2061 = vmatprep.subr.mxu1 %v2511_v0 }
 0x702   :  { %2062 = vmatpush3.msra.mxu1 %v2590_v9 }
 0x703   :  { %2063 = vmatprep.subr.mxu1 %v2511_v0 }
 0x704   :  { %2064 = vmatpush3.msra.mxu1 %v2596_v10 }
 0x705   :  { %2065 = vmatprep.subr.mxu1 %v2511_v0 }
 0x706   :  { %2066 = vmatpush3.msra.mxu1 %v2602_v11 }
 0x707   :  { %2067 = vmatprep.subr.mxu1 %v2511_v0 }
 0x708   :  { %2068 = vmatpush3.msra.mxu1 %v2608_v12 }
 0x709   :  { %2069 = vmatprep.subr.mxu1 %v2511_v0 }
 0x70a   :  { %2070 = vmatpush3.msra.mxu1 %v2614_v13 }
 0x70b   :  { %2071 = vmatprep.subr.mxu1 %v2511_v0 }
 0x70c   :  { %2072 = vmatpush3.msra.mxu1 %v2620_v14 }
 0x70d   :  { %2073 = vmatprep.subr.mxu1 %v2511_v0 }
 0x70e   :  { %2074 = vmatpush3.msra.mxu1 %v2626_v15 }
 0x70f   :  { %2075 = vmatprep.subr.mxu1 %v2511_v0 }
 0x710   :  { %2076 = vmatpush3.msra.mxu1 %v2632_v16 }
 0x711   :  { %2115 = vmatprep.subr.mxu1 %v2511_v0 }
 0x7b1   :  { %v725_v61 = vpop.f32.mrf.mxu1 }
 0x7b2   :  { %v726_v62 = vadd.f32 %v725_v61, %v658_v60 }
 0x7b3   :  { %v2009_v63 = vpop.f32.mrf.mxu1 }
 0x7b4   :  { %v1449_v17 = vmul.f32 -1.442695, %v726_v62 }
 0x7b6   :  { %2353 = vpow2.f32 %v1449_v17 }
 0x7b7   :  { %2355 = vtanh.f32 %v726_v62 }
 0x7c3   :  { %v2354_v18 = vpop.eup %2353 }
 0x7c4   :  { %v732_v19 = vadd.f32 1.0, %v2354_v18  ;;  %v2356_v20 = vpop.eup %2355  ;;  %v998_v18 = vld [vmem:[#allocation4 + $0x58] sm:$0xff] }
 0x7c5   :  { %v736_v21 = vadd.f32 %v2356_v20, %v652_v57 }
 0x7c6   :  { %2357 = vrcp.f32 %v732_v19 }
 0x7d3   :  { %v2358_v22 = vpop.eup %2357 }
 0x7d4   :  { %v737_v23 = vmul.f32 %v2358_v22, %v736_v21 }
 0x7d6   :  { %2359 = vtanh.f32 %v737_v23 }
 0x7e3   :  { %v2360_v24 = vpop.eup %2359 }
 0x7e4   :  { %v739_v25 = vmul.f32 %v2360_v24, %v2358_v22 }
 0x7e6   :  { %741 = vst [vmem:[#allocation9 + $0x38] sm:$0xff] %v739_v25  ;;  %2043 = vmatmul.mubr.f32.vlgmr.msra.gmra.mxu0 %v739_v25 }
 0x7e7   :  { %2081 = vmatpush3.msra.mxu0 %v2547_v1  ;;  %2112 = vmatprep.mubr.msk.f32.mxu0 %vm2512_vm0, %v2511_v0  ;;  %v743_v1 = vld [vmem:[#allocation4 + $0x40] sm:$0xff] }
 0x7e8   :  { %2082 = vmatprep.subr.mxu0 %v2511_v0 }
 0x7e9   :  { %2083 = vmatpush3.msra.mxu0 %v2549_v2 }
 0x7ea   :  { %2084 = vmatprep.subr.mxu0 %v2511_v0 }
 0x7eb   :  { %2085 = vmatpush3.msra.mxu0 %v2554_v3 }
 0x7ec   :  { %2086 = vmatprep.subr.mxu0 %v2511_v0 }
 0x7ed   :  { %2087 = vmatpush3.msra.mxu0 %v2560_v4 }
 0x7ee   :  { %2088 = vmatprep.subr.mxu0 %v2511_v0 }
 0x7ef   :  { %2089 = vmatpush3.msra.mxu0 %v2566_v5 }
 0x7f0   :  { %2090 = vmatprep.subr.mxu0 %v2511_v0 }
 0x7f1   :  { %2091 = vmatpush3.msra.mxu0 %v2572_v6 }
 0x7f2   :  { %2092 = vmatprep.subr.mxu0 %v2511_v0 }
 0x7f3   :  { %2093 = vmatpush3.msra.mxu0 %v2578_v7 }
 0x7f4   :  { %2094 = vmatprep.subr.mxu0 %v2511_v0 }
 0x7f5   :  { %2095 = vmatpush3.msra.mxu0 %v2584_v8 }
 0x7f6   :  { %2096 = vmatprep.subr.mxu0 %v2511_v0 }
 0x7f7   :  { %2097 = vmatpush3.msra.mxu0 %v2590_v9 }
 0x7f8   :  { %2098 = vmatprep.subr.mxu0 %v2511_v0 }
 0x7f9   :  { %2099 = vmatpush3.msra.mxu0 %v2596_v10 }
 0x7fa   :  { %2100 = vmatprep.subr.mxu0 %v2511_v0 }
 0x7fb   :  { %2101 = vmatpush3.msra.mxu0 %v2602_v11 }
 0x7fc   :  { %2102 = vmatprep.subr.mxu0 %v2511_v0 }
 0x7fd   :  { %2103 = vmatpush3.msra.mxu0 %v2608_v12 }
 0x7fe   :  { %2104 = vmatprep.subr.mxu0 %v2511_v0 }
 0x7ff   :  { %2105 = vmatpush3.msra.mxu0 %v2614_v13 }
 0x800   :  { %2106 = vmatprep.subr.mxu0 %v2511_v0 }
 0x801   :  { %2107 = vmatpush3.msra.mxu0 %v2620_v14  ;;  %v2953_v14 = vld [vmem:[#allocation7 + $0x78] sm:$0xff] }
 0x802   :  { %2108 = vmatprep.subr.mxu0 %v2511_v0 }
 0x803   :  { %2109 = vmatpush3.msra.mxu0 %v2626_v15  ;;  %v2959_v15 = vld [vmem:[#allocation7 + $0x70] sm:$0xff] }
 0x804   :  { %2110 = vmatprep.subr.mxu0 %v2511_v0 }
 0x805   :  { %2111 = vmatpush3.msra.mxu0 %v2632_v16 }
 0x806   :  { %2150 = vmatprep.subr.mxu0 %v2511_v0 }
 0x8a6   :  { %v810_v2 = vpop.f32.mrf.mxu0 }
 0x8a7   :  { %v811_v3 = vadd.f32 %v810_v2, %v743_v1 }
 0x8a8   :  { %v2044_v4 = vpop.f32.mrf.mxu0 }
 0x8a9   :  { %v1450_v5 = vmul.f32 -1.442695, %v811_v3 }
 0x8ab   :  { %2361 = vpow2.f32 %v1450_v5 }
 0x8ac   :  { %2363 = vtanh.f32 %v811_v3 }
 0x8b8   :  { %v2362_v6 = vpop.eup %2361 }
 0x8b9   :  { %v817_v7 = vadd.f32 1.0, %v2362_v6  ;;  %v2364_v8 = vpop.eup %2363  ;;  %v1083_v6 = vld [vmem:[#allocation4 + $0x60] sm:$0xff] }
 0x8ba   :  { %v821_v9 = vadd.f32 %v2364_v8, %v737_v23 }
 0x8bb   :  { %2365 = vrcp.f32 %v817_v7 }
 0x8c8   :  { %v2366_v10 = vpop.eup %2365 }
 0x8c9   :  { %v2950_v11 = vmul.f32 %v2366_v10, %v821_v9 }
 0x8cb   :  { %2367 = vtanh.f32 %v2950_v11 }
 0x8d8   :  { %v2368_v12 = vpop.eup %2367 }
 0x8d9   :  { %v824_v13 = vmul.f32 %v2368_v12, %v2366_v10 }
 0x8db   :  { %826 = vst [vmem:[#allocation9 + $0x40] sm:$0xff] %v824_v13  ;;  %2078 = vmatmul.mubr.f32.vlgmr.msra.gmra.mxu1 %v824_v13 }
 0x8dc   :  { %2116 = vmatpush3.msra.mxu1 %v2953_v14  ;;  %2147 = vmatprep.mubr.msk.f32.mxu1 %vm2512_vm0, %v2511_v0 }
 0x8dd   :  { %2117 = vmatprep.subr.mxu1 %v2511_v0 }
 0x8de   :  { %2118 = vmatpush3.msra.mxu1 %v2959_v15 }
 0x8df   :  { %2119 = vmatprep.subr.mxu1 %v2511_v0 }
 0x8e0   :  { %2120 = vmatpush3.msra.mxu1 %v2963_v26 }
 0x8e1   :  { %2121 = vmatprep.subr.mxu1 %v2511_v0 }
 0x8e2   :  { %2122 = vmatpush3.msra.mxu1 %v2967_v27 }
 0x8e3   :  { %2123 = vmatprep.subr.mxu1 %v2511_v0 }
 0x8e4   :  { %2124 = vmatpush3.msra.mxu1 %v2971_v28 }
 0x8e5   :  { %2125 = vmatprep.subr.mxu1 %v2511_v0 }
 0x8e6   :  { %2126 = vmatpush3.msra.mxu1 %v2975_v29 }
 0x8e7   :  { %2127 = vmatprep.subr.mxu1 %v2511_v0 }
 0x8e8   :  { %2128 = vmatpush3.msra.mxu1 %v2979_v30 }
 0x8e9   :  { %2129 = vmatprep.subr.mxu1 %v2511_v0 }
 0x8ea   :  { %2130 = vmatpush3.msra.mxu1 %v2983_v31 }
 0x8eb   :  { %2131 = vmatprep.subr.mxu1 %v2511_v0 }
 0x8ec   :  { %2132 = vmatpush3.msra.mxu1 %v2987_v32 }
 0x8ed   :  { %2133 = vmatprep.subr.mxu1 %v2511_v0 }
 0x8ee   :  { %2134 = vmatpush3.msra.mxu1 %v2991_v33 }
 0x8ef   :  { %2135 = vmatprep.subr.mxu1 %v2511_v0 }
 0x8f0   :  { %2136 = vmatpush3.msra.mxu1 %v2995_v34 }
 0x8f1   :  { %2137 = vmatprep.subr.mxu1 %v2511_v0 }
 0x8f2   :  { %2138 = vmatpush3.msra.mxu1 %v2999_v35 }
 0x8f3   :  { %2139 = vmatprep.subr.mxu1 %v2511_v0 }
 0x8f4   :  { %2140 = vmatpush3.msra.mxu1 %v3003_v36 }
 0x8f5   :  { %2141 = vmatprep.subr.mxu1 %v2511_v0 }
 0x8f6   :  { %2142 = vmatpush3.msra.mxu1 %v3007_v37 }
 0x8f7   :  { %2143 = vmatprep.subr.mxu1 %v2511_v0 }
 0x8f8   :  { %2144 = vmatpush3.msra.mxu1 %v3011_v38 }
 0x8f9   :  { %2145 = vmatprep.subr.mxu1 %v2511_v0 }
 0x8fa   :  { %2146 = vmatpush3.msra.mxu1 %v2632_v16 }
 0x8fb   :  { %2185 = vmatprep.subr.mxu1 %v2511_v0 }
 0x99b   :  { %v895_v40 = vpop.f32.mrf.mxu1 }
 0x99c   :  { %v896_v41 = vadd.f32 %v895_v40, %v828_v39 }
 0x99d   :  { %v2079_v42 = vpop.f32.mrf.mxu1 }
 0x99e   :  { %v1451_v43 = vmul.f32 -1.442695, %v896_v41 }
 0x9a0   :  { %2369 = vpow2.f32 %v1451_v43 }
 0x9a1   :  { %2371 = vtanh.f32 %v896_v41 }
 0x9ad   :  { %v2370_v44 = vpop.eup %2369 }
 0x9ae   :  { %v902_v45 = vadd.f32 1.0, %v2370_v44  ;;  %v2372_v46 = vpop.eup %2371 }
 0x9af   :  { %v906_v47 = vadd.f32 %v2372_v46, %v2950_v11 }
 0x9b0   :  { %2373 = vrcp.f32 %v902_v45 }
 0x9bd   :  { %v2374_v48 = vpop.eup %2373 }
 0x9be   :  { %v907_v49 = vmul.f32 %v2374_v48, %v906_v47 }
 0x9c0   :  { %2375 = vtanh.f32 %v907_v49 }
 0x9cd   :  { %v2376_v50 = vpop.eup %2375 }
 0x9ce   :  { %v909_v16 = vmul.f32 %v2376_v50, %v2374_v48 }
 0x9d0   :  { %911 = vst [vmem:[#allocation9 + $0x48] sm:$0xff] %v909_v16  ;;  %2113 = vmatmul.mubr.f32.vlgmr.msra.gmra.mxu0 %v909_v16 }
 0x9d1   :  { %2151 = vmatpush3.msra.mxu0 %v2953_v14  ;;  %2182 = vmatprep.mubr.msk.f32.mxu0 %vm2512_vm0, %v2511_v0 }
 0x9d2   :  { %2152 = vmatprep.subr.mxu0 %v2511_v0 }
 0x9d3   :  { %2153 = vmatpush3.msra.mxu0 %v2959_v15 }
 0x9d4   :  { %2154 = vmatprep.subr.mxu0 %v2511_v0 }
 0x9d5   :  { %2155 = vmatpush3.msra.mxu0 %v2963_v26 }
 0x9d6   :  { %2156 = vmatprep.subr.mxu0 %v2511_v0 }
 0x9d7   :  { %2157 = vmatpush3.msra.mxu0 %v2967_v27 }
 0x9d8   :  { %2158 = vmatprep.subr.mxu0 %v2511_v0 }
 0x9d9   :  { %2159 = vmatpush3.msra.mxu0 %v2971_v28 }
 0x9da   :  { %2160 = vmatprep.subr.mxu0 %v2511_v0 }
 0x9db   :  { %2161 = vmatpush3.msra.mxu0 %v2975_v29 }
 0x9dc   :  { %2162 = vmatprep.subr.mxu0 %v2511_v0 }
 0x9dd   :  { %2163 = vmatpush3.msra.mxu0 %v2979_v30 }
 0x9de   :  { %2164 = vmatprep.subr.mxu0 %v2511_v0 }
 0x9df   :  { %2165 = vmatpush3.msra.mxu0 %v2983_v31 }
 0x9e0   :  { %2166 = vmatprep.subr.mxu0 %v2511_v0 }
 0x9e1   :  { %2167 = vmatpush3.msra.mxu0 %v2987_v32 }
 0x9e2   :  { %2168 = vmatprep.subr.mxu0 %v2511_v0 }
 0x9e3   :  { %2169 = vmatpush3.msra.mxu0 %v2991_v33 }
 0x9e4   :  { %2170 = vmatprep.subr.mxu0 %v2511_v0 }
 0x9e5   :  { %2171 = vmatpush3.msra.mxu0 %v2995_v34 }
 0x9e6   :  { %2172 = vmatprep.subr.mxu0 %v2511_v0 }
 0x9e7   :  { %2173 = vmatpush3.msra.mxu0 %v2999_v35 }
 0x9e8   :  { %2174 = vmatprep.subr.mxu0 %v2511_v0 }
 0x9e9   :  { %2175 = vmatpush3.msra.mxu0 %v3003_v36 }
 0x9ea   :  { %2176 = vmatprep.subr.mxu0 %v2511_v0 }
 0x9eb   :  { %2177 = vmatpush3.msra.mxu0 %v3007_v37 }
 0x9ec   :  { %2178 = vmatprep.subr.mxu0 %v2511_v0 }
 0x9ed   :  { %2179 = vmatpush3.msra.mxu0 %v3011_v38 }
 0x9ee   :  { %2180 = vmatprep.subr.mxu0 %v2511_v0 }
 0x9ef   :  { %2181 = vmatpush3.msra.mxu0 %v3050_v51 }
 0x9f0   :  { %2220 = vmatprep.subr.mxu0 %v2511_v0 }
 0xa90   :  { %v980_v53 = vpop.f32.mrf.mxu0 }
 0xa91   :  { %v981_v54 = vadd.f32 %v980_v53, %v913_v52  ;;  %v1338_v53 = vld [vmem:[#allocation4 + $0x78] sm:$0xff] }
 0xa92   :  { %v2114_v55 = vpop.f32.mrf.mxu0 }
 0xa93   :  { %v1452_v56 = vmul.f32 -1.442695, %v981_v54 }
 0xa95   :  { %2377 = vpow2.f32 %v1452_v56 }
 0xa96   :  { %2379 = vtanh.f32 %v981_v54 }
 0xaa2   :  { %v2378_v57 = vpop.eup %2377 }
 0xaa3   :  { %v987_v58 = vadd.f32 1.0, %v2378_v57  ;;  %v2380_v59 = vpop.eup %2379 }
 0xaa4   :  { %v991_v60 = vadd.f32 %v2380_v59, %v907_v49 }
 0xaa5   :  { %2381 = vrcp.f32 %v987_v58 }
 0xab2   :  { %v2382_v61 = vpop.eup %2381 }
 0xab3   :  { %v992_v62 = vmul.f32 %v2382_v61, %v991_v60 }
 0xab5   :  { %2383 = vtanh.f32 %v992_v62 }
 0xac2   :  { %v2384_v63 = vpop.eup %2383 }
 0xac3   :  { %v994_v17 = vmul.f32 %v2384_v63, %v2382_v61 }
 0xac5   :  { %996 = vst [vmem:[#allocation9 + $0x50] sm:$0xff] %v994_v17  ;;  %2148 = vmatmul.mubr.f32.vlgmr.msra.gmra.mxu1 %v994_v17 }
 0xac6   :  { %2186 = vmatpush3.msra.mxu1 %v2953_v14  ;;  %2217 = vmatprep.mubr.msk.f32.mxu1 %vm2512_vm0, %v2511_v0 }
 0xac7   :  { %2187 = vmatprep.subr.mxu1 %v2511_v0 }
 0xac8   :  { %2188 = vmatpush3.msra.mxu1 %v2959_v15 }
 0xac9   :  { %2189 = vmatprep.subr.mxu1 %v2511_v0 }
 0xaca   :  { %2190 = vmatpush3.msra.mxu1 %v2963_v26 }
 0xacb   :  { %2191 = vmatprep.subr.mxu1 %v2511_v0 }
 0xacc   :  { %2192 = vmatpush3.msra.mxu1 %v2967_v27 }
 0xacd   :  { %2193 = vmatprep.subr.mxu1 %v2511_v0 }
 0xace   :  { %2194 = vmatpush3.msra.mxu1 %v2971_v28 }
 0xacf   :  { %2195 = vmatprep.subr.mxu1 %v2511_v0 }
 0xad0   :  { %2196 = vmatpush3.msra.mxu1 %v2975_v29 }
 0xad1   :  { %2197 = vmatprep.subr.mxu1 %v2511_v0 }
 0xad2   :  { %2198 = vmatpush3.msra.mxu1 %v2979_v30 }
 0xad3   :  { %2199 = vmatprep.subr.mxu1 %v2511_v0 }
 0xad4   :  { %2200 = vmatpush3.msra.mxu1 %v2983_v31 }
 0xad5   :  { %2201 = vmatprep.subr.mxu1 %v2511_v0 }
 0xad6   :  { %2202 = vmatpush3.msra.mxu1 %v2987_v32 }
 0xad7   :  { %2203 = vmatprep.subr.mxu1 %v2511_v0 }
 0xad8   :  { %2204 = vmatpush3.msra.mxu1 %v2991_v33 }
 0xad9   :  { %2205 = vmatprep.subr.mxu1 %v2511_v0 }
 0xada   :  { %2206 = vmatpush3.msra.mxu1 %v2995_v34 }
 0xadb   :  { %2207 = vmatprep.subr.mxu1 %v2511_v0 }
 0xadc   :  { %2208 = vmatpush3.msra.mxu1 %v2999_v35 }
 0xadd   :  { %2209 = vmatprep.subr.mxu1 %v2511_v0 }
 0xade   :  { %2210 = vmatpush3.msra.mxu1 %v3003_v36 }
 0xadf   :  { %2211 = vmatprep.subr.mxu1 %v2511_v0 }
 0xae0   :  { %2212 = vmatpush3.msra.mxu1 %v3007_v37 }
 0xae1   :  { %2213 = vmatprep.subr.mxu1 %v2511_v0 }
 0xae2   :  { %2214 = vmatpush3.msra.mxu1 %v3011_v38 }
 0xae3   :  { %2215 = vmatprep.subr.mxu1 %v2511_v0 }
 0xae4   :  { %2216 = vmatpush3.msra.mxu1 %v3050_v51 }
 0xae5   :  { %2255 = vmatprep.subr.mxu1 %v2511_v0 }
 0xb85   :  { %v1065_v19 = vpop.f32.mrf.mxu1 }
 0xb86   :  { %v1066_v20 = vadd.f32 %v1065_v19, %v998_v18 }
 0xb87   :  { %v2149_v21 = vpop.f32.mrf.mxu1 }
 0xb88   :  { %v1453_v22 = vmul.f32 -1.442695, %v1066_v20 }
 0xb8a   :  { %2385 = vpow2.f32 %v1453_v22 }
 0xb8b   :  { %2387 = vtanh.f32 %v1066_v20 }
 0xb97   :  { %v2386_v23 = vpop.eup %2385 }
 0xb98   :  { %v1072_v24 = vadd.f32 1.0, %v2386_v23  ;;  %v2388_v25 = vpop.eup %2387 }
 0xb99   :  { %v1076_v1 = vadd.f32 %v2388_v25, %v992_v62 }
 0xb9a   :  { %2389 = vrcp.f32 %v1072_v24 }
 0xba7   :  { %v2390_v2 = vpop.eup %2389 }
 0xba8   :  { %v1077_v3 = vmul.f32 %v2390_v2, %v1076_v1 }
 0xbaa   :  { %2391 = vtanh.f32 %v1077_v3 }
 0xbb7   :  { %v2392_v4 = vpop.eup %2391 }
 0xbb8   :  { %v1079_v5 = vmul.f32 %v2392_v4, %v2390_v2 }
 0xbba   :  { %1081 = vst [vmem:[#allocation9 + $0x58] sm:$0xff] %v1079_v5  ;;  %2183 = vmatmul.mubr.f32.vlgmr.msra.gmra.mxu0 %v1079_v5 }
 0xbbb   :  { %2221 = vmatpush3.msra.mxu0 %v2953_v14  ;;  %2252 = vmatprep.mubr.msk.f32.mxu0 %vm2512_vm0, %v2511_v0 }
 0xbbc   :  { %2222 = vmatprep.subr.mxu0 %v2511_v0 }
 0xbbd   :  { %2223 = vmatpush3.msra.mxu0 %v2959_v15 }
 0xbbe   :  { %2224 = vmatprep.subr.mxu0 %v2511_v0 }
 0xbbf   :  { %2225 = vmatpush3.msra.mxu0 %v2963_v26 }
 0xbc0   :  { %2226 = vmatprep.subr.mxu0 %v2511_v0 }
 0xbc1   :  { %2227 = vmatpush3.msra.mxu0 %v2967_v27 }
 0xbc2   :  { %2228 = vmatprep.subr.mxu0 %v2511_v0 }
 0xbc3   :  { %2229 = vmatpush3.msra.mxu0 %v2971_v28 }
 0xbc4   :  { %2230 = vmatprep.subr.mxu0 %v2511_v0 }
 0xbc5   :  { %2231 = vmatpush3.msra.mxu0 %v2975_v29 }
 0xbc6   :  { %2232 = vmatprep.subr.mxu0 %v2511_v0 }
 0xbc7   :  { %2233 = vmatpush3.msra.mxu0 %v2979_v30 }
 0xbc8   :  { %2234 = vmatprep.subr.mxu0 %v2511_v0 }
 0xbc9   :  { %2235 = vmatpush3.msra.mxu0 %v2983_v31 }
 0xbca   :  { %2236 = vmatprep.subr.mxu0 %v2511_v0 }
 0xbcb   :  { %2237 = vmatpush3.msra.mxu0 %v2987_v32 }
 0xbcc   :  { %2238 = vmatprep.subr.mxu0 %v2511_v0 }
 0xbcd   :  { %2239 = vmatpush3.msra.mxu0 %v2991_v33 }
 0xbce   :  { %2240 = vmatprep.subr.mxu0 %v2511_v0 }
 0xbcf   :  { %2241 = vmatpush3.msra.mxu0 %v2995_v34 }
 0xbd0   :  { %2242 = vmatprep.subr.mxu0 %v2511_v0 }
 0xbd1   :  { %2243 = vmatpush3.msra.mxu0 %v2999_v35 }
 0xbd2   :  { %2244 = vmatprep.subr.mxu0 %v2511_v0 }
 0xbd3   :  { %2245 = vmatpush3.msra.mxu0 %v3003_v36 }
 0xbd4   :  { %2246 = vmatprep.subr.mxu0 %v2511_v0 }
 0xbd5   :  { %2247 = vmatpush3.msra.mxu0 %v3007_v37 }
 0xbd6   :  { %2248 = vmatprep.subr.mxu0 %v2511_v0 }
 0xbd7   :  { %2249 = vmatpush3.msra.mxu0 %v3011_v38 }
 0xbd8   :  { %2250 = vmatprep.subr.mxu0 %v2511_v0 }
 0xbd9   :  { %2251 = vmatpush3.msra.mxu0 %v3050_v51 }
 0xc7a   :  { %v1150_v7 = vpop.f32.mrf.mxu0 }
 0xc7b   :  { %v1151_v8 = vadd.f32 %v1150_v7, %v1083_v6 }
 0xc7c   :  { %v2184_v9 = vpop.f32.mrf.mxu0 }
 0xc7d   :  { %v1454_v10 = vmul.f32 -1.442695, %v1151_v8 }
 0xc7f   :  { %2393 = vpow2.f32 %v1454_v10 }
 0xc80   :  { %2395 = vtanh.f32 %v1151_v8 }
 0xc8c   :  { %v2394_v11 = vpop.eup %2393 }
 0xc8d   :  { %v1157_v12 = vadd.f32 1.0, %v2394_v11  ;;  %v2396_v13 = vpop.eup %2395 }
 0xc8e   :  { %v1161_v39 = vadd.f32 %v2396_v13, %v1077_v3 }
 0xc8f   :  { %2397 = vrcp.f32 %v1157_v12 }
 0xc9c   :  { %v2398_v40 = vpop.eup %2397 }
 0xc9d   :  { %v1162_v41 = vmul.f32 %v2398_v40, %v1161_v39 }
 0xc9f   :  { %2399 = vtanh.f32 %v1162_v41 }
 0xcac   :  { %v2400_v42 = vpop.eup %2399 }
 0xcad   :  { %v1164_v43 = vmul.f32 %v2400_v42, %v2398_v40 }
 0xcaf   :  { %1166 = vst [vmem:[#allocation9 + $0x60] sm:$0xff] %v1164_v43  ;;  %2218 = vmatmul.mubr.f32.vlgmr.msra.gmra.mxu1 %v1164_v43 }
 0xcb0   :  { %2256 = vmatpush3.msra.mxu1 %v2953_v14  ;;  %2287 = vmatprep.mubr.msk.f32.mxu1 %vm2512_vm0, %v2511_v0  ;;  %v1168_v14 = vld [vmem:[#allocation4 + $0x68] sm:$0xff] }
 0xcb1   :  { %2257 = vmatprep.subr.mxu1 %v2511_v0 }
 0xcb2   :  { %2258 = vmatpush3.msra.mxu1 %v2959_v15 }
 0xcb3   :  { %2259 = vmatprep.subr.mxu1 %v2511_v0 }
 0xcb4   :  { %2260 = vmatpush3.msra.mxu1 %v2963_v26 }
 0xcb5   :  { %2261 = vmatprep.subr.mxu1 %v2511_v0 }
 0xcb6   :  { %2262 = vmatpush3.msra.mxu1 %v2967_v27 }
 0xcb7   :  { %2263 = vmatprep.subr.mxu1 %v2511_v0 }
 0xcb8   :  { %2264 = vmatpush3.msra.mxu1 %v2971_v28 }
 0xcb9   :  { %2265 = vmatprep.subr.mxu1 %v2511_v0 }
 0xcba   :  { %2266 = vmatpush3.msra.mxu1 %v2975_v29 }
 0xcbb   :  { %2267 = vmatprep.subr.mxu1 %v2511_v0 }
 0xcbc   :  { %2268 = vmatpush3.msra.mxu1 %v2979_v30 }
 0xcbd   :  { %2269 = vmatprep.subr.mxu1 %v2511_v0 }
 0xcbe   :  { %2270 = vmatpush3.msra.mxu1 %v2983_v31 }
 0xcbf   :  { %2271 = vmatprep.subr.mxu1 %v2511_v0 }
 0xcc0   :  { %2272 = vmatpush3.msra.mxu1 %v2987_v32 }
 0xcc1   :  { %2273 = vmatprep.subr.mxu1 %v2511_v0 }
 0xcc2   :  { %2274 = vmatpush3.msra.mxu1 %v2991_v33 }
 0xcc3   :  { %2275 = vmatprep.subr.mxu1 %v2511_v0 }
 0xcc4   :  { %2276 = vmatpush3.msra.mxu1 %v2995_v34 }
 0xcc5   :  { %2277 = vmatprep.subr.mxu1 %v2511_v0 }
 0xcc6   :  { %2278 = vmatpush3.msra.mxu1 %v2999_v35 }
 0xcc7   :  { %2279 = vmatprep.subr.mxu1 %v2511_v0 }
 0xcc8   :  { %2280 = vmatpush3.msra.mxu1 %v3003_v36 }
 0xcc9   :  { %2281 = vmatprep.subr.mxu1 %v2511_v0 }
 0xcca   :  { %2282 = vmatpush3.msra.mxu1 %v3007_v37 }
 0xccb   :  { %2283 = vmatprep.subr.mxu1 %v2511_v0 }
 0xccc   :  { %2284 = vmatpush3.msra.mxu1 %v3011_v38 }
 0xccd   :  { %2285 = vmatprep.subr.mxu1 %v2511_v0  ;;  %v1253_v0 = vld [vmem:[#allocation4 + $0x70] sm:$0xff] }
 0xcce   :  { %2286 = vmatpush3.msra.mxu1 %v3050_v51 }
 0xd6f   :  { %v1235_v15 = vpop.f32.mrf.mxu1 }
 0xd70   :  { %v1236_v26 = vadd.f32 %v1235_v15, %v1168_v14 }
 0xd71   :  { %v2219_v27 = vpop.f32.mrf.mxu1 }
 0xd72   :  { %v1455_v28 = vmul.f32 -1.442695, %v1236_v26 }
 0xd74   :  { %2401 = vpow2.f32 %v1455_v28 }
 0xd75   :  { %2403 = vtanh.f32 %v1236_v26 }
 0xd81   :  { %v2402_v29 = vpop.eup %2401 }
 0xd82   :  { %v1242_v30 = vadd.f32 1.0, %v2402_v29  ;;  %v2404_v31 = vpop.eup %2403 }
 0xd83   :  { %v1246_v32 = vadd.f32 %v2404_v31, %v1162_v41 }
 0xd84   :  { %2405 = vrcp.f32 %v1242_v30 }
 0xd91   :  { %v2406_v33 = vpop.eup %2405 }
 0xd92   :  { %v1247_v34 = vmul.f32 %v2406_v33, %v1246_v32 }
 0xd94   :  { %2407 = vtanh.f32 %v1247_v34 }
 0xda1   :  { %v2408_v35 = vpop.eup %2407 }
 0xda2   :  { %v1249_v36 = vmul.f32 %v2408_v35, %v2406_v33 }
 0xda4   :  { %1251 = vst [vmem:[#allocation9 + $0x68] sm:$0xff] %v1249_v36  ;;  %2253 = vmatmul.mubr.f32.vlgmr.msra.gmra.mxu0 %v1249_v36 }
 0xe64   :  { %v1320_v37 = vpop.f32.mrf.mxu0 }
 0xe65   :  { %v1321_v38 = vadd.f32 %v1320_v37, %v1253_v0 }
 0xe66   :  { %v2254_v44 = vpop.f32.mrf.mxu0 }
 0xe67   :  { %v1456_v45 = vmul.f32 -1.442695, %v1321_v38 }
 0xe69   :  { %2409 = vpow2.f32 %v1456_v45 }
 0xe6a   :  { %2411 = vtanh.f32 %v1321_v38 }
 0xe76   :  { %v2410_v46 = vpop.eup %2409 }
 0xe77   :  { %v1327_v47 = vadd.f32 1.0, %v2410_v46  ;;  %v2412_v48 = vpop.eup %2411 }
 0xe78   :  { %v1331_v49 = vadd.f32 %v2412_v48, %v1247_v34 }
 0xe79   :  { %2413 = vrcp.f32 %v1327_v47 }
 0xe86   :  { %v2414_v50 = vpop.eup %2413 }
 0xe87   :  { %v1332_v16 = vmul.f32 %v2414_v50, %v1331_v49 }
 0xe89   :  { %2415 = vtanh.f32 %v1332_v16 }
 0xe96   :  { %v2416_v51 = vpop.eup %2415 }
 0xe97   :  { %v1334_v52 = vmul.f32 %v2416_v51, %v2414_v50 }
 0xe99   :  { %1336 = vst [vmem:[#allocation9 + $0x70] sm:$0xff] %v1334_v52  ;;  %2288 = vmatmul.mubr.f32.vlgmr.msra.gmra.mxu1 %v1334_v52 }
 0xf59   :  { %v1405_v54 = vpop.f32.mrf.mxu1 }
 0xf5a   :  { %v1406_v55 = vadd.f32 %v1405_v54, %v1338_v53 }
 0xf5b   :  { %v2289_v56 = vpop.f32.mrf.mxu1 }
 0xf5c   :  { %v1457_v57 = vmul.f32 -1.442695, %v1406_v55 }
 0xf5e   :  { %2417 = vpow2.f32 %v1457_v57 }
 0xf5f   :  { %2419 = vtanh.f32 %v1406_v55 }
 0xf6b   :  { %v2418_v58 = vpop.eup %2417 }
 0xf6c   :  { %v1412_v59 = vadd.f32 1.0, %v2418_v58  ;;  %v2420_v60 = vpop.eup %2419 }
 0xf6d   :  { %v1416_v61 = vadd.f32 %v2420_v60, %v1332_v16 }
 0xf6e   :  { %2421 = vrcp.f32 %v1412_v59 }
 0xf7b   :  { %v2422_v62 = vpop.eup %2421 }
 0xf7c   :  { %v1417_v63 = vmul.f32 %v2422_v62, %v1416_v61 }
 0xf7e   :  { %2423 = vtanh.f32 %v1417_v63 }
 0xf8b   :  { %v2424_v17 = vpop.eup %2423 }
 0xf8c   :  { %v1419_v18 = vmul.f32 %v2424_v17, %v2422_v62 }
 0xf8e   :  { %1421 = vst [vmem:[#allocation9 + $0x78] sm:$0xff] %v1419_v18 }
 0xf8f   :  { %2492 = shalt.err (!%p2489_p0)
}
 0xf90   :  { %1435 = dma.vmem_to_hbm [thread:$0]  %s1430_s1, 2048, %s3162_s2, [#allocation6], %s2508_s12, %s2508_s12, %s2509_s13  }
 0xf91   :  { %2505 = dma.done.wait [#allocation6], 2048  }
 0xf92   :  { %2506 = vsyncadd [#allocation6], 4294965248 }
 0xf93   :  { %1439 = vsyncpa [#allocation5], 1 }
 0xf94   :  { %1440 = vsyncpa [#allocation8], 1 }
 0xf95   :  { %1441 = vsyncpa [#allocation6], 1 }

// kernel: tpu_custom_call.1
= control target key start
LH: loop header
LB: loop body
LE: loop exit
PB: predicated region body
PF: predicated region fallthrough
CT: control target
= control target key end

     0   :  { %7 = vsyncpa [#allocation5], 0  ;;  %s3160_s0 = inlined_call_operand.hbm [shape: f32[16,8,128], index: 0, kind: input, shape index: {}]   ;;  %s3161_s1 = inlined_call_operand.hbm [shape: f32[128,128], index: 1, kind: input, shape index: {}]   ;;  %s3162_s2 = inlined_call_operand.hbm [shape: f32[16,8,128], index: 2, kind: output, shape index: {}]  }
   0x1   :  { %8 = vsyncpa [#allocation8], 0 }
   0x2   :  { %9 = vsyncpa [#allocation6], 0  ;;  %s2507_s9 = smov [#allocation4]  }
   0x3   :  { %s15_s10 = sshll.u32 %s2507_s9, 4  ;;  %s16_s10 = int_to_ptr.vmem [resolvable:$true] %s15_s10 }
   0x4   :  { %s2449_s11 = scalar_lea.vmem %s16_s10, 2048  ;;  %p2454_p1 = scmp.lt.s32.totalorder %s16_s10, %s16_s10 }
   0x5   :  { %p2450_p0 = scmp.ne.s32.totalorder %s16_s10, %s2449_s11  ;;  %p2455_p2 = scmp.lt.s32.totalorder %s2449_s11, %s2449_s11 }
   0x7   :  { %p2456_p3 = por %p2455_p2, %p2454_p1 }
   0x9   :  { %p2457_p4 = pnand %p2456_p3, %p2450_p0 }
   0xb   :  { %2460 = shalt.err (!%p2457_p4)
}
   0xc   :  { %s2508_s12 = smov 128   ;;  %s2509_s13 = smov 8  }
   0xd   :  { %21 = dma.hbm_to_vmem [thread:$0]  %s3160_s0, 2048, %s16_s10, [#allocation5], %s2508_s12, %s2508_s12, %s2509_s13  }
   0xe   :  { %s2510_s16 = smov [#allocation7]  }
   0xf   :  { %s27_s17 = sshll.u32 %s2510_s16, 4  ;;  %s28_s17 = int_to_ptr.vmem [resolvable:$true] %s27_s17 }
  0x10   :  { %s2469_s18 = scalar_lea.vmem %s28_s17, 2048  ;;  %p2474_p6 = scmp.lt.s32.totalorder %s28_s17, %s28_s17 }
  0x11   :  { %p2470_p5 = scmp.ne.s32.totalorder %s28_s17, %s2469_s18  ;;  %p2475_p7 = scmp.lt.s32.totalorder %s2469_s18, %s2469_s18 }
  0x13   :  { %p2476_p8 = por %p2475_p7, %p2474_p6 }
  0x15   :  { %p2477_p9 = pnand %p2476_p8, %p2470_p5 }
  0x17   :  { %2480 = shalt.err (!%p2477_p9)
}
  0x18   :  { %33 = dma.hbm_to_vmem [thread:$0]  %s3161_s1, 2048, %s28_s17, [#allocation8], %s2508_s12, %s2508_s12, %s2509_s13  }
  0x19   :  { %2501 = dma.done.wait [#allocation5], 2048  }
  0x1a   :  { %2502 = vsyncadd [#allocation5], 4294965248 }
  0x1b   :  { %2503 = dma.done.wait [#allocation8], 2048  }
  0x1c   :  { %2504 = vsyncadd [#allocation8], 4294965248  ;;  %v2511_v0 = vmov 0.0   ;;  %vm2512_vm0 = vmmov 0   ;;  %v2547_v1 = vld [vmem:[#allocation7 + $0x78] sm:$0xff]  ;;  %v2549_v2 = vld [vmem:[#allocation7 + $0x70] sm:$0xff] }
  0x1d   :  { %1730 = vmatprep.subr.mxu0 %v2511_v0  ;;  %1762 = vmatprep.mubr.msk.f32.mxu0 %vm2512_vm0, %v2511_v0  ;;  %v2554_v3 = vld [vmem:[#allocation7 + $0x68] sm:$0xff]  ;;  %v2560_v4 = vld [vmem:[#allocation7 + $0x60] sm:$0xff]  ;;  %v2566_v5 = vld [vmem:[#allocation7 + $0x58] sm:$0xff]  ;;  %s2513_s0 = smov [#allocation9]  }
  0x1e   :  { %1765 = vmatprep.subr.mxu1 %v2511_v0  ;;  %1797 = vmatprep.mubr.msk.f32.mxu1 %vm2512_vm0, %v2511_v0  ;;  %v2572_v6 = vld [vmem:[#allocation7 + $0x50] sm:$0xff]  ;;  %v2578_v7 = vld [vmem:[#allocation7 + $0x48] sm:$0xff]  ;;  %v2584_v8 = vld [vmem:[#allocation7 + $0x40] sm:$0xff]  ;;  %s1429_s1 = sshll.u32 %s2513_s0, 4  ;;  %s1430_s1 = int_to_ptr.vmem [resolvable:$true] %s1429_s1 }
  0x1f   :  { %1731 = vmatpush3.msra.mxu0 %v2547_v1  ;;  %1766 = vmatpush3.msra.mxu1 %v2547_v1  ;;  %v2590_v9 = vld [vmem:[#allocation7 + $0x38] sm:$0xff]  ;;  %v2596_v10 = vld [vmem:[#allocation7 + $0x30] sm:$0xff]  ;;  %v2602_v11 = vld [vmem:[#allocation7 + $0x28] sm:$0xff]  ;;  %s2481_s21 = scalar_lea.vmem %s1430_s1, 2048  ;;  %p2486_p11 = scmp.lt.s32.totalorder %s1430_s1, %s1430_s1 }
  0x20   :  { %1732 = vmatprep.subr.mxu0 %v2511_v0  ;;  %1767 = vmatprep.subr.mxu1 %v2511_v0  ;;  %v2608_v12 = vld [vmem:[#allocation7 + $0x20] sm:$0xff]  ;;  %v2614_v13 = vld [vmem:[#allocation7 + $0x18] sm:$0xff]  ;;  %v2620_v14 = vld [vmem:[#allocation7 + $0x10] sm:$0xff]  ;;  %p2482_p10 = scmp.ne.s32.totalorder %s1430_s1, %s2481_s21  ;;  %p2487_p12 = scmp.lt.s32.totalorder %s2481_s21, %s2481_s21 }
  0x21   :  { %1733 = vmatpush3.msra.mxu0 %v2549_v2  ;;  %1768 = vmatpush3.msra.mxu1 %v2549_v2  ;;  %v2626_v15 = vld [vmem:[#allocation7 + $0x8] sm:$0xff]  ;;  %v2632_v16 = vld [vmem:[#allocation7] sm:$0xff]  ;;  %v233_v42 = vld [vmem:[#allocation4 + $0x10] sm:$0xff] }
  0x22   :  { %1734 = vmatprep.subr.mxu0 %v2511_v0  ;;  %1769 = vmatprep.subr.mxu1 %v2511_v0  ;;  %v64_v17 = vld [vmem:[#allocation4] sm:$0xff]  ;;  %v148_v29 = vld [vmem:[#allocation4 + $0x8] sm:$0xff]  ;;  %v318_v55 = vld [vmem:[#allocation4 + $0x18] sm:$0xff]  ;;  %p2488_p13 = por %p2487_p12, %p2486_p11 }
  0x23   :  { %1735 = vmatpush3.msra.mxu0 %v2554_v3  ;;  %1770 = vmatpush3.msra.mxu1 %v2554_v3 }
  0x24   :  { %1736 = vmatprep.subr.mxu0 %v2511_v0  ;;  %1771 = vmatprep.subr.mxu1 %v2511_v0  ;;  %p2489_p0 = pnand %p2488_p13, %p2482_p10 }
  0x25   :  { %1737 = vmatpush3.msra.mxu0 %v2560_v4  ;;  %1772 = vmatpush3.msra.mxu1 %v2560_v4 }
  0x26   :  { %1738 = vmatprep.subr.mxu0 %v2511_v0  ;;  %1773 = vmatprep.subr.mxu1 %v2511_v0 }
  0x27   :  { %1739 = vmatpush3.msra.mxu0 %v2566_v5  ;;  %1774 = vmatpush3.msra.mxu1 %v2566_v5 }
  0x28   :  { %1740 = vmatprep.subr.mxu0 %v2511_v0  ;;  %1775 = vmatprep.subr.mxu1 %v2511_v0 }
  0x29   :  { %1741 = vmatpush3.msra.mxu0 %v2572_v6  ;;  %1776 = vmatpush3.msra.mxu1 %v2572_v6 }
  0x2a   :  { %1742 = vmatprep.subr.mxu0 %v2511_v0  ;;  %1777 = vmatprep.subr.mxu1 %v2511_v0 }
  0x2b   :  { %1743 = vmatpush3.msra.mxu0 %v2578_v7  ;;  %1778 = vmatpush3.msra.mxu1 %v2578_v7 }
  0x2c   :  { %1744 = vmatprep.subr.mxu0 %v2511_v0  ;;  %1779 = vmatprep.subr.mxu1 %v2511_v0 }
  0x2d   :  { %1745 = vmatpush3.msra.mxu0 %v2584_v8  ;;  %1780 = vmatpush3.msra.mxu1 %v2584_v8 }
  0x2e   :  { %1746 = vmatprep.subr.mxu0 %v2511_v0  ;;  %1781 = vmatprep.subr.mxu1 %v2511_v0 }
  0x2f   :  { %1747 = vmatpush3.msra.mxu0 %v2590_v9  ;;  %1782 = vmatpush3.msra.mxu1 %v2590_v9 }
  0x30   :  { %1748 = vmatprep.subr.mxu0 %v2511_v0  ;;  %1783 = vmatprep.subr.mxu1 %v2511_v0 }
  0x31   :  { %1749 = vmatpush3.msra.mxu0 %v2596_v10  ;;  %1784 = vmatpush3.msra.mxu1 %v2596_v10 }
  0x32   :  { %1750 = vmatprep.subr.mxu0 %v2511_v0  ;;  %1785 = vmatprep.subr.mxu1 %v2511_v0 }
  0x33   :  { %1751 = vmatpush3.msra.mxu0 %v2602_v11  ;;  %1786 = vmatpush3.msra.mxu1 %v2602_v11 }
  0x34   :  { %1752 = vmatprep.subr.mxu0 %v2511_v0  ;;  %1787 = vmatprep.subr.mxu1 %v2511_v0 }
  0x35   :  { %1753 = vmatpush3.msra.mxu0 %v2608_v12  ;;  %1788 = vmatpush3.msra.mxu1 %v2608_v12 }
  0x36   :  { %1754 = vmatprep.subr.mxu0 %v2511_v0  ;;  %1789 = vmatprep.subr.mxu1 %v2511_v0 }
  0x37   :  { %1755 = vmatpush3.msra.mxu0 %v2614_v13  ;;  %1790 = vmatpush3.msra.mxu1 %v2614_v13 }
  0x38   :  { %1756 = vmatprep.subr.mxu0 %v2511_v0  ;;  %1791 = vmatprep.subr.mxu1 %v2511_v0 }
  0x39   :  { %1757 = vmatpush3.msra.mxu0 %v2620_v14  ;;  %1792 = vmatpush3.msra.mxu1 %v2620_v14 }
  0x3a   :  { %1758 = vmatprep.subr.mxu0 %v2511_v0  ;;  %1793 = vmatprep.subr.mxu1 %v2511_v0 }
  0x3b   :  { %1759 = vmatpush3.msra.mxu0 %v2626_v15  ;;  %1794 = vmatpush3.msra.mxu1 %v2626_v15 }
  0x3c   :  { %1760 = vmatprep.subr.mxu0 %v2511_v0  ;;  %1795 = vmatprep.subr.mxu1 %v2511_v0 }
  0x3d   :  { %1761 = vmatpush3.msra.mxu0 %v2632_v16  ;;  %1796 = vmatpush3.msra.mxu1 %v2632_v16 }
  0x3e   :  { %1763 = vmatmul.mubr.f32.vlgmr.msra.gmra.mxu0 %v2511_v0  ;;  %1800 = vmatprep.subr.mxu0 %v2511_v0 }
  0x3f   :  { %1801 = vmatpush3.msra.mxu0 %v2547_v1  ;;  %1832 = vmatprep.mubr.msk.f32.mxu0 %vm2512_vm0, %v2511_v0 }
  0x40   :  { %1802 = vmatprep.subr.mxu0 %v2511_v0  ;;  %1835 = vmatprep.subr.mxu1 %v2511_v0 }
  0x41   :  { %1803 = vmatpush3.msra.mxu0 %v2549_v2 }
  0x42   :  { %1804 = vmatprep.subr.mxu0 %v2511_v0 }
  0x43   :  { %1805 = vmatpush3.msra.mxu0 %v2554_v3 }
  0x44   :  { %1806 = vmatprep.subr.mxu0 %v2511_v0 }
  0x45   :  { %1807 = vmatpush3.msra.mxu0 %v2560_v4 }
  0x46   :  { %1808 = vmatprep.subr.mxu0 %v2511_v0 }
  0x47   :  { %1809 = vmatpush3.msra.mxu0 %v2566_v5 }
  0x48   :  { %1810 = vmatprep.subr.mxu0 %v2511_v0 }
  0x49   :  { %1811 = vmatpush3.msra.mxu0 %v2572_v6 }
  0x4a   :  { %1812 = vmatprep.subr.mxu0 %v2511_v0 }
  0x4b   :  { %1813 = vmatpush3.msra.mxu0 %v2578_v7 }
  0x4c   :  { %1814 = vmatprep.subr.mxu0 %v2511_v0 }
  0x4d   :  { %1815 = vmatpush3.msra.mxu0 %v2584_v8 }
  0x4e   :  { %1816 = vmatprep.subr.mxu0 %v2511_v0 }
  0x4f   :  { %1817 = vmatpush3.msra.mxu0 %v2590_v9 }
  0x50   :  { %1818 = vmatprep.subr.mxu0 %v2511_v0 }
  0x51   :  { %1819 = vmatpush3.msra.mxu0 %v2596_v10 }
  0x52   :  { %1820 = vmatprep.subr.mxu0 %v2511_v0 }
  0x53   :  { %1821 = vmatpush3.msra.mxu0 %v2602_v11 }
  0x54   :  { %1822 = vmatprep.subr.mxu0 %v2511_v0 }
  0x55   :  { %1823 = vmatpush3.msra.mxu0 %v2608_v12 }
  0x56   :  { %1824 = vmatprep.subr.mxu0 %v2511_v0 }
  0x57   :  { %1825 = vmatpush3.msra.mxu0 %v2614_v13 }
  0x58   :  { %1826 = vmatprep.subr.mxu0 %v2511_v0 }
  0x59   :  { %1827 = vmatpush3.msra.mxu0 %v2620_v14 }
  0x5a   :  { %1828 = vmatprep.subr.mxu0 %v2511_v0 }
  0x5b   :  { %1829 = vmatpush3.msra.mxu0 %v2626_v15 }
  0x5c   :  { %1830 = vmatprep.subr.mxu0 %v2511_v0 }
  0x5d   :  { %1831 = vmatpush3.msra.mxu0 %v2632_v16 }
  0x5e   :  { %1870 = vmatprep.subr.mxu0 %v2511_v0 }
  0xfe   :  { %v131_v18 = vpop.f32.mrf.mxu0 }
  0xff   :  { %v132_v19 = vadd.f32 %v131_v18, %v64_v17 }
 0x100   :  { %v1764_v20 = vpop.f32.mrf.mxu0 }
 0x101   :  { %v1442_v21 = vmul.f32 -1.442695, %v132_v19 }
 0x103   :  { %2297 = vpow2.f32 %v1442_v21  ;;  %v403_v21 = vld [vmem:[#allocation4 + $0x20] sm:$0xff] }
 0x104   :  { %2299 = vtanh.f32 %v132_v19 }
 0x110   :  { %v2298_v22 = vpop.eup %2297 }
 0x111   :  { %v138_v23 = vadd.f32 1.0, %v2298_v22  ;;  %v2300_v24 = vpop.eup %2299 }
 0x113   :  { %2301 = vrcp.f32 %v138_v23 }
 0x120   :  { %v2302_v25 = vpop.eup %2301 }
 0x121   :  { %v143_v26 = vmul.f32 %v2302_v25, %v2300_v24 }
 0x123   :  { %2303 = vtanh.f32 %v143_v26 }
 0x130   :  { %v2304_v27 = vpop.eup %2303 }
 0x131   :  { %v145_v28 = vmul.f32 %v2304_v27, %v2302_v25 }
 0x133   :  { %146 = vst [vmem:[#allocation9] sm:$0xff] %v145_v28  ;;  %1798 = vmatmul.mubr.f32.vlgmr.msra.gmra.mxu1 %v145_v28 }
 0x134   :  { %1836 = vmatpush3.msra.mxu1 %v2547_v1  ;;  %1867 = vmatprep.mubr.msk.f32.mxu1 %vm2512_vm0, %v2511_v0 }
 0x135   :  { %1837 = vmatprep.subr.mxu1 %v2511_v0 }
 0x136   :  { %1838 = vmatpush3.msra.mxu1 %v2549_v2 }
 0x137   :  { %1839 = vmatprep.subr.mxu1 %v2511_v0 }
 0x138   :  { %1840 = vmatpush3.msra.mxu1 %v2554_v3 }
 0x139   :  { %1841 = vmatprep.subr.mxu1 %v2511_v0 }
 0x13a   :  { %1842 = vmatpush3.msra.mxu1 %v2560_v4 }
 0x13b   :  { %1843 = vmatprep.subr.mxu1 %v2511_v0 }
 0x13c   :  { %1844 = vmatpush3.msra.mxu1 %v2566_v5 }
 0x13d   :  { %1845 = vmatprep.subr.mxu1 %v2511_v0 }
 0x13e   :  { %1846 = vmatpush3.msra.mxu1 %v2572_v6 }
 0x13f   :  { %1847 = vmatprep.subr.mxu1 %v2511_v0 }
 0x140   :  { %1848 = vmatpush3.msra.mxu1 %v2578_v7 }
 0x141   :  { %1849 = vmatprep.subr.mxu1 %v2511_v0 }
 0x142   :  { %1850 = vmatpush3.msra.mxu1 %v2584_v8 }
 0x143   :  { %1851 = vmatprep.subr.mxu1 %v2511_v0 }
 0x144   :  { %1852 = vmatpush3.msra.mxu1 %v2590_v9 }
 0x145   :  { %1853 = vmatprep.subr.mxu1 %v2511_v0 }
 0x146   :  { %1854 = vmatpush3.msra.mxu1 %v2596_v10 }
 0x147   :  { %1855 = vmatprep.subr.mxu1 %v2511_v0 }
 0x148   :  { %1856 = vmatpush3.msra.mxu1 %v2602_v11 }
 0x149   :  { %1857 = vmatprep.subr.mxu1 %v2511_v0 }
 0x14a   :  { %1858 = vmatpush3.msra.mxu1 %v2608_v12 }
 0x14b   :  { %1859 = vmatprep.subr.mxu1 %v2511_v0 }
 0x14c   :  { %1860 = vmatpush3.msra.mxu1 %v2614_v13 }
 0x14d   :  { %1861 = vmatprep.subr.mxu1 %v2511_v0 }
 0x14e   :  { %1862 = vmatpush3.msra.mxu1 %v2620_v14 }
 0x14f   :  { %1863 = vmatprep.subr.mxu1 %v2511_v0 }
 0x150   :  { %1864 = vmatpush3.msra.mxu1 %v2626_v15 }
 0x151   :  { %1865 = vmatprep.subr.mxu1 %v2511_v0 }
 0x152   :  { %1866 = vmatpush3.msra.mxu1 %v2632_v16 }
 0x153   :  { %1905 = vmatprep.subr.mxu1 %v2511_v0 }
 0x1f3   :  { %v215_v30 = vpop.f32.mrf.mxu1 }
 0x1f4   :  { %v216_v31 = vadd.f32 %v215_v30, %v148_v29 }
 0x1f5   :  { %v1799_v32 = vpop.f32.mrf.mxu1 }
 0x1f6   :  { %v1443_v33 = vmul.f32 -1.442695, %v216_v31 }
 0x1f8   :  { %2305 = vpow2.f32 %v1443_v33 }
 0x1f9   :  { %2307 = vtanh.f32 %v216_v31 }
 0x205   :  { %v2306_v34 = vpop.eup %2305 }
 0x206   :  { %v222_v35 = vadd.f32 1.0, %v2306_v34  ;;  %v2308_v36 = vpop.eup %2307  ;;  %v488_v34 = vld [vmem:[#allocation4 + $0x28] sm:$0xff] }
 0x207   :  { %v226_v37 = vadd.f32 %v2308_v36, %v143_v26 }
 0x208   :  { %2309 = vrcp.f32 %v222_v35 }
 0x215   :  { %v2310_v38 = vpop.eup %2309 }
 0x216   :  { %v227_v39 = vmul.f32 %v2310_v38, %v226_v37 }
 0x218   :  { %2311 = vtanh.f32 %v227_v39 }
 0x225   :  { %v2312_v40 = vpop.eup %2311 }
 0x226   :  { %v229_v41 = vmul.f32 %v2312_v40, %v2310_v38 }
 0x228   :  { %231 = vst [vmem:[#allocation9 + $0x8] sm:$0xff] %v229_v41  ;;  %1833 = vmatmul.mubr.f32.vlgmr.msra.gmra.mxu0 %v229_v41 }
 0x229   :  { %1871 = vmatpush3.msra.mxu0 %v2547_v1  ;;  %1902 = vmatprep.mubr.msk.f32.mxu0 %vm2512_vm0, %v2511_v0 }
 0x22a   :  { %1872 = vmatprep.subr.mxu0 %v2511_v0 }
 0x22b   :  { %1873 = vmatpush3.msra.mxu0 %v2549_v2 }
 0x22c   :  { %1874 = vmatprep.subr.mxu0 %v2511_v0 }
 0x22d   :  { %1875 = vmatpush3.msra.mxu0 %v2554_v3 }
 0x22e   :  { %1876 = vmatprep.subr.mxu0 %v2511_v0 }
 0x22f   :  { %1877 = vmatpush3.msra.mxu0 %v2560_v4 }
 0x230   :  { %1878 = vmatprep.subr.mxu0 %v2511_v0 }
 0x231   :  { %1879 = vmatpush3.msra.mxu0 %v2566_v5 }
 0x232   :  { %1880 = vmatprep.subr.mxu0 %v2511_v0 }
 0x233   :  { %1881 = vmatpush3.msra.mxu0 %v2572_v6 }
 0x234   :  { %1882 = vmatprep.subr.mxu0 %v2511_v0 }
 0x235   :  { %1883 = vmatpush3.msra.mxu0 %v2578_v7 }
 0x236   :  { %1884 = vmatprep.subr.mxu0 %v2511_v0 }
 0x237   :  { %1885 = vmatpush3.msra.mxu0 %v2584_v8 }
 0x238   :  { %1886 = vmatprep.subr.mxu0 %v2511_v0 }
 0x239   :  { %1887 = vmatpush3.msra.mxu0 %v2590_v9 }
 0x23a   :  { %1888 = vmatprep.subr.mxu0 %v2511_v0 }
 0x23b   :  { %1889 = vmatpush3.msra.mxu0 %v2596_v10 }
 0x23c   :  { %1890 = vmatprep.subr.mxu0 %v2511_v0 }
 0x23d   :  { %1891 = vmatpush3.msra.mxu0 %v2602_v11 }
 0x23e   :  { %1892 = vmatprep.subr.mxu0 %v2511_v0 }
 0x23f   :  { %1893 = vmatpush3.msra.mxu0 %v2608_v12 }
 0x240   :  { %1894 = vmatprep.subr.mxu0 %v2511_v0 }
 0x241   :  { %1895 = vmatpush3.msra.mxu0 %v2614_v13 }
 0x242   :  { %1896 = vmatprep.subr.mxu0 %v2511_v0 }
 0x243   :  { %1897 = vmatpush3.msra.mxu0 %v2620_v14 }
 0x244   :  { %1898 = vmatprep.subr.mxu0 %v2511_v0 }
 0x245   :  { %1899 = vmatpush3.msra.mxu0 %v2626_v15 }
 0x246   :  { %1900 = vmatprep.subr.mxu0 %v2511_v0 }
 0x247   :  { %1901 = vmatpush3.msra.mxu0 %v2632_v16 }
 0x248   :  { %1940 = vmatprep.subr.mxu0 %v2511_v0 }
 0x2e8   :  { %v300_v43 = vpop.f32.mrf.mxu0 }
 0x2e9   :  { %v301_v44 = vadd.f32 %v300_v43, %v233_v42 }
 0x2ea   :  { %v1834_v45 = vpop.f32.mrf.mxu0 }
 0x2eb   :  { %v1444_v46 = vmul.f32 -1.442695, %v301_v44 }
 0x2ed   :  { %2313 = vpow2.f32 %v1444_v46 }
 0x2ee   :  { %2315 = vtanh.f32 %v301_v44 }
 0x2fa   :  { %v2314_v47 = vpop.eup %2313 }
 0x2fb   :  { %v307_v48 = vadd.f32 1.0, %v2314_v47  ;;  %v2316_v49 = vpop.eup %2315  ;;  %v573_v47 = vld [vmem:[#allocation4 + $0x30] sm:$0xff] }
 0x2fc   :  { %v311_v50 = vadd.f32 %v2316_v49, %v227_v39 }
 0x2fd   :  { %2317 = vrcp.f32 %v307_v48 }
 0x30a   :  { %v2318_v51 = vpop.eup %2317 }
 0x30b   :  { %v312_v52 = vmul.f32 %v2318_v51, %v311_v50 }
 0x30d   :  { %2319 = vtanh.f32 %v312_v52 }
 0x31a   :  { %v2320_v53 = vpop.eup %2319 }
 0x31b   :  { %v314_v54 = vmul.f32 %v2320_v53, %v2318_v51 }
 0x31d   :  { %316 = vst [vmem:[#allocation9 + $0x10] sm:$0xff] %v314_v54  ;;  %1868 = vmatmul.mubr.f32.vlgmr.msra.gmra.mxu1 %v314_v54 }
 0x31e   :  { %1906 = vmatpush3.msra.mxu1 %v2547_v1  ;;  %1937 = vmatprep.mubr.msk.f32.mxu1 %vm2512_vm0, %v2511_v0 }
 0x31f   :  { %1907 = vmatprep.subr.mxu1 %v2511_v0 }
 0x320   :  { %1908 = vmatpush3.msra.mxu1 %v2549_v2 }
 0x321   :  { %1909 = vmatprep.subr.mxu1 %v2511_v0 }
 0x322   :  { %1910 = vmatpush3.msra.mxu1 %v2554_v3 }
 0x323   :  { %1911 = vmatprep.subr.mxu1 %v2511_v0 }
 0x324   :  { %1912 = vmatpush3.msra.mxu1 %v2560_v4 }
 0x325   :  { %1913 = vmatprep.subr.mxu1 %v2511_v0 }
 0x326   :  { %1914 = vmatpush3.msra.mxu1 %v2566_v5 }
 0x327   :  { %1915 = vmatprep.subr.mxu1 %v2511_v0 }
 0x328   :  { %1916 = vmatpush3.msra.mxu1 %v2572_v6 }
 0x329   :  { %1917 = vmatprep.subr.mxu1 %v2511_v0 }
 0x32a   :  { %1918 = vmatpush3.msra.mxu1 %v2578_v7 }
 0x32b   :  { %1919 = vmatprep.subr.mxu1 %v2511_v0 }
 0x32c   :  { %1920 = vmatpush3.msra.mxu1 %v2584_v8 }
 0x32d   :  { %1921 = vmatprep.subr.mxu1 %v2511_v0 }
 0x32e   :  { %1922 = vmatpush3.msra.mxu1 %v2590_v9 }
 0x32f   :  { %1923 = vmatprep.subr.mxu1 %v2511_v0 }
 0x330   :  { %1924 = vmatpush3.msra.mxu1 %v2596_v10 }
 0x331   :  { %1925 = vmatprep.subr.mxu1 %v2511_v0 }
 0x332   :  { %1926 = vmatpush3.msra.mxu1 %v2602_v11 }
 0x333   :  { %1927 = vmatprep.subr.mxu1 %v2511_v0 }
 0x334   :  { %1928 = vmatpush3.msra.mxu1 %v2608_v12 }
 0x335   :  { %1929 = vmatprep.subr.mxu1 %v2511_v0 }
 0x336   :  { %1930 = vmatpush3.msra.mxu1 %v2614_v13 }
 0x337   :  { %1931 = vmatprep.subr.mxu1 %v2511_v0 }
 0x338   :  { %1932 = vmatpush3.msra.mxu1 %v2620_v14 }
 0x339   :  { %1933 = vmatprep.subr.mxu1 %v2511_v0 }
 0x33a   :  { %1934 = vmatpush3.msra.mxu1 %v2626_v15 }
 0x33b   :  { %1935 = vmatprep.subr.mxu1 %v2511_v0 }
 0x33c   :  { %1936 = vmatpush3.msra.mxu1 %v2632_v16 }
 0x33d   :  { %1975 = vmatprep.subr.mxu1 %v2511_v0 }
 0x3dd   :  { %v385_v56 = vpop.f32.mrf.mxu1 }
 0x3de   :  { %v386_v57 = vadd.f32 %v385_v56, %v318_v55 }
 0x3df   :  { %v1869_v58 = vpop.f32.mrf.mxu1 }
 0x3e0   :  { %v1445_v59 = vmul.f32 -1.442695, %v386_v57 }
 0x3e2   :  { %2321 = vpow2.f32 %v1445_v59 }
 0x3e3   :  { %2323 = vtanh.f32 %v386_v57 }
 0x3ef   :  { %v2322_v60 = vpop.eup %2321 }
 0x3f0   :  { %v392_v61 = vadd.f32 1.0, %v2322_v60  ;;  %v2324_v62 = vpop.eup %2323  ;;  %v658_v60 = vld [vmem:[#allocation4 + $0x38] sm:$0xff] }
 0x3f1   :  { %v396_v63 = vadd.f32 %v2324_v62, %v312_v52 }
 0x3f2   :  { %2325 = vrcp.f32 %v392_v61 }
 0x3ff   :  { %v2326_v17 = vpop.eup %2325 }
 0x400   :  { %v397_v18 = vmul.f32 %v2326_v17, %v396_v63 }
 0x402   :  { %2327 = vtanh.f32 %v397_v18 }
 0x40f   :  { %v2328_v19 = vpop.eup %2327 }
 0x410   :  { %v399_v20 = vmul.f32 %v2328_v19, %v2326_v17 }
 0x412   :  { %401 = vst [vmem:[#allocation9 + $0x18] sm:$0xff] %v399_v20  ;;  %1903 = vmatmul.mubr.f32.vlgmr.msra.gmra.mxu0 %v399_v20 }
 0x413   :  { %1941 = vmatpush3.msra.mxu0 %v2547_v1  ;;  %1972 = vmatprep.mubr.msk.f32.mxu0 %vm2512_vm0, %v2511_v0 }
 0x414   :  { %1942 = vmatprep.subr.mxu0 %v2511_v0 }
 0x415   :  { %1943 = vmatpush3.msra.mxu0 %v2549_v2 }
 0x416   :  { %1944 = vmatprep.subr.mxu0 %v2511_v0 }
 0x417   :  { %1945 = vmatpush3.msra.mxu0 %v2554_v3 }
 0x418   :  { %1946 = vmatprep.subr.mxu0 %v2511_v0 }
 0x419   :  { %1947 = vmatpush3.msra.mxu0 %v2560_v4 }
 0x41a   :  { %1948 = vmatprep.subr.mxu0 %v2511_v0 }
 0x41b   :  { %1949 = vmatpush3.msra.mxu0 %v2566_v5 }
 0x41c   :  { %1950 = vmatprep.subr.mxu0 %v2511_v0 }
 0x41d   :  { %1951 = vmatpush3.msra.mxu0 %v2572_v6 }
 0x41e   :  { %1952 = vmatprep.subr.mxu0 %v2511_v0 }
 0x41f   :  { %1953 = vmatpush3.msra.mxu0 %v2578_v7 }
 0x420   :  { %1954 = vmatprep.subr.mxu0 %v2511_v0 }
 0x421   :  { %1955 = vmatpush3.msra.mxu0 %v2584_v8 }
 0x422   :  { %1956 = vmatprep.subr.mxu0 %v2511_v0 }
 0x423   :  { %1957 = vmatpush3.msra.mxu0 %v2590_v9 }
 0x424   :  { %1958 = vmatprep.subr.mxu0 %v2511_v0 }
 0x425   :  { %1959 = vmatpush3.msra.mxu0 %v2596_v10 }
 0x426   :  { %1960 = vmatprep.subr.mxu0 %v2511_v0 }
 0x427   :  { %1961 = vmatpush3.msra.mxu0 %v2602_v11 }
 0x428   :  { %1962 = vmatprep.subr.mxu0 %v2511_v0 }
 0x429   :  { %1963 = vmatpush3.msra.mxu0 %v2608_v12 }
 0x42a   :  { %1964 = vmatprep.subr.mxu0 %v2511_v0 }
 0x42b   :  { %1965 = vmatpush3.msra.mxu0 %v2614_v13 }
 0x42c   :  { %1966 = vmatprep.subr.mxu0 %v2511_v0 }
 0x42d   :  { %1967 = vmatpush3.msra.mxu0 %v2620_v14 }
 0x42e   :  { %1968 = vmatprep.subr.mxu0 %v2511_v0 }
 0x42f   :  { %1969 = vmatpush3.msra.mxu0 %v2626_v15 }
 0x430   :  { %1970 = vmatprep.subr.mxu0 %v2511_v0 }
 0x431   :  { %1971 = vmatpush3.msra.mxu0 %v2632_v16 }
 0x432   :  { %2010 = vmatprep.subr.mxu0 %v2511_v0 }
 0x4d2   :  { %v470_v22 = vpop.f32.mrf.mxu0 }
 0x4d3   :  { %v471_v23 = vadd.f32 %v470_v22, %v403_v21 }
 0x4d4   :  { %v1904_v24 = vpop.f32.mrf.mxu0 }
 0x4d5   :  { %v1446_v25 = vmul.f32 -1.442695, %v471_v23 }
 0x4d7   :  { %2329 = vpow2.f32 %v1446_v25 }
 0x4d8   :  { %2331 = vtanh.f32 %v471_v23 }
 0x4e4   :  { %v2330_v26 = vpop.eup %2329 }
 0x4e5   :  { %v477_v27 = vadd.f32 1.0, %v2330_v26  ;;  %v2332_v28 = vpop.eup %2331  ;;  %v2963_v26 = vld [vmem:[#allocation7 + $0x68] sm:$0xff] }
 0x4e6   :  { %v481_v29 = vadd.f32 %v2332_v28, %v397_v18  ;;  %v2971_v28 = vld [vmem:[#allocation7 + $0x58] sm:$0xff] }
 0x4e7   :  { %2333 = vrcp.f32 %v477_v27  ;;  %v2967_v27 = vld [vmem:[#allocation7 + $0x60] sm:$0xff] }
 0x4f4   :  { %v2334_v30 = vpop.eup %2333 }
 0x4f5   :  { %v482_v31 = vmul.f32 %v2334_v30, %v481_v29  ;;  %v2975_v29 = vld [vmem:[#allocation7 + $0x50] sm:$0xff] }
 0x4f7   :  { %2335 = vtanh.f32 %v482_v31 }
 0x504   :  { %v2336_v32 = vpop.eup %2335 }
 0x505   :  { %v484_v33 = vmul.f32 %v2336_v32, %v2334_v30  ;;  %v2979_v30 = vld [vmem:[#allocation7 + $0x48] sm:$0xff]  ;;  %v2987_v32 = vld [vmem:[#allocation7 + $0x38] sm:$0xff] }
 0x507   :  { %486 = vst [vmem:[#allocation9 + $0x20] sm:$0xff] %v484_v33  ;;  %1938 = vmatmul.mubr.f32.vlgmr.msra.gmra.mxu1 %v484_v33  ;;  %v2991_v33 = vld [vmem:[#allocation7 + $0x30] sm:$0xff] }
 0x508   :  { %1976 = vmatpush3.msra.mxu1 %v2547_v1  ;;  %2007 = vmatprep.mubr.msk.f32.mxu1 %vm2512_vm0, %v2511_v0 }
 0x509   :  { %1977 = vmatprep.subr.mxu1 %v2511_v0 }
 0x50a   :  { %1978 = vmatpush3.msra.mxu1 %v2549_v2 }
 0x50b   :  { %1979 = vmatprep.subr.mxu1 %v2511_v0 }
 0x50c   :  { %1980 = vmatpush3.msra.mxu1 %v2554_v3 }
 0x50d   :  { %1981 = vmatprep.subr.mxu1 %v2511_v0 }
 0x50e   :  { %1982 = vmatpush3.msra.mxu1 %v2560_v4 }
 0x50f   :  { %1983 = vmatprep.subr.mxu1 %v2511_v0 }
 0x510   :  { %1984 = vmatpush3.msra.mxu1 %v2566_v5 }
 0x511   :  { %1985 = vmatprep.subr.mxu1 %v2511_v0 }
 0x512   :  { %1986 = vmatpush3.msra.mxu1 %v2572_v6 }
 0x513   :  { %1987 = vmatprep.subr.mxu1 %v2511_v0 }
 0x514   :  { %1988 = vmatpush3.msra.mxu1 %v2578_v7 }
 0x515   :  { %1989 = vmatprep.subr.mxu1 %v2511_v0 }
 0x516   :  { %1990 = vmatpush3.msra.mxu1 %v2584_v8 }
 0x517   :  { %1991 = vmatprep.subr.mxu1 %v2511_v0 }
 0x518   :  { %1992 = vmatpush3.msra.mxu1 %v2590_v9 }
 0x519   :  { %1993 = vmatprep.subr.mxu1 %v2511_v0 }
 0x51a   :  { %1994 = vmatpush3.msra.mxu1 %v2596_v10 }
 0x51b   :  { %1995 = vmatprep.subr.mxu1 %v2511_v0 }
 0x51c   :  { %1996 = vmatpush3.msra.mxu1 %v2602_v11 }
 0x51d   :  { %1997 = vmatprep.subr.mxu1 %v2511_v0 }
 0x51e   :  { %1998 = vmatpush3.msra.mxu1 %v2608_v12 }
 0x51f   :  { %1999 = vmatprep.subr.mxu1 %v2511_v0 }
 0x520   :  { %2000 = vmatpush3.msra.mxu1 %v2614_v13 }
 0x521   :  { %2001 = vmatprep.subr.mxu1 %v2511_v0 }
 0x522   :  { %2002 = vmatpush3.msra.mxu1 %v2620_v14 }
 0x523   :  { %2003 = vmatprep.subr.mxu1 %v2511_v0 }
 0x524   :  { %2004 = vmatpush3.msra.mxu1 %v2626_v15 }
 0x525   :  { %2005 = vmatprep.subr.mxu1 %v2511_v0 }
 0x526   :  { %2006 = vmatpush3.msra.mxu1 %v2632_v16 }
 0x527   :  { %2045 = vmatprep.subr.mxu1 %v2511_v0 }
 0x5c7   :  { %v555_v35 = vpop.f32.mrf.mxu1 }
 0x5c8   :  { %v556_v36 = vadd.f32 %v555_v35, %v488_v34  ;;  %v2995_v34 = vld [vmem:[#allocation7 + $0x28] sm:$0xff]  ;;  %v2999_v35 = vld [vmem:[#allocation7 + $0x20] sm:$0xff] }
 0x5c9   :  { %v1939_v37 = vpop.f32.mrf.mxu1 }
 0x5ca   :  { %v1447_v38 = vmul.f32 -1.442695, %v556_v36  ;;  %v3007_v37 = vld [vmem:[#allocation7 + $0x10] sm:$0xff] }
 0x5cc   :  { %2337 = vpow2.f32 %v1447_v38  ;;  %v3011_v38 = vld [vmem:[#allocation7 + $0x8] sm:$0xff] }
 0x5cd   :  { %2339 = vtanh.f32 %v556_v36  ;;  %v3003_v36 = vld [vmem:[#allocation7 + $0x18] sm:$0xff] }
 0x5d9   :  { %v2338_v39 = vpop.eup %2337 }
 0x5da   :  { %v562_v40 = vadd.f32 1.0, %v2338_v39  ;;  %v2340_v41 = vpop.eup %2339  ;;  %v828_v39 = vld [vmem:[#allocation4 + $0x48] sm:$0xff] }
 0x5db   :  { %v566_v42 = vadd.f32 %v2340_v41, %v482_v31  ;;  %v2983_v31 = vld [vmem:[#allocation7 + $0x40] sm:$0xff] }
 0x5dc   :  { %2341 = vrcp.f32 %v562_v40 }
 0x5e9   :  { %v2342_v43 = vpop.eup %2341 }
 0x5ea   :  { %v567_v44 = vmul.f32 %v2342_v43, %v566_v42 }
 0x5ec   :  { %2343 = vtanh.f32 %v567_v44 }
 0x5f9   :  { %v2344_v45 = vpop.eup %2343 }
 0x5fa   :  { %v569_v46 = vmul.f32 %v2344_v45, %v2342_v43 }
 0x5fc   :  { %571 = vst [vmem:[#allocation9 + $0x28] sm:$0xff] %v569_v46  ;;  %1973 = vmatmul.mubr.f32.vlgmr.msra.gmra.mxu0 %v569_v46 }
 0x5fd   :  { %2011 = vmatpush3.msra.mxu0 %v2547_v1  ;;  %2042 = vmatprep.mubr.msk.f32.mxu0 %vm2512_vm0, %v2511_v0 }
 0x5fe   :  { %2012 = vmatprep.subr.mxu0 %v2511_v0 }
 0x5ff   :  { %2013 = vmatpush3.msra.mxu0 %v2549_v2 }
 0x600   :  { %2014 = vmatprep.subr.mxu0 %v2511_v0 }
 0x601   :  { %2015 = vmatpush3.msra.mxu0 %v2554_v3 }
 0x602   :  { %2016 = vmatprep.subr.mxu0 %v2511_v0 }
 0x603   :  { %2017 = vmatpush3.msra.mxu0 %v2560_v4 }
 0x604   :  { %2018 = vmatprep.subr.mxu0 %v2511_v0 }
 0x605   :  { %2019 = vmatpush3.msra.mxu0 %v2566_v5 }
 0x606   :  { %2020 = vmatprep.subr.mxu0 %v2511_v0 }
 0x607   :  { %2021 = vmatpush3.msra.mxu0 %v2572_v6 }
 0x608   :  { %2022 = vmatprep.subr.mxu0 %v2511_v0 }
 0x609   :  { %2023 = vmatpush3.msra.mxu0 %v2578_v7 }
 0x60a   :  { %2024 = vmatprep.subr.mxu0 %v2511_v0 }
 0x60b   :  { %2025 = vmatpush3.msra.mxu0 %v2584_v8 }
 0x60c   :  { %2026 = vmatprep.subr.mxu0 %v2511_v0 }
 0x60d   :  { %2027 = vmatpush3.msra.mxu0 %v2590_v9 }
 0x60e   :  { %2028 = vmatprep.subr.mxu0 %v2511_v0 }
 0x60f   :  { %2029 = vmatpush3.msra.mxu0 %v2596_v10 }
 0x610   :  { %2030 = vmatprep.subr.mxu0 %v2511_v0 }
 0x611   :  { %2031 = vmatpush3.msra.mxu0 %v2602_v11 }
 0x612   :  { %2032 = vmatprep.subr.mxu0 %v2511_v0 }
 0x613   :  { %2033 = vmatpush3.msra.mxu0 %v2608_v12 }
 0x614   :  { %2034 = vmatprep.subr.mxu0 %v2511_v0 }
 0x615   :  { %2035 = vmatpush3.msra.mxu0 %v2614_v13 }
 0x616   :  { %2036 = vmatprep.subr.mxu0 %v2511_v0 }
 0x617   :  { %2037 = vmatpush3.msra.mxu0 %v2620_v14 }
 0x618   :  { %2038 = vmatprep.subr.mxu0 %v2511_v0 }
 0x619   :  { %2039 = vmatpush3.msra.mxu0 %v2626_v15 }
 0x61a   :  { %2040 = vmatprep.subr.mxu0 %v2511_v0 }
 0x61b   :  { %2041 = vmatpush3.msra.mxu0 %v2632_v16 }
 0x61c   :  { %2080 = vmatprep.subr.mxu0 %v2511_v0 }
 0x6bc   :  { %v640_v48 = vpop.f32.mrf.mxu0 }
 0x6bd   :  { %v641_v49 = vadd.f32 %v640_v48, %v573_v47 }
 0x6be   :  { %v1974_v50 = vpop.f32.mrf.mxu0 }
 0x6bf   :  { %v1448_v51 = vmul.f32 -1.442695, %v641_v49 }
 0x6c1   :  { %2345 = vpow2.f32 %v1448_v51  ;;  %v3050_v51 = vld [vmem:[#allocation7] sm:$0xff] }
 0x6c2   :  { %2347 = vtanh.f32 %v641_v49 }
 0x6ce   :  { %v2346_v52 = vpop.eup %2345 }
 0x6cf   :  { %v647_v53 = vadd.f32 1.0, %v2346_v52  ;;  %v2348_v54 = vpop.eup %2347  ;;  %v913_v52 = vld [vmem:[#allocation4 + $0x50] sm:$0xff] }
 0x6d0   :  { %v651_v55 = vadd.f32 %v2348_v54, %v567_v44 }
 0x6d1   :  { %2349 = vrcp.f32 %v647_v53 }
 0x6de   :  { %v2350_v56 = vpop.eup %2349 }
 0x6df   :  { %v652_v57 = vmul.f32 %v2350_v56, %v651_v55 }
 0x6e1   :  { %2351 = vtanh.f32 %v652_v57 }
 0x6ee   :  { %v2352_v58 = vpop.eup %2351 }
 0x6ef   :  { %v654_v59 = vmul.f32 %v2352_v58, %v2350_v56 }
 0x6f1   :  { %656 = vst [vmem:[#allocation9 + $0x30] sm:$0xff] %v654_v59  ;;  %2008 = vmatmul.mubr.f32.vlgmr.msra.gmra.mxu1 %v654_v59 }
 0x6f2   :  { %2046 = vmatpush3.msra.mxu1 %v2547_v1  ;;  %2077 = vmatprep.mubr.msk.f32.mxu1 %vm2512_vm0, %v2511_v0 }
 0x6f3   :  { %2047 = vmatprep.subr.mxu1 %v2511_v0 }
 0x6f4   :  { %2048 = vmatpush3.msra.mxu1 %v2549_v2 }
 0x6f5   :  { %2049 = vmatprep.subr.mxu1 %v2511_v0 }
 0x6f6   :  { %2050 = vmatpush3.msra.mxu1 %v2554_v3 }
 0x6f7   :  { %2051 = vmatprep.subr.mxu1 %v2511_v0 }
 0x6f8   :  { %2052 = vmatpush3.msra.mxu1 %v2560_v4 }
 0x6f9   :  { %2053 = vmatprep.subr.mxu1 %v2511_v0 }
 0x6fa   :  { %2054 = vmatpush3.msra.mxu1 %v2566_v5 }
 0x6fb   :  { %2055 = vmatprep.subr.mxu1 %v2511_v0 }
 0x6fc   :  { %2056 = vmatpush3.msra.mxu1 %v2572_v6 }
 0x6fd   :  { %2057 = vmatprep.subr.mxu1 %v2511_v0 }
 0x6fe   :  { %2058 = vmatpush3.msra.mxu1 %v2578_v7 }
 0x6ff   :  { %2059 = vmatprep.subr.mxu1 %v2511_v0 }
 0x700   :  { %2060 = vmatpush3.msra.mxu1 %v2584_v8 }
 0x701   :  { %2061 = vmatprep.subr.mxu1 %v2511_v0 }
 0x702   :  { %2062 = vmatpush3.msra.mxu1 %v2590_v9 }
 0x703   :  { %2063 = vmatprep.subr.mxu1 %v2511_v0 }
 0x704   :  { %2064 = vmatpush3.msra.mxu1 %v2596_v10 }
 0x705   :  { %2065 = vmatprep.subr.mxu1 %v2511_v0 }
 0x706   :  { %2066 = vmatpush3.msra.mxu1 %v2602_v11 }
 0x707   :  { %2067 = vmatprep.subr.mxu1 %v2511_v0 }
 0x708   :  { %2068 = vmatpush3.msra.mxu1 %v2608_v12 }
 0x709   :  { %2069 = vmatprep.subr.mxu1 %v2511_v0 }
 0x70a   :  { %2070 = vmatpush3.msra.mxu1 %v2614_v13 }
 0x70b   :  { %2071 = vmatprep.subr.mxu1 %v2511_v0 }
 0x70c   :  { %2072 = vmatpush3.msra.mxu1 %v2620_v14 }
 0x70d   :  { %2073 = vmatprep.subr.mxu1 %v2511_v0 }
 0x70e   :  { %2074 = vmatpush3.msra.mxu1 %v2626_v15 }
 0x70f   :  { %2075 = vmatprep.subr.mxu1 %v2511_v0 }
 0x710   :  { %2076 = vmatpush3.msra.mxu1 %v2632_v16 }
 0x711   :  { %2115 = vmatprep.subr.mxu1 %v2511_v0 }
 0x7b1   :  { %v725_v61 = vpop.f32.mrf.mxu1 }
 0x7b2   :  { %v726_v62 = vadd.f32 %v725_v61, %v658_v60 }
 0x7b3   :  { %v2009_v63 = vpop.f32.mrf.mxu1 }
 0x7b4   :  { %v1449_v17 = vmul.f32 -1.442695, %v726_v62 }
 0x7b6   :  { %2353 = vpow2.f32 %v1449_v17 }
 0x7b7   :  { %2355 = vtanh.f32 %v726_v62 }
 0x7c3   :  { %v2354_v18 = vpop.eup %2353 }
 0x7c4   :  { %v732_v19 = vadd.f32 1.0, %v2354_v18  ;;  %v2356_v20 = vpop.eup %2355  ;;  %v998_v18 = vld [vmem:[#allocation4 + $0x58] sm:$0xff] }
 0x7c5   :  { %v736_v21 = vadd.f32 %v2356_v20, %v652_v57 }
 0x7c6   :  { %2357 = vrcp.f32 %v732_v19 }
 0x7d3   :  { %v2358_v22 = vpop.eup %2357 }
 0x7d4   :  { %v737_v23 = vmul.f32 %v2358_v22, %v736_v21 }
 0x7d6   :  { %2359 = vtanh.f32 %v737_v23 }
 0x7e3   :  { %v2360_v24 = vpop.eup %2359 }
 0x7e4   :  { %v739_v25 = vmul.f32 %v2360_v24, %v2358_v22 }
 0x7e6   :  { %741 = vst [vmem:[#allocation9 + $0x38] sm:$0xff] %v739_v25  ;;  %2043 = vmatmul.mubr.f32.vlgmr.msra.gmra.mxu0 %v739_v25 }
 0x7e7   :  { %2081 = vmatpush3.msra.mxu0 %v2547_v1  ;;  %2112 = vmatprep.mubr.msk.f32.mxu0 %vm2512_vm0, %v2511_v0  ;;  %v743_v1 = vld [vmem:[#allocation4 + $0x40] sm:$0xff] }
 0x7e8   :  { %2082 = vmatprep.subr.mxu0 %v2511_v0 }
 0x7e9   :  { %2083 = vmatpush3.msra.mxu0 %v2549_v2 }
 0x7ea   :  { %2084 = vmatprep.subr.mxu0 %v2511_v0 }
 0x7eb   :  { %2085 = vmatpush3.msra.mxu0 %v2554_v3 }
 0x7ec   :  { %2086 = vmatprep.subr.mxu0 %v2511_v0 }
 0x7ed   :  { %2087 = vmatpush3.msra.mxu0 %v2560_v4 }
 0x7ee   :  { %2088 = vmatprep.subr.mxu0 %v2511_v0 }
 0x7ef   :  { %2089 = vmatpush3.msra.mxu0 %v2566_v5 }
 0x7f0   :  { %2090 = vmatprep.subr.mxu0 %v2511_v0 }
 0x7f1   :  { %2091 = vmatpush3.msra.mxu0 %v2572_v6 }
 0x7f2   :  { %2092 = vmatprep.subr.mxu0 %v2511_v0 }
 0x7f3   :  { %2093 = vmatpush3.msra.mxu0 %v2578_v7 }
 0x7f4   :  { %2094 = vmatprep.subr.mxu0 %v2511_v0 }
 0x7f5   :  { %2095 = vmatpush3.msra.mxu0 %v2584_v8 }
 0x7f6   :  { %2096 = vmatprep.subr.mxu0 %v2511_v0 }
 0x7f7   :  { %2097 = vmatpush3.msra.mxu0 %v2590_v9 }
 0x7f8   :  { %2098 = vmatprep.subr.mxu0 %v2511_v0 }
 0x7f9   :  { %2099 = vmatpush3.msra.mxu0 %v2596_v10 }
 0x7fa   :  { %2100 = vmatprep.subr.mxu0 %v2511_v0 }
 0x7fb   :  { %2101 = vmatpush3.msra.mxu0 %v2602_v11 }
 0x7fc   :  { %2102 = vmatprep.subr.mxu0 %v2511_v0 }
 0x7fd   :  { %2103 = vmatpush3.msra.mxu0 %v2608_v12 }
 0x7fe   :  { %2104 = vmatprep.subr.mxu0 %v2511_v0 }
 0x7ff   :  { %2105 = vmatpush3.msra.mxu0 %v2614_v13 }
 0x800   :  { %2106 = vmatprep.subr.mxu0 %v2511_v0 }
 0x801   :  { %2107 = vmatpush3.msra.mxu0 %v2620_v14  ;;  %v2953_v14 = vld [vmem:[#allocation7 + $0x78] sm:$0xff] }
 0x802   :  { %2108 = vmatprep.subr.mxu0 %v2511_v0 }
 0x803   :  { %2109 = vmatpush3.msra.mxu0 %v2626_v15  ;;  %v2959_v15 = vld [vmem:[#allocation7 + $0x70] sm:$0xff] }
 0x804   :  { %2110 = vmatprep.subr.mxu0 %v2511_v0 }
 0x805   :  { %2111 = vmatpush3.msra.mxu0 %v2632_v16 }
 0x806   :  { %2150 = vmatprep.subr.mxu0 %v2511_v0 }
 0x8a6   :  { %v810_v2 = vpop.f32.mrf.mxu0 }
 0x8a7   :  { %v811_v3 = vadd.f32 %v810_v2, %v743_v1 }
 0x8a8   :  { %v2044_v4 = vpop.f32.mrf.mxu0 }
 0x8a9   :  { %v1450_v5 = vmul.f32 -1.442695, %v811_v3 }
 0x8ab   :  { %2361 = vpow2.f32 %v1450_v5 }
 0x8ac   :  { %2363 = vtanh.f32 %v811_v3 }
 0x8b8   :  { %v2362_v6 = vpop.eup %2361 }
 0x8b9   :  { %v817_v7 = vadd.f32 1.0, %v2362_v6  ;;  %v2364_v8 = vpop.eup %2363  ;;  %v1083_v6 = vld [vmem:[#allocation4 + $0x60] sm:$0xff] }
 0x8ba   :  { %v821_v9 = vadd.f32 %v2364_v8, %v737_v23 }
 0x8bb   :  { %2365 = vrcp.f32 %v817_v7 }
 0x8c8   :  { %v2366_v10 = vpop.eup %2365 }
 0x8c9   :  { %v2950_v11 = vmul.f32 %v2366_v10, %v821_v9 }
 0x8cb   :  { %2367 = vtanh.f32 %v2950_v11 }
 0x8d8   :  { %v2368_v12 = vpop.eup %2367 }
 0x8d9   :  { %v824_v13 = vmul.f32 %v2368_v12, %v2366_v10 }
 0x8db   :  { %826 = vst [vmem:[#allocation9 + $0x40] sm:$0xff] %v824_v13  ;;  %2078 = vmatmul.mubr.f32.vlgmr.msra.gmra.mxu1 %v824_v13 }
 0x8dc   :  { %2116 = vmatpush3.msra.mxu1 %v2953_v14  ;;  %2147 = vmatprep.mubr.msk.f32.mxu1 %vm2512_vm0, %v2511_v0 }
 0x8dd   :  { %2117 = vmatprep.subr.mxu1 %v2511_v0 }
 0x8de   :  { %2118 = vmatpush3.msra.mxu1 %v2959_v15 }
 0x8df   :  { %2119 = vmatprep.subr.mxu1 %v2511_v0 }
 0x8e0   :  { %2120 = vmatpush3.msra.mxu1 %v2963_v26 }
 0x8e1   :  { %2121 = vmatprep.subr.mxu1 %v2511_v0 }
 0x8e2   :  { %2122 = vmatpush3.msra.mxu1 %v2967_v27 }
 0x8e3   :  { %2123 = vmatprep.subr.mxu1 %v2511_v0 }
 0x8e4   :  { %2124 = vmatpush3.msra.mxu1 %v2971_v28 }
 0x8e5   :  { %2125 = vmatprep.subr.mxu1 %v2511_v0 }
 0x8e6   :  { %2126 = vmatpush3.msra.mxu1 %v2975_v29 }
 0x8e7   :  { %2127 = vmatprep.subr.mxu1 %v2511_v0 }
 0x8e8   :  { %2128 = vmatpush3.msra.mxu1 %v2979_v30 }
 0x8e9   :  { %2129 = vmatprep.subr.mxu1 %v2511_v0 }
 0x8ea   :  { %2130 = vmatpush3.msra.mxu1 %v2983_v31 }
 0x8eb   :  { %2131 = vmatprep.subr.mxu1 %v2511_v0 }
 0x8ec   :  { %2132 = vmatpush3.msra.mxu1 %v2987_v32 }
 0x8ed   :  { %2133 = vmatprep.subr.mxu1 %v2511_v0 }
 0x8ee   :  { %2134 = vmatpush3.msra.mxu1 %v2991_v33 }
 0x8ef   :  { %2135 = vmatprep.subr.mxu1 %v2511_v0 }
 0x8f0   :  { %2136 = vmatpush3.msra.mxu1 %v2995_v34 }
 0x8f1   :  { %2137 = vmatprep.subr.mxu1 %v2511_v0 }
 0x8f2   :  { %2138 = vmatpush3.msra.mxu1 %v2999_v35 }
 0x8f3   :  { %2139 = vmatprep.subr.mxu1 %v2511_v0 }
 0x8f4   :  { %2140 = vmatpush3.msra.mxu1 %v3003_v36 }
 0x8f5   :  { %2141 = vmatprep.subr.mxu1 %v2511_v0 }
 0x8f6   :  { %2142 = vmatpush3.msra.mxu1 %v3007_v37 }
 0x8f7   :  { %2143 = vmatprep.subr.mxu1 %v2511_v0 }
 0x8f8   :  { %2144 = vmatpush3.msra.mxu1 %v3011_v38 }
 0x8f9   :  { %2145 = vmatprep.subr.mxu1 %v2511_v0 }
 0x8fa   :  { %2146 = vmatpush3.msra.mxu1 %v2632_v16 }
 0x8fb   :  { %2185 = vmatprep.subr.mxu1 %v2511_v0 }
 0x99b   :  { %v895_v40 = vpop.f32.mrf.mxu1 }
 0x99c   :  { %v896_v41 = vadd.f32 %v895_v40, %v828_v39 }
 0x99d   :  { %v2079_v42 = vpop.f32.mrf.mxu1 }
 0x99e   :  { %v1451_v43 = vmul.f32 -1.442695, %v896_v41 }
 0x9a0   :  { %2369 = vpow2.f32 %v1451_v43 }
 0x9a1   :  { %2371 = vtanh.f32 %v896_v41 }
 0x9ad   :  { %v2370_v44 = vpop.eup %2369 }
 0x9ae   :  { %v902_v45 = vadd.f32 1.0, %v2370_v44  ;;  %v2372_v46 = vpop.eup %2371 }
 0x9af   :  { %v906_v47 = vadd.f32 %v2372_v46, %v2950_v11 }
 0x9b0   :  { %2373 = vrcp.f32 %v902_v45 }
 0x9bd   :  { %v2374_v48 = vpop.eup %2373 }
 0x9be   :  { %v907_v49 = vmul.f32 %v2374_v48, %v906_v47 }
 0x9c0   :  { %2375 = vtanh.f32 %v907_v49 }
 0x9cd   :  { %v2376_v50 = vpop.eup %2375 }
 0x9ce   :  { %v909_v16 = vmul.f32 %v2376_v50, %v2374_v48 }
 0x9d0   :  { %911 = vst [vmem:[#allocation9 + $0x48] sm:$0xff] %v909_v16  ;;  %2113 = vmatmul.mubr.f32.vlgmr.msra.gmra.mxu0 %v909_v16 }
 0x9d1   :  { %2151 = vmatpush3.msra.mxu0 %v2953_v14  ;;  %2182 = vmatprep.mubr.msk.f32.mxu0 %vm2512_vm0, %v2511_v0 }
 0x9d2   :  { %2152 = vmatprep.subr.mxu0 %v2511_v0 }
 0x9d3   :  { %2153 = vmatpush3.msra.mxu0 %v2959_v15 }
 0x9d4   :  { %2154 = vmatprep.subr.mxu0 %v2511_v0 }
 0x9d5   :  { %2155 = vmatpush3.msra.mxu0 %v2963_v26 }
 0x9d6   :  { %2156 = vmatprep.subr.mxu0 %v2511_v0 }
 0x9d7   :  { %2157 = vmatpush3.msra.mxu0 %v2967_v27 }
 0x9d8   :  { %2158 = vmatprep.subr.mxu0 %v2511_v0 }
 0x9d9   :  { %2159 = vmatpush3.msra.mxu0 %v2971_v28 }
 0x9da   :  { %2160 = vmatprep.subr.mxu0 %v2511_v0 }
 0x9db   :  { %2161 = vmatpush3.msra.mxu0 %v2975_v29 }
 0x9dc   :  { %2162 = vmatprep.subr.mxu0 %v2511_v0 }
 0x9dd   :  { %2163 = vmatpush3.msra.mxu0 %v2979_v30 }
 0x9de   :  { %2164 = vmatprep.subr.mxu0 %v2511_v0 }
 0x9df   :  { %2165 = vmatpush3.msra.mxu0 %v2983_v31 }
 0x9e0   :  { %2166 = vmatprep.subr.mxu0 %v2511_v0 }
 0x9e1   :  { %2167 = vmatpush3.msra.mxu0 %v2987_v32 }
 0x9e2   :  { %2168 = vmatprep.subr.mxu0 %v2511_v0 }
 0x9e3   :  { %2169 = vmatpush3.msra.mxu0 %v2991_v33 }
 0x9e4   :  { %2170 = vmatprep.subr.mxu0 %v2511_v0 }
 0x9e5   :  { %2171 = vmatpush3.msra.mxu0 %v2995_v34 }
 0x9e6   :  { %2172 = vmatprep.subr.mxu0 %v2511_v0 }
 0x9e7   :  { %2173 = vmatpush3.msra.mxu0 %v2999_v35 }
 0x9e8   :  { %2174 = vmatprep.subr.mxu0 %v2511_v0 }
 0x9e9   :  { %2175 = vmatpush3.msra.mxu0 %v3003_v36 }
 0x9ea   :  { %2176 = vmatprep.subr.mxu0 %v2511_v0 }
 0x9eb   :  { %2177 = vmatpush3.msra.mxu0 %v3007_v37 }
 0x9ec   :  { %2178 = vmatprep.subr.mxu0 %v2511_v0 }
 0x9ed   :  { %2179 = vmatpush3.msra.mxu0 %v3011_v38 }
 0x9ee   :  { %2180 = vmatprep.subr.mxu0 %v2511_v0 }
 0x9ef   :  { %2181 = vmatpush3.msra.mxu0 %v3050_v51 }
 0x9f0   :  { %2220 = vmatprep.subr.mxu0 %v2511_v0 }
 0xa90   :  { %v980_v53 = vpop.f32.mrf.mxu0 }
 0xa91   :  { %v981_v54 = vadd.f32 %v980_v53, %v913_v52  ;;  %v1338_v53 = vld [vmem:[#allocation4 + $0x78] sm:$0xff] }
 0xa92   :  { %v2114_v55 = vpop.f32.mrf.mxu0 }
 0xa93   :  { %v1452_v56 = vmul.f32 -1.442695, %v981_v54 }
 0xa95   :  { %2377 = vpow2.f32 %v1452_v56 }
 0xa96   :  { %2379 = vtanh.f32 %v981_v54 }
 0xaa2   :  { %v2378_v57 = vpop.eup %2377 }
 0xaa3   :  { %v987_v58 = vadd.f32 1.0, %v2378_v57  ;;  %v2380_v59 = vpop.eup %2379 }
 0xaa4   :  { %v991_v60 = vadd.f32 %v2380_v59, %v907_v49 }
 0xaa5   :  { %2381 = vrcp.f32 %v987_v58 }
 0xab2   :  { %v2382_v61 = vpop.eup %2381 }
 0xab3   :  { %v992_v62 = vmul.f32 %v2382_v61, %v991_v60 }
 0xab5   :  { %2383 = vtanh.f32 %v992_v62 }
 0xac2   :  { %v2384_v63 = vpop.eup %2383 }
 0xac3   :  { %v994_v17 = vmul.f32 %v2384_v63, %v2382_v61 }
 0xac5   :  { %996 = vst [vmem:[#allocation9 + $0x50] sm:$0xff] %v994_v17  ;;  %2148 = vmatmul.mubr.f32.vlgmr.msra.gmra.mxu1 %v994_v17 }
 0xac6   :  { %2186 = vmatpush3.msra.mxu1 %v2953_v14  ;;  %2217 = vmatprep.mubr.msk.f32.mxu1 %vm2512_vm0, %v2511_v0 }
 0xac7   :  { %2187 = vmatprep.subr.mxu1 %v2511_v0 }
 0xac8   :  { %2188 = vmatpush3.msra.mxu1 %v2959_v15 }
 0xac9   :  { %2189 = vmatprep.subr.mxu1 %v2511_v0 }
 0xaca   :  { %2190 = vmatpush3.msra.mxu1 %v2963_v26 }
 0xacb   :  { %2191 = vmatprep.subr.mxu1 %v2511_v0 }
 0xacc   :  { %2192 = vmatpush3.msra.mxu1 %v2967_v27 }
 0xacd   :  { %2193 = vmatprep.subr.mxu1 %v2511_v0 }
 0xace   :  { %2194 = vmatpush3.msra.mxu1 %v2971_v28 }
 0xacf   :  { %2195 = vmatprep.subr.mxu1 %v2511_v0 }
 0xad0   :  { %2196 = vmatpush3.msra.mxu1 %v2975_v29 }
 0xad1   :  { %2197 = vmatprep.subr.mxu1 %v2511_v0 }
 0xad2   :  { %2198 = vmatpush3.msra.mxu1 %v2979_v30 }
 0xad3   :  { %2199 = vmatprep.subr.mxu1 %v2511_v0 }
 0xad4   :  { %2200 = vmatpush3.msra.mxu1 %v2983_v31 }
 0xad5   :  { %2201 = vmatprep.subr.mxu1 %v2511_v0 }
 0xad6   :  { %2202 = vmatpush3.msra.mxu1 %v2987_v32 }
 0xad7   :  { %2203 = vmatprep.subr.mxu1 %v2511_v0 }
 0xad8   :  { %2204 = vmatpush3.msra.mxu1 %v2991_v33 }
 0xad9   :  { %2205 = vmatprep.subr.mxu1 %v2511_v0 }
 0xada   :  { %2206 = vmatpush3.msra.mxu1 %v2995_v34 }
 0xadb   :  { %2207 = vmatprep.subr.mxu1 %v2511_v0 }
 0xadc   :  { %2208 = vmatpush3.msra.mxu1 %v2999_v35 }
 0xadd   :  { %2209 = vmatprep.subr.mxu1 %v2511_v0 }
 0xade   :  { %2210 = vmatpush3.msra.mxu1 %v3003_v36 }
 0xadf   :  { %2211 = vmatprep.subr.mxu1 %v2511_v0 }
 0xae0   :  { %2212 = vmatpush3.msra.mxu1 %v3007_v37 }
 0xae1   :  { %2213 = vmatprep.subr.mxu1 %v2511_v0 }
 0xae2   :  { %2214 = vmatpush3.msra.mxu1 %v3011_v38 }
 0xae3   :  { %2215 = vmatprep.subr.mxu1 %v2511_v0 }
 0xae4   :  { %2216 = vmatpush3.msra.mxu1 %v3050_v51 }
 0xae5   :  { %2255 = vmatprep.subr.mxu1 %v2511_v0 }
 0xb85   :  { %v1065_v19 = vpop.f32.mrf.mxu1 }
 0xb86   :  { %v1066_v20 = vadd.f32 %v1065_v19, %v998_v18 }
 0xb87   :  { %v2149_v21 = vpop.f32.mrf.mxu1 }
 0xb88   :  { %v1453_v22 = vmul.f32 -1.442695, %v1066_v20 }
 0xb8a   :  { %2385 = vpow2.f32 %v1453_v22 }
 0xb8b   :  { %2387 = vtanh.f32 %v1066_v20 }
 0xb97   :  { %v2386_v23 = vpop.eup %2385 }
 0xb98   :  { %v1072_v24 = vadd.f32 1.0, %v2386_v23  ;;  %v2388_v25 = vpop.eup %2387 }
 0xb99   :  { %v1076_v1 = vadd.f32 %v2388_v25, %v992_v62 }
 0xb9a   :  { %2389 = vrcp.f32 %v1072_v24 }
 0xba7   :  { %v2390_v2 = vpop.eup %2389 }
 0xba8   :  { %v1077_v3 = vmul.f32 %v2390_v2, %v1076_v1 }
 0xbaa   :  { %2391 = vtanh.f32 %v1077_v3 }
 0xbb7   :  { %v2392_v4 = vpop.eup %2391 }
 0xbb8   :  { %v1079_v5 = vmul.f32 %v2392_v4, %v2390_v2 }
 0xbba   :  { %1081 = vst [vmem:[#allocation9 + $0x58] sm:$0xff] %v1079_v5  ;;  %2183 = vmatmul.mubr.f32.vlgmr.msra.gmra.mxu0 %v1079_v5 }
 0xbbb   :  { %2221 = vmatpush3.msra.mxu0 %v2953_v14  ;;  %2252 = vmatprep.mubr.msk.f32.mxu0 %vm2512_vm0, %v2511_v0 }
 0xbbc   :  { %2222 = vmatprep.subr.mxu0 %v2511_v0 }
 0xbbd   :  { %2223 = vmatpush3.msra.mxu0 %v2959_v15 }
 0xbbe   :  { %2224 = vmatprep.subr.mxu0 %v2511_v0 }
 0xbbf   :  { %2225 = vmatpush3.msra.mxu0 %v2963_v26 }
 0xbc0   :  { %2226 = vmatprep.subr.mxu0 %v2511_v0 }
 0xbc1   :  { %2227 = vmatpush3.msra.mxu0 %v2967_v27 }
 0xbc2   :  { %2228 = vmatprep.subr.mxu0 %v2511_v0 }
 0xbc3   :  { %2229 = vmatpush3.msra.mxu0 %v2971_v28 }
 0xbc4   :  { %2230 = vmatprep.subr.mxu0 %v2511_v0 }
 0xbc5   :  { %2231 = vmatpush3.msra.mxu0 %v2975_v29 }
 0xbc6   :  { %2232 = vmatprep.subr.mxu0 %v2511_v0 }
 0xbc7   :  { %2233 = vmatpush3.msra.mxu0 %v2979_v30 }
 0xbc8   :  { %2234 = vmatprep.subr.mxu0 %v2511_v0 }
 0xbc9   :  { %2235 = vmatpush3.msra.mxu0 %v2983_v31 }
 0xbca   :  { %2236 = vmatprep.subr.mxu0 %v2511_v0 }
 0xbcb   :  { %2237 = vmatpush3.msra.mxu0 %v2987_v32 }
 0xbcc   :  { %2238 = vmatprep.subr.mxu0 %v2511_v0 }
 0xbcd   :  { %2239 = vmatpush3.msra.mxu0 %v2991_v33 }
 0xbce   :  { %2240 = vmatprep.subr.mxu0 %v2511_v0 }
 0xbcf   :  { %2241 = vmatpush3.msra.mxu0 %v2995_v34 }
 0xbd0   :  { %2242 = vmatprep.subr.mxu0 %v2511_v0 }
 0xbd1   :  { %2243 = vmatpush3.msra.mxu0 %v2999_v35 }
 0xbd2   :  { %2244 = vmatprep.subr.mxu0 %v2511_v0 }
 0xbd3   :  { %2245 = vmatpush3.msra.mxu0 %v3003_v36 }
 0xbd4   :  { %2246 = vmatprep.subr.mxu0 %v2511_v0 }
 0xbd5   :  { %2247 = vmatpush3.msra.mxu0 %v3007_v37 }
 0xbd6   :  { %2248 = vmatprep.subr.mxu0 %v2511_v0 }
 0xbd7   :  { %2249 = vmatpush3.msra.mxu0 %v3011_v38 }
 0xbd8   :  { %2250 = vmatprep.subr.mxu0 %v2511_v0 }
 0xbd9   :  { %2251 = vmatpush3.msra.mxu0 %v3050_v51 }
 0xc7a   :  { %v1150_v7 = vpop.f32.mrf.mxu0 }
 0xc7b   :  { %v1151_v8 = vadd.f32 %v1150_v7, %v1083_v6 }
 0xc7c   :  { %v2184_v9 = vpop.f32.mrf.mxu0 }
 0xc7d   :  { %v1454_v10 = vmul.f32 -1.442695, %v1151_v8 }
 0xc7f   :  { %2393 = vpow2.f32 %v1454_v10 }
 0xc80   :  { %2395 = vtanh.f32 %v1151_v8 }
 0xc8c   :  { %v2394_v11 = vpop.eup %2393 }
 0xc8d   :  { %v1157_v12 = vadd.f32 1.0, %v2394_v11  ;;  %v2396_v13 = vpop.eup %2395 }
 0xc8e   :  { %v1161_v39 = vadd.f32 %v2396_v13, %v1077_v3 }
 0xc8f   :  { %2397 = vrcp.f32 %v1157_v12 }
 0xc9c   :  { %v2398_v40 = vpop.eup %2397 }
 0xc9d   :  { %v1162_v41 = vmul.f32 %v2398_v40, %v1161_v39 }
 0xc9f   :  { %2399 = vtanh.f32 %v1162_v41 }
 0xcac   :  { %v2400_v42 = vpop.eup %2399 }
 0xcad   :  { %v1164_v43 = vmul.f32 %v2400_v42, %v2398_v40 }
 0xcaf   :  { %1166 = vst [vmem:[#allocation9 + $0x60] sm:$0xff] %v1164_v43  ;;  %2218 = vmatmul.mubr.f32.vlgmr.msra.gmra.mxu1 %v1164_v43 }
 0xcb0   :  { %2256 = vmatpush3.msra.mxu1 %v2953_v14  ;;  %2287 = vmatprep.mubr.msk.f32.mxu1 %vm2512_vm0, %v2511_v0  ;;  %v1168_v14 = vld [vmem:[#allocation4 + $0x68] sm:$0xff] }
 0xcb1   :  { %2257 = vmatprep.subr.mxu1 %v2511_v0 }
 0xcb2   :  { %2258 = vmatpush3.msra.mxu1 %v2959_v15 }
 0xcb3   :  { %2259 = vmatprep.subr.mxu1 %v2511_v0 }
 0xcb4   :  { %2260 = vmatpush3.msra.mxu1 %v2963_v26 }
 0xcb5   :  { %2261 = vmatprep.subr.mxu1 %v2511_v0 }
 0xcb6   :  { %2262 = vmatpush3.msra.mxu1 %v2967_v27 }
 0xcb7   :  { %2263 = vmatprep.subr.mxu1 %v2511_v0 }
 0xcb8   :  { %2264 = vmatpush3.msra.mxu1 %v2971_v28 }
 0xcb9   :  { %2265 = vmatprep.subr.mxu1 %v2511_v0 }
 0xcba   :  { %2266 = vmatpush3.msra.mxu1 %v2975_v29 }
 0xcbb   :  { %2267 = vmatprep.subr.mxu1 %v2511_v0 }
 0xcbc   :  { %2268 = vmatpush3.msra.mxu1 %v2979_v30 }
 0xcbd   :  { %2269 = vmatprep.subr.mxu1 %v2511_v0 }
 0xcbe   :  { %2270 = vmatpush3.msra.mxu1 %v2983_v31 }
 0xcbf   :  { %2271 = vmatprep.subr.mxu1 %v2511_v0 }
 0xcc0   :  { %2272 = vmatpush3.msra.mxu1 %v2987_v32 }
 0xcc1   :  { %2273 = vmatprep.subr.mxu1 %v2511_v0 }
 0xcc2   :  { %2274 = vmatpush3.msra.mxu1 %v2991_v33 }
 0xcc3   :  { %2275 = vmatprep.subr.mxu1 %v2511_v0 }
 0xcc4   :  { %2276 = vmatpush3.msra.mxu1 %v2995_v34 }
 0xcc5   :  { %2277 = vmatprep.subr.mxu1 %v2511_v0 }
 0xcc6   :  { %2278 = vmatpush3.msra.mxu1 %v2999_v35 }
 0xcc7   :  { %2279 = vmatprep.subr.mxu1 %v2511_v0 }
 0xcc8   :  { %2280 = vmatpush3.msra.mxu1 %v3003_v36 }
 0xcc9   :  { %2281 = vmatprep.subr.mxu1 %v2511_v0 }
 0xcca   :  { %2282 = vmatpush3.msra.mxu1 %v3007_v37 }
 0xccb   :  { %2283 = vmatprep.subr.mxu1 %v2511_v0 }
 0xccc   :  { %2284 = vmatpush3.msra.mxu1 %v3011_v38 }
 0xccd   :  { %2285 = vmatprep.subr.mxu1 %v2511_v0  ;;  %v1253_v0 = vld [vmem:[#allocation4 + $0x70] sm:$0xff] }
 0xcce   :  { %2286 = vmatpush3.msra.mxu1 %v3050_v51 }
 0xd6f   :  { %v1235_v15 = vpop.f32.mrf.mxu1 }
 0xd70   :  { %v1236_v26 = vadd.f32 %v1235_v15, %v1168_v14 }
 0xd71   :  { %v2219_v27 = vpop.f32.mrf.mxu1 }
 0xd72   :  { %v1455_v28 = vmul.f32 -1.442695, %v1236_v26 }
 0xd74   :  { %2401 = vpow2.f32 %v1455_v28 }
 0xd75   :  { %2403 = vtanh.f32 %v1236_v26 }
 0xd81   :  { %v2402_v29 = vpop.eup %2401 }
 0xd82   :  { %v1242_v30 = vadd.f32 1.0, %v2402_v29  ;;  %v2404_v31 = vpop.eup %2403 }
 0xd83   :  { %v1246_v32 = vadd.f32 %v2404_v31, %v1162_v41 }
 0xd84   :  { %2405 = vrcp.f32 %v1242_v30 }
 0xd91   :  { %v2406_v33 = vpop.eup %2405 }
 0xd92   :  { %v1247_v34 = vmul.f32 %v2406_v33, %v1246_v32 }
 0xd94   :  { %2407 = vtanh.f32 %v1247_v34 }
 0xda1   :  { %v2408_v35 = vpop.eup %2407 }
 0xda2   :  { %v1249_v36 = vmul.f32 %v2408_v35, %v2406_v33 }
 0xda4   :  { %1251 = vst [vmem:[#allocation9 + $0x68] sm:$0xff] %v1249_v36  ;;  %2253 = vmatmul.mubr.f32.vlgmr.msra.gmra.mxu0 %v1249_v36 }
 0xe64   :  { %v1320_v37 = vpop.f32.mrf.mxu0 }
 0xe65   :  { %v1321_v38 = vadd.f32 %v1320_v37, %v1253_v0 }
 0xe66   :  { %v2254_v44 = vpop.f32.mrf.mxu0 }
 0xe67   :  { %v1456_v45 = vmul.f32 -1.442695, %v1321_v38 }
 0xe69   :  { %2409 = vpow2.f32 %v1456_v45 }
 0xe6a   :  { %2411 = vtanh.f32 %v1321_v38 }
 0xe76   :  { %v2410_v46 = vpop.eup %2409 }
 0xe77   :  { %v1327_v47 = vadd.f32 1.0, %v2410_v46  ;;  %v2412_v48 = vpop.eup %2411 }
 0xe78   :  { %v1331_v49 = vadd.f32 %v2412_v48, %v1247_v34 }
 0xe79   :  { %2413 = vrcp.f32 %v1327_v47 }
 0xe86   :  { %v2414_v50 = vpop.eup %2413 }
 0xe87   :  { %v1332_v16 = vmul.f32 %v2414_v50, %v1331_v49 }
 0xe89   :  { %2415 = vtanh.f32 %v1332_v16 }
 0xe96   :  { %v2416_v51 = vpop.eup %2415 }
 0xe97   :  { %v1334_v52 = vmul.f32 %v2416_v51, %v2414_v50 }
 0xe99   :  { %1336 = vst [vmem:[#allocation9 + $0x70] sm:$0xff] %v1334_v52  ;;  %2288 = vmatmul.mubr.f32.vlgmr.msra.gmra.mxu1 %v1334_v52 }
 0xf59   :  { %v1405_v54 = vpop.f32.mrf.mxu1 }
 0xf5a   :  { %v1406_v55 = vadd.f32 %v1405_v54, %v1338_v53 }
 0xf5b   :  { %v2289_v56 = vpop.f32.mrf.mxu1 }
 0xf5c   :  { %v1457_v57 = vmul.f32 -1.442695, %v1406_v55 }
 0xf5e   :  { %2417 = vpow2.f32 %v1457_v57 }
 0xf5f   :  { %2419 = vtanh.f32 %v1406_v55 }
 0xf6b   :  { %v2418_v58 = vpop.eup %2417 }
 0xf6c   :  { %v1412_v59 = vadd.f32 1.0, %v2418_v58  ;;  %v2420_v60 = vpop.eup %2419 }
 0xf6d   :  { %v1416_v61 = vadd.f32 %v2420_v60, %v1332_v16 }
 0xf6e   :  { %2421 = vrcp.f32 %v1412_v59 }
 0xf7b   :  { %v2422_v62 = vpop.eup %2421 }
 0xf7c   :  { %v1417_v63 = vmul.f32 %v2422_v62, %v1416_v61 }
 0xf7e   :  { %2423 = vtanh.f32 %v1417_v63 }
 0xf8b   :  { %v2424_v17 = vpop.eup %2423 }
 0xf8c   :  { %v1419_v18 = vmul.f32 %v2424_v17, %v2422_v62 }
 0xf8e   :  { %1421 = vst [vmem:[#allocation9 + $0x78] sm:$0xff] %v1419_v18 }
 0xf8f   :  { %2492 = shalt.err (!%p2489_p0)
}
 0xf90   :  { %1435 = dma.vmem_to_hbm [thread:$0]  %s1430_s1, 2048, %s3162_s2, [#allocation6], %s2508_s12, %s2508_s12, %s2509_s13  }
 0xf91   :  { %2505 = dma.done.wait [#allocation6], 2048  }
 0xf92   :  { %2506 = vsyncadd [#allocation6], 4294965248 }
 0xf93   :  { %1439 = vsyncpa [#allocation5], 1 }
 0xf94   :  { %1440 = vsyncpa [#allocation8], 1 }
 0xf95   :  { %1441 = vsyncpa [#allocation6], 1 }

</bundles_post_ra>
